<compile_context>
chip_gen: v5e
topology: v5e:2x2
jax: 0.10.0
libtpu: 0.0.40
codegen_flags: <defaults>
</compile_context>

<pallas_src>
import jax
import jax.numpy as jnp
from jax.experimental import pallas as pl
from jax.experimental.pallas import tpu as pltpu

INPUT_SIZE = 4
HIDDEN_SIZE = 64
NUM_LAYERS = 2
OUTPUT_SIZE = 4
FC_HIDDEN = 32


# ----------------------------------------------------------------------------
# Pallas kernel.
# Inputs (all resident in VMEM, no grid — everything is < 256 KiB):
#   x_ref    : (T, B, I)   time-major input (layout plumbing only in wrapper).
#   wih0_ref : (I, 4H)     layer-0 input weights^T, gate order (i, f, o, g).
#   b0_ref   : (1, 4H)     b_ih0 + b_hh0, reordered.
#   wa_ref   : (H, 8H)     fused [W_ih1^T | W_hh0^T], reordered.
#   wb_ref   : (H, 4H)     W_hh1^T, reordered.
#   b1_ref   : (1, 4H)     b_ih1 + b_hh1, reordered.
#   wfc1_ref : (H, 32), bfc1_ref: (1, 32), wfc2_ref: (32, 4), bfc2_ref: (1, 4)
# ----------------------------------------------------------------------------
def lstm_kernel(x_ref, wih0_ref, b0_ref, wa_ref, wb_ref, b1_ref,
                wfc1_ref, bfc1_ref, wfc2_ref, bfc2_ref, out_ref):
    T, B, _ = x_ref.shape
    H = HIDDEN_SIZE
    G = 4 * H

    # Small loop-invariant biases (4 vregs total) — cheap to keep live.
    b0 = b0_ref[...]          # (1, 4H)
    b1 = b1_ref[...]          # (1, 4H)

    def cell(gates, c):
        # Gate order (i, f, o, g).  sigmoid over both full 128-lane vregs and
        # tanh over the whole second vreg -> no masked partial-vreg EUP ops;
        # the redundant lanes are free (EUP is its own bundle slot).
        sig = jax.nn.sigmoid(gates)                    # (B, 4H)
        g = jnp.tanh(gates[:, 2 * H:])[:, H:]          # tanh([o|g]) -> take g
        i = sig[:, 0 * H:1 * H]
        f = sig[:, 1 * H:2 * H]
        o = sig[:, 2 * H:3 * H]
        c_new = f * c + i * g
        h_new = o * jnp.tanh(c_new)
        return h_new, c_new

    zeros_h = jnp.zeros((B, H), jnp.float32)
    h1 = zeros_h
    c0 = zeros_h
    c1 = zeros_h
    # Recurrent part of layer-0 gates, h0(t-1) @ W_hh0^T; zero at t=0.
    h0rec = jnp.zeros((B, G), jnp.float32)
    # Layer-1 gate contribution from h1(t-1) @ W_hh1^T; zero at t=0.
    g1_from_h1 = jnp.zeros((B, G), jnp.float32)

    # T is static and small -> fully unrolled; states live in vregs.
    for t in range(T):
        # ---- layer-0 input projection: I=4 VPU broadcast-FMAs (off the
        # recurrent chain, depends only on x).  Weights re-read from VMEM.
        x_t = x_ref[t]                                  # (B, I)
        xp = b0
        for j in range(INPUT_SIZE):
            xp = xp + x_t[:, j:j + 1] * wih0_ref[j:j + 1, :]
        # Add the late-arriving recurrent term last.
        gates0 = xp + h0rec                             # (B, 4H)
        h0, c0 = cell(gates0, c0)

        # ---- ONE serial MXU push per step: h0(t) @ [W_ih1^T | W_hh0^T].
        # Columns [0,4H) feed layer-1's gates now; columns [4H,8H) are the
        # recurrent part of NEXT step's layer-0 gates.
        fused = jnp.dot(h0, wa_ref[...],
                        preferred_element_type=jnp.float32)   # (B, 8H)
        gates1 = (g1_from_h1 + b1) + fused[:, :G]
        h0rec = fused[:, G:]

        # (Inter-layer dropout is identity in eval mode.)
        h1, c1 = cell(gates1, c1)

        # ---- h1(t) @ W_hh1^T for next step's layer-1 gates: depends only on
        # h1(t), so it is off the critical chain of the next step.
        if t + 1 < T:
            g1_from_h1 = jnp.dot(h1, wb_ref[...],
                                 preferred_element_type=jnp.float32)

    # FC head on h1(T-1): Linear(64,32) + ReLU + (eval-mode Dropout) + Linear(32,4).
    hidden = jnp.maximum(
        jnp.dot(h1, wfc1_ref[...], preferred_element_type=jnp.float32)
        + bfc1_ref[...], 0.0)
    out = (jnp.dot(hidden, wfc2_ref[...], preferred_element_type=jnp.float32)
           + bfc2_ref[...])
    out_ref[...] = out.astype(out_ref.dtype)


# ----------------------------------------------------------------------------
# Parameter construction (PyTorch layout) + packing for the kernel.
# ----------------------------------------------------------------------------
def init_raw_params(key):
    """PyTorch-layout params, U(-1/sqrt(fan), 1/sqrt(fan)), gate order i,f,g,o."""
    H, I = HIDDEN_SIZE, INPUT_SIZE
    k = 1.0 / jnp.sqrt(jnp.float32(H))
    k1 = 1.0 / jnp.sqrt(jnp.float32(H))
    k2 = 1.0 / jnp.sqrt(jnp.float32(FC_HIDDEN))
    keys = jax.random.split(key, 12)

    def u(kk, shape, bound):
        return jax.random.uniform(kk, shape, jnp.float32, -bound, bound)

    return dict(
        w_ih0=u(keys[0], (4 * H, I), k), w_hh0=u(keys[1], (4 * H, H), k),
        b_ih0=u(keys[2], (4 * H,), k), b_hh0=u(keys[3], (4 * H,), k),
        w_ih1=u(keys[4], (4 * H, H), k), w_hh1=u(keys[5], (4 * H, H), k),
        b_ih1=u(keys[6], (4 * H,), k), b_hh1=u(keys[7], (4 * H,), k),
        w_fc1=u(keys[8], (FC_HIDDEN, H), k1), b_fc1=u(keys[9], (FC_HIDDEN,), k1),
        w_fc2=u(keys[10], (OUTPUT_SIZE, FC_HIDDEN), k2),
        b_fc2=u(keys[11], (OUTPUT_SIZE,), k2),
    )


def _reorder_gates(w):
    """Permute gate blocks along axis 0: PyTorch (i,f,g,o) -> kernel (i,f,o,g)."""
    H = HIDDEN_SIZE
    return jnp.concatenate([w[:2 * H], w[3 * H:4 * H], w[2 * H:3 * H]], axis=0)


def pack_params(raw):
    """Pre-transpose / fuse / reorder weights for the kernel."""
    H = HIDDEN_SIZE
    wih0_t = _reorder_gates(raw["w_ih0"]).T                      # (I, 4H)
    b0 = _reorder_gates(raw["b_ih0"] + raw["b_hh0"]).reshape(1, 4 * H)
    # Fused RHS for the single serial per-step matmul:
    #   cols [0, 4H)  = W_ih1^T  (layer-1 gates from h0(t))
    #   cols [4H, 8H) = W_hh0^T  (layer-0 recurrent gates for step t+1)
    wa = jnp.concatenate([_reorder_gates(raw["w_ih1"]).T,
                          _reorder_gates(raw["w_hh0"]).T], axis=1)  # (H, 8H)
    wb = _reorder_gates(raw["w_hh1"]).T                           # (H, 4H)
    b1 = _reorder_gates(raw["b_ih1"] + raw["b_hh1"]).reshape(1, 4 * H)
    wfc1_t = raw["w_fc1"].T                                       # (H, 32)
    bfc1 = raw["b_fc1"].reshape(1, FC_HIDDEN)
    wfc2_t = raw["w_fc2"].T                                       # (32, 4)
    bfc2 = raw["b_fc2"].reshape(1, OUTPUT_SIZE)
    return (wih0_t, b0, wa, wb, b1, wfc1_t, bfc1, wfc2_t, bfc2)


# ----------------------------------------------------------------------------
# Wrapper: layout plumbing only (batch_first -> time-major transpose of the
# tiny input); ALL compute, including the layer-0 input projection, happens
# inside the single pallas_call.
# ----------------------------------------------------------------------------
def water_quality_lstm_forward(x, kparams):
    """x: (B, T, I) batch_first, same as the PyTorch module."""
    (wih0_t, b0, wa, wb, b1, wfc1_t, bfc1, wfc2_t, bfc2) = kparams
    B, T, _ = x.shape
    x_tm = jnp.transpose(x.astype(jnp.float32), (1, 0, 2))        # (T, B, I)

    vmem = pl.BlockSpec(memory_space=pltpu.MemorySpace.VMEM)
    kernel_inputs = (x_tm, wih0_t, b0, wa, wb, b1, wfc1_t, bfc1, wfc2_t, bfc2)
    return pl.pallas_call(
        lstm_kernel,
        out_shape=jax.ShapeDtypeStruct((B, OUTPUT_SIZE), jnp.float32),
        in_specs=[vmem] * len(kernel_inputs),
        out_specs=vmem,
    )(*kernel_inputs)


water_quality_lstm_forward_jit = jax.jit(water_quality_lstm_forward)


# ----------------------------------------------------------------------------
# Pure-JAX reference with the ORIGINAL (unfused, i,f,g,o) PyTorch formulation,
# used to verify the gate-reordering / weight-fusion packing.
# ----------------------------------------------------------------------------
def reference_forward(x, raw):
    H = HIDDEN_SIZE
    B, T, _ = x.shape
    xf = x.astype(jnp.float32)
    h0 = jnp.zeros((B, H), jnp.float32)
    c0 = jnp.zeros((B, H), jnp.float32)
    h1 = jnp.zeros((B, H), jnp.float32)
    c1 = jnp.zeros((B, H), jnp.float32)
    b0 = raw["b_ih0"] + raw["b_hh0"]
    b1 = raw["b_ih1"] + raw["b_hh1"]

    def cell(x_t, h, c, wih, whh, b):
        g = x_t @ wih.T + h @ whh.T + b
        i = jax.nn.sigmoid(g[:, 0 * H:1 * H])
        f = jax.nn.sigmoid(g[:, 1 * H:2 * H])
        gg = jnp.tanh(g[:, 2 * H:3 * H])
        o = jax.nn.sigmoid(g[:, 3 * H:4 * H])
        c_new = f * c + i * gg
        return o * jnp.tanh(c_new), c_new

    for t in range(T):
        h0, c0 = cell(xf[:, t, :], h0, c0, raw["w_ih0"], raw["w_hh0"], b0)
        h1, c1 = cell(h0, h1, c1, raw["w_ih1"], raw["w_hh1"], b1)

    hid = jnp.maximum(h1 @ raw["w_fc1"].T + raw["b_fc1"], 0.0)
    return hid @ raw["w_fc2"].T + raw["b_fc2"]


if __name__ == "__main__":
    key = jax.random.PRNGKey(0)
    k_x, k_p = jax.random.split(key)

    B, T = 2, 8
    x = jax.random.normal(k_x, (B, T, INPUT_SIZE), jnp.float32)

    raw_params = init_raw_params(k_p)
    kernel_params = pack_params(raw_params)

    out = jax.block_until_ready(water_quality_lstm_forward_jit(x, kernel_params))
    ref = jax.block_until_ready(reference_forward(x, raw_params))

    assert out.shape == (B, OUTPUT_SIZE)
    assert jnp.allclose(out, ref, rtol=1e-3, atol=1e-4), (out, ref)

    print("KERNEL_OK")
</pallas_src>

<mosaic_0001>
module attributes {stable_mosaic.version = 11 : i64} {
  func.func @lstm_kernel(%arg0: memref<8x2x4xf32, #tpu.memory_space<vmem>>, %arg1: memref<4x256xf32, #tpu.memory_space<vmem>>, %arg2: memref<1x256xf32, #tpu.memory_space<vmem>>, %arg3: memref<64x512xf32, #tpu.memory_space<vmem>>, %arg4: memref<64x256xf32, #tpu.memory_space<vmem>>, %arg5: memref<1x256xf32, #tpu.memory_space<vmem>>, %arg6: memref<64x32xf32, #tpu.memory_space<vmem>>, %arg7: memref<1x32xf32, #tpu.memory_space<vmem>>, %arg8: memref<32x4xf32, #tpu.memory_space<vmem>>, %arg9: memref<1x4xf32, #tpu.memory_space<vmem>>, %arg10: memref<2x4xf32, #tpu.memory_space<vmem>>) attributes {dimension_semantics = [], scalar_prefetch = 0 : i64, scratch_operands = 0 : i64, tpu.core_type = #tpu.core_type<tc>} {
    %c0 = arith.constant 0 : index
    %c0_0 = arith.constant 0 : index
    %0 = vector.load %arg2[%c0, %c0_0] : memref<1x256xf32, #tpu.memory_space<vmem>>, vector<1x256xf32>
    %c0_1 = arith.constant 0 : index
    %c0_2 = arith.constant 0 : index
    %1 = vector.load %arg5[%c0_1, %c0_2] : memref<1x256xf32, #tpu.memory_space<vmem>>, vector<1x256xf32>
    %cst = arith.constant 0.000000e+00 : f32
    %2 = vector.broadcast %cst : f32 to vector<2x64xf32>
    %cst_3 = arith.constant 0.000000e+00 : f32
    %3 = vector.broadcast %cst_3 : f32 to vector<2x256xf32>
    %cst_4 = arith.constant 0.000000e+00 : f32
    %4 = vector.broadcast %cst_4 : f32 to vector<2x256xf32>
    %c0_5 = arith.constant 0 : index
    %c0_6 = arith.constant 0 : index
    %c0_7 = arith.constant 0 : index
    %5 = vector.load %arg0[%c0_5, %c0_6, %c0_7] : memref<8x2x4xf32, #tpu.memory_space<vmem>>, vector<1x2x4xf32>
    %6 = vector.shape_cast %5 : vector<1x2x4xf32> to vector<2x4xf32>
    %7 = vector.extract_strided_slice %6 {offsets = [0, 0], sizes = [2, 1], strides = [1, 1]} : vector<2x4xf32> to vector<2x1xf32>
    %c0_8 = arith.constant 0 : index
    %c0_9 = arith.constant 0 : index
    %8 = vector.load %arg1[%c0_8, %c0_9] : memref<4x256xf32, #tpu.memory_space<vmem>>, vector<1x256xf32>
    %9 = vector.broadcast %7 : vector<2x1xf32> to vector<2x256xf32>
    %10 = vector.broadcast %8 : vector<1x256xf32> to vector<2x256xf32>
    %11 = arith.mulf %9, %10 : vector<2x256xf32>
    %12 = vector.broadcast %0 : vector<1x256xf32> to vector<2x256xf32>
    %13 = arith.addf %12, %11 : vector<2x256xf32>
    %14 = vector.extract_strided_slice %6 {offsets = [0, 1], sizes = [2, 1], strides = [1, 1]} : vector<2x4xf32> to vector<2x1xf32>
    %c1 = arith.constant 1 : index
    %c0_10 = arith.constant 0 : index
    %15 = vector.load %arg1[%c1, %c0_10] : memref<4x256xf32, #tpu.memory_space<vmem>>, vector<1x256xf32>
    %16 = vector.broadcast %14 : vector<2x1xf32> to vector<2x256xf32>
    %17 = vector.broadcast %15 : vector<1x256xf32> to vector<2x256xf32>
    %18 = arith.mulf %16, %17 : vector<2x256xf32>
    %19 = arith.addf %13, %18 : vector<2x256xf32>
    %20 = vector.extract_strided_slice %6 {offsets = [0, 2], sizes = [2, 1], strides = [1, 1]} : vector<2x4xf32> to vector<2x1xf32>
    %c2 = arith.constant 2 : index
    %c0_11 = arith.constant 0 : index
    %21 = vector.load %arg1[%c2, %c0_11] : memref<4x256xf32, #tpu.memory_space<vmem>>, vector<1x256xf32>
    %22 = vector.broadcast %20 : vector<2x1xf32> to vector<2x256xf32>
    %23 = vector.broadcast %21 : vector<1x256xf32> to vector<2x256xf32>
    %24 = arith.mulf %22, %23 : vector<2x256xf32>
    %25 = arith.addf %19, %24 : vector<2x256xf32>
    %26 = vector.extract_strided_slice %6 {offsets = [0, 3], sizes = [2, 1], strides = [1, 1]} : vector<2x4xf32> to vector<2x1xf32>
    %c3 = arith.constant 3 : index
    %c0_12 = arith.constant 0 : index
    %27 = vector.load %arg1[%c3, %c0_12] : memref<4x256xf32, #tpu.memory_space<vmem>>, vector<1x256xf32>
    %28 = vector.broadcast %26 : vector<2x1xf32> to vector<2x256xf32>
    %29 = vector.broadcast %27 : vector<1x256xf32> to vector<2x256xf32>
    %30 = arith.mulf %28, %29 : vector<2x256xf32>
    %31 = arith.addf %25, %30 : vector<2x256xf32>
    %32 = arith.addf %31, %3 : vector<2x256xf32>
    %33 = arith.negf %32 : vector<2x256xf32>
    %34 = math.exp %33 : vector<2x256xf32>
    %cst_13 = arith.constant 1.000000e+00 : f32
    %35 = vector.broadcast %cst_13 : f32 to vector<2x256xf32>
    %36 = arith.addf %35, %34 : vector<2x256xf32>
    %37 = arith.divf %35, %36 : vector<2x256xf32>
    %38 = vector.extract_strided_slice %32 {offsets = [0, 128], sizes = [2, 128], strides = [1, 1]} : vector<2x256xf32> to vector<2x128xf32>
    %39 = math.tanh %38 : vector<2x128xf32>
    %40 = vector.extract_strided_slice %39 {offsets = [0, 64], sizes = [2, 64], strides = [1, 1]} : vector<2x128xf32> to vector<2x64xf32>
    %41 = vector.extract_strided_slice %37 {offsets = [0, 0], sizes = [2, 64], strides = [1, 1]} : vector<2x256xf32> to vector<2x64xf32>
    %42 = vector.extract_strided_slice %37 {offsets = [0, 64], sizes = [2, 64], strides = [1, 1]} : vector<2x256xf32> to vector<2x64xf32>
    %43 = vector.extract_strided_slice %37 {offsets = [0, 128], sizes = [2, 64], strides = [1, 1]} : vector<2x256xf32> to vector<2x64xf32>
    %44 = arith.mulf %42, %2 : vector<2x64xf32>
    %45 = arith.mulf %41, %40 : vector<2x64xf32>
    %46 = arith.addf %44, %45 : vector<2x64xf32>
    %47 = math.tanh %46 : vector<2x64xf32>
    %48 = arith.mulf %43, %47 : vector<2x64xf32>
    %c0_14 = arith.constant 0 : index
    %c0_15 = arith.constant 0 : index
    %49 = vector.load %arg3[%c0_14, %c0_15] : memref<64x512xf32, #tpu.memory_space<vmem>>, vector<64x512xf32>
    %cst_16 = arith.constant dense<0.000000e+00> : vector<2x512xf32>
    %50 = tpu.matmul %48, %49, %cst_16 {dimension_numbers = #tpu.dot_dimension_numbers<[1], [0], [0], [1], [0, 0, 1, 1], [], []>} : vector<2x64xf32>, vector<64x512xf32>, vector<2x512xf32> -> vector<2x512xf32>
    %51 = vector.broadcast %1 : vector<1x256xf32> to vector<2x256xf32>
    %52 = arith.addf %4, %51 : vector<2x256xf32>
    %53 = vector.extract_strided_slice %50 {offsets = [0, 0], sizes = [2, 256], strides = [1, 1]} : vector<2x512xf32> to vector<2x256xf32>
    %54 = arith.addf %52, %53 : vector<2x256xf32>
    %55 = vector.extract_strided_slice %50 {offsets = [0, 256], sizes = [2, 256], strides = [1, 1]} : vector<2x512xf32> to vector<2x256xf32>
    %56 = arith.negf %54 : vector<2x256xf32>
    %57 = math.exp %56 : vector<2x256xf32>
    %cst_17 = arith.constant 1.000000e+00 : f32
    %58 = vector.broadcast %cst_17 : f32 to vector<2x256xf32>
    %59 = arith.addf %58, %57 : vector<2x256xf32>
    %60 = arith.divf %58, %59 : vector<2x256xf32>
    %61 = vector.extract_strided_slice %54 {offsets = [0, 128], sizes = [2, 128], strides = [1, 1]} : vector<2x256xf32> to vector<2x128xf32>
    %62 = math.tanh %61 : vector<2x128xf32>
    %63 = vector.extract_strided_slice %62 {offsets = [0, 64], sizes = [2, 64], strides = [1, 1]} : vector<2x128xf32> to vector<2x64xf32>
    %64 = vector.extract_strided_slice %60 {offsets = [0, 0], sizes = [2, 64], strides = [1, 1]} : vector<2x256xf32> to vector<2x64xf32>
    %65 = vector.extract_strided_slice %60 {offsets = [0, 64], sizes = [2, 64], strides = [1, 1]} : vector<2x256xf32> to vector<2x64xf32>
    %66 = vector.extract_strided_slice %60 {offsets = [0, 128], sizes = [2, 64], strides = [1, 1]} : vector<2x256xf32> to vector<2x64xf32>
    %67 = arith.mulf %65, %2 : vector<2x64xf32>
    %68 = arith.mulf %64, %63 : vector<2x64xf32>
    %69 = arith.addf %67, %68 : vector<2x64xf32>
    %70 = math.tanh %69 : vector<2x64xf32>
    %71 = arith.mulf %66, %70 : vector<2x64xf32>
    %c0_18 = arith.constant 0 : index
    %c0_19 = arith.constant 0 : index
    %72 = vector.load %arg4[%c0_18, %c0_19] : memref<64x256xf32, #tpu.memory_space<vmem>>, vector<64x256xf32>
    %cst_20 = arith.constant dense<0.000000e+00> : vector<2x256xf32>
    %73 = tpu.matmul %71, %72, %cst_20 {dimension_numbers = #tpu.dot_dimension_numbers<[1], [0], [0], [1], [0, 0, 1, 1], [], []>} : vector<2x64xf32>, vector<64x256xf32>, vector<2x256xf32> -> vector<2x256xf32>
    %c1_21 = arith.constant 1 : index
    %c0_22 = arith.constant 0 : index
    %c0_23 = arith.constant 0 : index
    %74 = vector.load %arg0[%c1_21, %c0_22, %c0_23] : memref<8x2x4xf32, #tpu.memory_space<vmem>>, vector<1x2x4xf32>
    %75 = vector.shape_cast %74 : vector<1x2x4xf32> to vector<2x4xf32>
    %76 = vector.extract_strided_slice %75 {offsets = [0, 0], sizes = [2, 1], strides = [1, 1]} : vector<2x4xf32> to vector<2x1xf32>
    %c0_24 = arith.constant 0 : index
    %c0_25 = arith.constant 0 : index
    %77 = vector.load %arg1[%c0_24, %c0_25] : memref<4x256xf32, #tpu.memory_space<vmem>>, vector<1x256xf32>
    %78 = vector.broadcast %76 : vector<2x1xf32> to vector<2x256xf32>
    %79 = vector.broadcast %77 : vector<1x256xf32> to vector<2x256xf32>
    %80 = arith.mulf %78, %79 : vector<2x256xf32>
    %81 = vector.broadcast %0 : vector<1x256xf32> to vector<2x256xf32>
    %82 = arith.addf %81, %80 : vector<2x256xf32>
    %83 = vector.extract_strided_slice %75 {offsets = [0, 1], sizes = [2, 1], strides = [1, 1]} : vector<2x4xf32> to vector<2x1xf32>
    %c1_26 = arith.constant 1 : index
    %c0_27 = arith.constant 0 : index
    %84 = vector.load %arg1[%c1_26, %c0_27] : memref<4x256xf32, #tpu.memory_space<vmem>>, vector<1x256xf32>
    %85 = vector.broadcast %83 : vector<2x1xf32> to vector<2x256xf32>
    %86 = vector.broadcast %84 : vector<1x256xf32> to vector<2x256xf32>
    %87 = arith.mulf %85, %86 : vector<2x256xf32>
    %88 = arith.addf %82, %87 : vector<2x256xf32>
    %89 = vector.extract_strided_slice %75 {offsets = [0, 2], sizes = [2, 1], strides = [1, 1]} : vector<2x4xf32> to vector<2x1xf32>
    %c2_28 = arith.constant 2 : index
    %c0_29 = arith.constant 0 : index
    %90 = vector.load %arg1[%c2_28, %c0_29] : memref<4x256xf32, #tpu.memory_space<vmem>>, vector<1x256xf32>
    %91 = vector.broadcast %89 : vector<2x1xf32> to vector<2x256xf32>
    %92 = vector.broadcast %90 : vector<1x256xf32> to vector<2x256xf32>
    %93 = arith.mulf %91, %92 : vector<2x256xf32>
    %94 = arith.addf %88, %93 : vector<2x256xf32>
    %95 = vector.extract_strided_slice %75 {offsets = [0, 3], sizes = [2, 1], strides = [1, 1]} : vector<2x4xf32> to vector<2x1xf32>
    %c3_30 = arith.constant 3 : index
    %c0_31 = arith.constant 0 : index
    %96 = vector.load %arg1[%c3_30, %c0_31] : memref<4x256xf32, #tpu.memory_space<vmem>>, vector<1x256xf32>
    %97 = vector.broadcast %95 : vector<2x1xf32> to vector<2x256xf32>
    %98 = vector.broadcast %96 : vector<1x256xf32> to vector<2x256xf32>
    %99 = arith.mulf %97, %98 : vector<2x256xf32>
    %100 = arith.addf %94, %99 : vector<2x256xf32>
    %101 = arith.addf %100, %55 : vector<2x256xf32>
    %102 = arith.negf %101 : vector<2x256xf32>
    %103 = math.exp %102 : vector<2x256xf32>
    %cst_32 = arith.constant 1.000000e+00 : f32
    %104 = vector.broadcast %cst_32 : f32 to vector<2x256xf32>
    %105 = arith.addf %104, %103 : vector<2x256xf32>
    %106 = arith.divf %104, %105 : vector<2x256xf32>
    %107 = vector.extract_strided_slice %101 {offsets = [0, 128], sizes = [2, 128], strides = [1, 1]} : vector<2x256xf32> to vector<2x128xf32>
    %108 = math.tanh %107 : vector<2x128xf32>
    %109 = vector.extract_strided_slice %108 {offsets = [0, 64], sizes = [2, 64], strides = [1, 1]} : vector<2x128xf32> to vector<2x64xf32>
    %110 = vector.extract_strided_slice %106 {offsets = [0, 0], sizes = [2, 64], strides = [1, 1]} : vector<2x256xf32> to vector<2x64xf32>
    %111 = vector.extract_strided_slice %106 {offsets = [0, 64], sizes = [2, 64], strides = [1, 1]} : vector<2x256xf32> to vector<2x64xf32>
    %112 = vector.extract_strided_slice %106 {offsets = [0, 128], sizes = [2, 64], strides = [1, 1]} : vector<2x256xf32> to vector<2x64xf32>
    %113 = arith.mulf %111, %46 : vector<2x64xf32>
    %114 = arith.mulf %110, %109 : vector<2x64xf32>
    %115 = arith.addf %113, %114 : vector<2x64xf32>
    %116 = math.tanh %115 : vector<2x64xf32>
    %117 = arith.mulf %112, %116 : vector<2x64xf32>
    %c0_33 = arith.constant 0 : index
    %c0_34 = arith.constant 0 : index
    %118 = vector.load %arg3[%c0_33, %c0_34] : memref<64x512xf32, #tpu.memory_space<vmem>>, vector<64x512xf32>
    %cst_35 = arith.constant dense<0.000000e+00> : vector<2x512xf32>
    %119 = tpu.matmul %117, %118, %cst_35 {dimension_numbers = #tpu.dot_dimension_numbers<[1], [0], [0], [1], [0, 0, 1, 1], [], []>} : vector<2x64xf32>, vector<64x512xf32>, vector<2x512xf32> -> vector<2x512xf32>
    %120 = vector.broadcast %1 : vector<1x256xf32> to vector<2x256xf32>
    %121 = arith.addf %73, %120 : vector<2x256xf32>
    %122 = vector.extract_strided_slice %119 {offsets = [0, 0], sizes = [2, 256], strides = [1, 1]} : vector<2x512xf32> to vector<2x256xf32>
    %123 = arith.addf %121, %122 : vector<2x256xf32>
    %124 = vector.extract_strided_slice %119 {offsets = [0, 256], sizes = [2, 256], strides = [1, 1]} : vector<2x512xf32> to vector<2x256xf32>
    %125 = arith.negf %123 : vector<2x256xf32>
    %126 = math.exp %125 : vector<2x256xf32>
    %cst_36 = arith.constant 1.000000e+00 : f32
    %127 = vector.broadcast %cst_36 : f32 to vector<2x256xf32>
    %128 = arith.addf %127, %126 : vector<2x256xf32>
    %129 = arith.divf %127, %128 : vector<2x256xf32>
    %130 = vector.extract_strided_slice %123 {offsets = [0, 128], sizes = [2, 128], strides = [1, 1]} : vector<2x256xf32> to vector<2x128xf32>
    %131 = math.tanh %130 : vector<2x128xf32>
    %132 = vector.extract_strided_slice %131 {offsets = [0, 64], sizes = [2, 64], strides = [1, 1]} : vector<2x128xf32> to vector<2x64xf32>
    %133 = vector.extract_strided_slice %129 {offsets = [0, 0], sizes = [2, 64], strides = [1, 1]} : vector<2x256xf32> to vector<2x64xf32>
    %134 = vector.extract_strided_slice %129 {offsets = [0, 64], sizes = [2, 64], strides = [1, 1]} : vector<2x256xf32> to vector<2x64xf32>
    %135 = vector.extract_strided_slice %129 {offsets = [0, 128], sizes = [2, 64], strides = [1, 1]} : vector<2x256xf32> to vector<2x64xf32>
    %136 = arith.mulf %134, %69 : vector<2x64xf32>
    %137 = arith.mulf %133, %132 : vector<2x64xf32>
    %138 = arith.addf %136, %137 : vector<2x64xf32>
    %139 = math.tanh %138 : vector<2x64xf32>
    %140 = arith.mulf %135, %139 : vector<2x64xf32>
    %c0_37 = arith.constant 0 : index
    %c0_38 = arith.constant 0 : index
    %141 = vector.load %arg4[%c0_37, %c0_38] : memref<64x256xf32, #tpu.memory_space<vmem>>, vector<64x256xf32>
    %cst_39 = arith.constant dense<0.000000e+00> : vector<2x256xf32>
    %142 = tpu.matmul %140, %141, %cst_39 {dimension_numbers = #tpu.dot_dimension_numbers<[1], [0], [0], [1], [0, 0, 1, 1], [], []>} : vector<2x64xf32>, vector<64x256xf32>, vector<2x256xf32> -> vector<2x256xf32>
    %c2_40 = arith.constant 2 : index
    %c0_41 = arith.constant 0 : index
    %c0_42 = arith.constant 0 : index
    %143 = vector.load %arg0[%c2_40, %c0_41, %c0_42] : memref<8x2x4xf32, #tpu.memory_space<vmem>>, vector<1x2x4xf32>
    %144 = vector.shape_cast %143 : vector<1x2x4xf32> to vector<2x4xf32>
    %145 = vector.extract_strided_slice %144 {offsets = [0, 0], sizes = [2, 1], strides = [1, 1]} : vector<2x4xf32> to vector<2x1xf32>
    %c0_43 = arith.constant 0 : index
    %c0_44 = arith.constant 0 : index
    %146 = vector.load %arg1[%c0_43, %c0_44] : memref<4x256xf32, #tpu.memory_space<vmem>>, vector<1x256xf32>
    %147 = vector.broadcast %145 : vector<2x1xf32> to vector<2x256xf32>
    %148 = vector.broadcast %146 : vector<1x256xf32> to vector<2x256xf32>
    %149 = arith.mulf %147, %148 : vector<2x256xf32>
    %150 = vector.broadcast %0 : vector<1x256xf32> to vector<2x256xf32>
    %151 = arith.addf %150, %149 : vector<2x256xf32>
    %152 = vector.extract_strided_slice %144 {offsets = [0, 1], sizes = [2, 1], strides = [1, 1]} : vector<2x4xf32> to vector<2x1xf32>
    %c1_45 = arith.constant 1 : index
    %c0_46 = arith.constant 0 : index
    %153 = vector.load %arg1[%c1_45, %c0_46] : memref<4x256xf32, #tpu.memory_space<vmem>>, vector<1x256xf32>
    %154 = vector.broadcast %152 : vector<2x1xf32> to vector<2x256xf32>
    %155 = vector.broadcast %153 : vector<1x256xf32> to vector<2x256xf32>
    %156 = arith.mulf %154, %155 : vector<2x256xf32>
    %157 = arith.addf %151, %156 : vector<2x256xf32>
    %158 = vector.extract_strided_slice %144 {offsets = [0, 2], sizes = [2, 1], strides = [1, 1]} : vector<2x4xf32> to vector<2x1xf32>
    %c2_47 = arith.constant 2 : index
    %c0_48 = arith.constant 0 : index
    %159 = vector.load %arg1[%c2_47, %c0_48] : memref<4x256xf32, #tpu.memory_space<vmem>>, vector<1x256xf32>
    %160 = vector.broadcast %158 : vector<2x1xf32> to vector<2x256xf32>
    %161 = vector.broadcast %159 : vector<1x256xf32> to vector<2x256xf32>
    %162 = arith.mulf %160, %161 : vector<2x256xf32>
    %163 = arith.addf %157, %162 : vector<2x256xf32>
    %164 = vector.extract_strided_slice %144 {offsets = [0, 3], sizes = [2, 1], strides = [1, 1]} : vector<2x4xf32> to vector<2x1xf32>
    %c3_49 = arith.constant 3 : index
    %c0_50 = arith.constant 0 : index
    %165 = vector.load %arg1[%c3_49, %c0_50] : memref<4x256xf32, #tpu.memory_space<vmem>>, vector<1x256xf32>
    %166 = vector.broadcast %164 : vector<2x1xf32> to vector<2x256xf32>
    %167 = vector.broadcast %165 : vector<1x256xf32> to vector<2x256xf32>
    %168 = arith.mulf %166, %167 : vector<2x256xf32>
    %169 = arith.addf %163, %168 : vector<2x256xf32>
    %170 = arith.addf %169, %124 : vector<2x256xf32>
    %171 = arith.negf %170 : vector<2x256xf32>
    %172 = math.exp %171 : vector<2x256xf32>
    %cst_51 = arith.constant 1.000000e+00 : f32
    %173 = vector.broadcast %cst_51 : f32 to vector<2x256xf32>
    %174 = arith.addf %173, %172 : vector<2x256xf32>
    %175 = arith.divf %173, %174 : vector<2x256xf32>
    %176 = vector.extract_strided_slice %170 {offsets = [0, 128], sizes = [2, 128], strides = [1, 1]} : vector<2x256xf32> to vector<2x128xf32>
    %177 = math.tanh %176 : vector<2x128xf32>
    %178 = vector.extract_strided_slice %177 {offsets = [0, 64], sizes = [2, 64], strides = [1, 1]} : vector<2x128xf32> to vector<2x64xf32>
    %179 = vector.extract_strided_slice %175 {offsets = [0, 0], sizes = [2, 64], strides = [1, 1]} : vector<2x256xf32> to vector<2x64xf32>
    %180 = vector.extract_strided_slice %175 {offsets = [0, 64], sizes = [2, 64], strides = [1, 1]} : vector<2x256xf32> to vector<2x64xf32>
    %181 = vector.extract_strided_slice %175 {offsets = [0, 128], sizes = [2, 64], strides = [1, 1]} : vector<2x256xf32> to vector<2x64xf32>
    %182 = arith.mulf %180, %115 : vector<2x64xf32>
    %183 = arith.mulf %179, %178 : vector<2x64xf32>
    %184 = arith.addf %182, %183 : vector<2x64xf32>
    %185 = math.tanh %184 : vector<2x64xf32>
    %186 = arith.mulf %181, %185 : vector<2x64xf32>
    %c0_52 = arith.constant 0 : index
    %c0_53 = arith.constant 0 : index
    %187 = vector.load %arg3[%c0_52, %c0_53] : memref<64x512xf32, #tpu.memory_space<vmem>>, vector<64x512xf32>
    %cst_54 = arith.constant dense<0.000000e+00> : vector<2x512xf32>
    %188 = tpu.matmul %186, %187, %cst_54 {dimension_numbers = #tpu.dot_dimension_numbers<[1], [0], [0], [1], [0, 0, 1, 1], [], []>} : vector<2x64xf32>, vector<64x512xf32>, vector<2x512xf32> -> vector<2x512xf32>
    %189 = vector.broadcast %1 : vector<1x256xf32> to vector<2x256xf32>
    %190 = arith.addf %142, %189 : vector<2x256xf32>
    %191 = vector.extract_strided_slice %188 {offsets = [0, 0], sizes = [2, 256], strides = [1, 1]} : vector<2x512xf32> to vector<2x256xf32>
    %192 = arith.addf %190, %191 : vector<2x256xf32>
    %193 = vector.extract_strided_slice %188 {offsets = [0, 256], sizes = [2, 256], strides = [1, 1]} : vector<2x512xf32> to vector<2x256xf32>
    %194 = arith.negf %192 : vector<2x256xf32>
    %195 = math.exp %194 : vector<2x256xf32>
    %cst_55 = arith.constant 1.000000e+00 : f32
    %196 = vector.broadcast %cst_55 : f32 to vector<2x256xf32>
    %197 = arith.addf %196, %195 : vector<2x256xf32>
    %198 = arith.divf %196, %197 : vector<2x256xf32>
    %199 = vector.extract_strided_slice %192 {offsets = [0, 128], sizes = [2, 128], strides = [1, 1]} : vector<2x256xf32> to vector<2x128xf32>
    %200 = math.tanh %199 : vector<2x128xf32>
    %201 = vector.extract_strided_slice %200 {offsets = [0, 64], sizes = [2, 64], strides = [1, 1]} : vector<2x128xf32> to vector<2x64xf32>
    %202 = vector.extract_strided_slice %198 {offsets = [0, 0], sizes = [2, 64], strides = [1, 1]} : vector<2x256xf32> to vector<2x64xf32>
    %203 = vector.extract_strided_slice %198 {offsets = [0, 64], sizes = [2, 64], strides = [1, 1]} : vector<2x256xf32> to vector<2x64xf32>
    %204 = vector.extract_strided_slice %198 {offsets = [0, 128], sizes = [2, 64], strides = [1, 1]} : vector<2x256xf32> to vector<2x64xf32>
    %205 = arith.mulf %203, %138 : vector<2x64xf32>
    %206 = arith.mulf %202, %201 : vector<2x64xf32>
    %207 = arith.addf %205, %206 : vector<2x64xf32>
    %208 = math.tanh %207 : vector<2x64xf32>
    %209 = arith.mulf %204, %208 : vector<2x64xf32>
    %c0_56 = arith.constant 0 : index
    %c0_57 = arith.constant 0 : index
    %210 = vector.load %arg4[%c0_56, %c0_57] : memref<64x256xf32, #tpu.memory_space<vmem>>, vector<64x256xf32>
    %cst_58 = arith.constant dense<0.000000e+00> : vector<2x256xf32>
    %211 = tpu.matmul %209, %210, %cst_58 {dimension_numbers = #tpu.dot_dimension_numbers<[1], [0], [0], [1], [0, 0, 1, 1], [], []>} : vector<2x64xf32>, vector<64x256xf32>, vector<2x256xf32> -> vector<2x256xf32>
    %c3_59 = arith.constant 3 : index
    %c0_60 = arith.constant 0 : index
    %c0_61 = arith.constant 0 : index
    %212 = vector.load %arg0[%c3_59, %c0_60, %c0_61] : memref<8x2x4xf32, #tpu.memory_space<vmem>>, vector<1x2x4xf32>
    %213 = vector.shape_cast %212 : vector<1x2x4xf32> to vector<2x4xf32>
    %214 = vector.extract_strided_slice %213 {offsets = [0, 0], sizes = [2, 1], strides = [1, 1]} : vector<2x4xf32> to vector<2x1xf32>
    %c0_62 = arith.constant 0 : index
    %c0_63 = arith.constant 0 : index
    %215 = vector.load %arg1[%c0_62, %c0_63] : memref<4x256xf32, #tpu.memory_space<vmem>>, vector<1x256xf32>
    %216 = vector.broadcast %214 : vector<2x1xf32> to vector<2x256xf32>
    %217 = vector.broadcast %215 : vector<1x256xf32> to vector<2x256xf32>
    %218 = arith.mulf %216, %217 : vector<2x256xf32>
    %219 = vector.broadcast %0 : vector<1x256xf32> to vector<2x256xf32>
    %220 = arith.addf %219, %218 : vector<2x256xf32>
    %221 = vector.extract_strided_slice %213 {offsets = [0, 1], sizes = [2, 1], strides = [1, 1]} : vector<2x4xf32> to vector<2x1xf32>
    %c1_64 = arith.constant 1 : index
    %c0_65 = arith.constant 0 : index
    %222 = vector.load %arg1[%c1_64, %c0_65] : memref<4x256xf32, #tpu.memory_space<vmem>>, vector<1x256xf32>
    %223 = vector.broadcast %221 : vector<2x1xf32> to vector<2x256xf32>
    %224 = vector.broadcast %222 : vector<1x256xf32> to vector<2x256xf32>
    %225 = arith.mulf %223, %224 : vector<2x256xf32>
    %226 = arith.addf %220, %225 : vector<2x256xf32>
    %227 = vector.extract_strided_slice %213 {offsets = [0, 2], sizes = [2, 1], strides = [1, 1]} : vector<2x4xf32> to vector<2x1xf32>
    %c2_66 = arith.constant 2 : index
    %c0_67 = arith.constant 0 : index
    %228 = vector.load %arg1[%c2_66, %c0_67] : memref<4x256xf32, #tpu.memory_space<vmem>>, vector<1x256xf32>
    %229 = vector.broadcast %227 : vector<2x1xf32> to vector<2x256xf32>
    %230 = vector.broadcast %228 : vector<1x256xf32> to vector<2x256xf32>
    %231 = arith.mulf %229, %230 : vector<2x256xf32>
    %232 = arith.addf %226, %231 : vector<2x256xf32>
    %233 = vector.extract_strided_slice %213 {offsets = [0, 3], sizes = [2, 1], strides = [1, 1]} : vector<2x4xf32> to vector<2x1xf32>
    %c3_68 = arith.constant 3 : index
    %c0_69 = arith.constant 0 : index
    %234 = vector.load %arg1[%c3_68, %c0_69] : memref<4x256xf32, #tpu.memory_space<vmem>>, vector<1x256xf32>
    %235 = vector.broadcast %233 : vector<2x1xf32> to vector<2x256xf32>
    %236 = vector.broadcast %234 : vector<1x256xf32> to vector<2x256xf32>
    %237 = arith.mulf %235, %236 : vector<2x256xf32>
    %238 = arith.addf %232, %237 : vector<2x256xf32>
    %239 = arith.addf %238, %193 : vector<2x256xf32>
    %240 = arith.negf %239 : vector<2x256xf32>
    %241 = math.exp %240 : vector<2x256xf32>
    %cst_70 = arith.constant 1.000000e+00 : f32
    %242 = vector.broadcast %cst_70 : f32 to vector<2x256xf32>
    %243 = arith.addf %242, %241 : vector<2x256xf32>
    %244 = arith.divf %242, %243 : vector<2x256xf32>
    %245 = vector.extract_strided_slice %239 {offsets = [0, 128], sizes = [2, 128], strides = [1, 1]} : vector<2x256xf32> to vector<2x128xf32>
    %246 = math.tanh %245 : vector<2x128xf32>
    %247 = vector.extract_strided_slice %246 {offsets = [0, 64], sizes = [2, 64], strides = [1, 1]} : vector<2x128xf32> to vector<2x64xf32>
    %248 = vector.extract_strided_slice %244 {offsets = [0, 0], sizes = [2, 64], strides = [1, 1]} : vector<2x256xf32> to vector<2x64xf32>
    %249 = vector.extract_strided_slice %244 {offsets = [0, 64], sizes = [2, 64], strides = [1, 1]} : vector<2x256xf32> to vector<2x64xf32>
    %250 = vector.extract_strided_slice %244 {offsets = [0, 128], sizes = [2, 64], strides = [1, 1]} : vector<2x256xf32> to vector<2x64xf32>
    %251 = arith.mulf %249, %184 : vector<2x64xf32>
    %252 = arith.mulf %248, %247 : vector<2x64xf32>
    %253 = arith.addf %251, %252 : vector<2x64xf32>
    %254 = math.tanh %253 : vector<2x64xf32>
    %255 = arith.mulf %250, %254 : vector<2x64xf32>
    %c0_71 = arith.constant 0 : index
    %c0_72 = arith.constant 0 : index
    %256 = vector.load %arg3[%c0_71, %c0_72] : memref<64x512xf32, #tpu.memory_space<vmem>>, vector<64x512xf32>
    %cst_73 = arith.constant dense<0.000000e+00> : vector<2x512xf32>
    %257 = tpu.matmul %255, %256, %cst_73 {dimension_numbers = #tpu.dot_dimension_numbers<[1], [0], [0], [1], [0, 0, 1, 1], [], []>} : vector<2x64xf32>, vector<64x512xf32>, vector<2x512xf32> -> vector<2x512xf32>
    %258 = vector.broadcast %1 : vector<1x256xf32> to vector<2x256xf32>
    %259 = arith.addf %211, %258 : vector<2x256xf32>
    %260 = vector.extract_strided_slice %257 {offsets = [0, 0], sizes = [2, 256], strides = [1, 1]} : vector<2x512xf32> to vector<2x256xf32>
    %261 = arith.addf %259, %260 : vector<2x256xf32>
    %262 = vector.extract_strided_slice %257 {offsets = [0, 256], sizes = [2, 256], strides = [1, 1]} : vector<2x512xf32> to vector<2x256xf32>
    %263 = arith.negf %261 : vector<2x256xf32>
    %264 = math.exp %263 : vector<2x256xf32>
    %cst_74 = arith.constant 1.000000e+00 : f32
    %265 = vector.broadcast %cst_74 : f32 to vector<2x256xf32>
    %266 = arith.addf %265, %264 : vector<2x256xf32>
    %267 = arith.divf %265, %266 : vector<2x256xf32>
    %268 = vector.extract_strided_slice %261 {offsets = [0, 128], sizes = [2, 128], strides = [1, 1]} : vector<2x256xf32> to vector<2x128xf32>
    %269 = math.tanh %268 : vector<2x128xf32>
    %270 = vector.extract_strided_slice %269 {offsets = [0, 64], sizes = [2, 64], strides = [1, 1]} : vector<2x128xf32> to vector<2x64xf32>
    %271 = vector.extract_strided_slice %267 {offsets = [0, 0], sizes = [2, 64], strides = [1, 1]} : vector<2x256xf32> to vector<2x64xf32>
    %272 = vector.extract_strided_slice %267 {offsets = [0, 64], sizes = [2, 64], strides = [1, 1]} : vector<2x256xf32> to vector<2x64xf32>
    %273 = vector.extract_strided_slice %267 {offsets = [0, 128], sizes = [2, 64], strides = [1, 1]} : vector<2x256xf32> to vector<2x64xf32>
    %274 = arith.mulf %272, %207 : vector<2x64xf32>
    %275 = arith.mulf %271, %270 : vector<2x64xf32>
    %276 = arith.addf %274, %275 : vector<2x64xf32>
    %277 = math.tanh %276 : vector<2x64xf32>
    %278 = arith.mulf %273, %277 : vector<2x64xf32>
    %c0_75 = arith.constant 0 : index
    %c0_76 = arith.constant 0 : index
    %279 = vector.load %arg4[%c0_75, %c0_76] : memref<64x256xf32, #tpu.memory_space<vmem>>, vector<64x256xf32>
    %cst_77 = arith.constant dense<0.000000e+00> : vector<2x256xf32>
    %280 = tpu.matmul %278, %279, %cst_77 {dimension_numbers = #tpu.dot_dimension_numbers<[1], [0], [0], [1], [0, 0, 1, 1], [], []>} : vector<2x64xf32>, vector<64x256xf32>, vector<2x256xf32> -> vector<2x256xf32>
    %c4 = arith.constant 4 : index
    %c0_78 = arith.constant 0 : index
    %c0_79 = arith.constant 0 : index
    %281 = vector.load %arg0[%c4, %c0_78, %c0_79] : memref<8x2x4xf32, #tpu.memory_space<vmem>>, vector<1x2x4xf32>
    %282 = vector.shape_cast %281 : vector<1x2x4xf32> to vector<2x4xf32>
    %283 = vector.extract_strided_slice %282 {offsets = [0, 0], sizes = [2, 1], strides = [1, 1]} : vector<2x4xf32> to vector<2x1xf32>
    %c0_80 = arith.constant 0 : index
    %c0_81 = arith.constant 0 : index
    %284 = vector.load %arg1[%c0_80, %c0_81] : memref<4x256xf32, #tpu.memory_space<vmem>>, vector<1x256xf32>
    %285 = vector.broadcast %283 : vector<2x1xf32> to vector<2x256xf32>
    %286 = vector.broadcast %284 : vector<1x256xf32> to vector<2x256xf32>
    %287 = arith.mulf %285, %286 : vector<2x256xf32>
    %288 = vector.broadcast %0 : vector<1x256xf32> to vector<2x256xf32>
    %289 = arith.addf %288, %287 : vector<2x256xf32>
    %290 = vector.extract_strided_slice %282 {offsets = [0, 1], sizes = [2, 1], strides = [1, 1]} : vector<2x4xf32> to vector<2x1xf32>
    %c1_82 = arith.constant 1 : index
    %c0_83 = arith.constant 0 : index
    %291 = vector.load %arg1[%c1_82, %c0_83] : memref<4x256xf32, #tpu.memory_space<vmem>>, vector<1x256xf32>
    %292 = vector.broadcast %290 : vector<2x1xf32> to vector<2x256xf32>
    %293 = vector.broadcast %291 : vector<1x256xf32> to vector<2x256xf32>
    %294 = arith.mulf %292, %293 : vector<2x256xf32>
    %295 = arith.addf %289, %294 : vector<2x256xf32>
    %296 = vector.extract_strided_slice %282 {offsets = [0, 2], sizes = [2, 1], strides = [1, 1]} : vector<2x4xf32> to vector<2x1xf32>
    %c2_84 = arith.constant 2 : index
    %c0_85 = arith.constant 0 : index
    %297 = vector.load %arg1[%c2_84, %c0_85] : memref<4x256xf32, #tpu.memory_space<vmem>>, vector<1x256xf32>
    %298 = vector.broadcast %296 : vector<2x1xf32> to vector<2x256xf32>
    %299 = vector.broadcast %297 : vector<1x256xf32> to vector<2x256xf32>
    %300 = arith.mulf %298, %299 : vector<2x256xf32>
    %301 = arith.addf %295, %300 : vector<2x256xf32>
    %302 = vector.extract_strided_slice %282 {offsets = [0, 3], sizes = [2, 1], strides = [1, 1]} : vector<2x4xf32> to vector<2x1xf32>
    %c3_86 = arith.constant 3 : index
    %c0_87 = arith.constant 0 : index
    %303 = vector.load %arg1[%c3_86, %c0_87] : memref<4x256xf32, #tpu.memory_space<vmem>>, vector<1x256xf32>
    %304 = vector.broadcast %302 : vector<2x1xf32> to vector<2x256xf32>
    %305 = vector.broadcast %303 : vector<1x256xf32> to vector<2x256xf32>
    %306 = arith.mulf %304, %305 : vector<2x256xf32>
    %307 = arith.addf %301, %306 : vector<2x256xf32>
    %308 = arith.addf %307, %262 : vector<2x256xf32>
    %309 = arith.negf %308 : vector<2x256xf32>
    %310 = math.exp %309 : vector<2x256xf32>
    %cst_88 = arith.constant 1.000000e+00 : f32
    %311 = vector.broadcast %cst_88 : f32 to vector<2x256xf32>
    %312 = arith.addf %311, %310 : vector<2x256xf32>
    %313 = arith.divf %311, %312 : vector<2x256xf32>
    %314 = vector.extract_strided_slice %308 {offsets = [0, 128], sizes = [2, 128], strides = [1, 1]} : vector<2x256xf32> to vector<2x128xf32>
    %315 = math.tanh %314 : vector<2x128xf32>
    %316 = vector.extract_strided_slice %315 {offsets = [0, 64], sizes = [2, 64], strides = [1, 1]} : vector<2x128xf32> to vector<2x64xf32>
    %317 = vector.extract_strided_slice %313 {offsets = [0, 0], sizes = [2, 64], strides = [1, 1]} : vector<2x256xf32> to vector<2x64xf32>
    %318 = vector.extract_strided_slice %313 {offsets = [0, 64], sizes = [2, 64], strides = [1, 1]} : vector<2x256xf32> to vector<2x64xf32>
    %319 = vector.extract_strided_slice %313 {offsets = [0, 128], sizes = [2, 64], strides = [1, 1]} : vector<2x256xf32> to vector<2x64xf32>
    %320 = arith.mulf %318, %253 : vector<2x64xf32>
    %321 = arith.mulf %317, %316 : vector<2x64xf32>
    %322 = arith.addf %320, %321 : vector<2x64xf32>
    %323 = math.tanh %322 : vector<2x64xf32>
    %324 = arith.mulf %319, %323 : vector<2x64xf32>
    %c0_89 = arith.constant 0 : index
    %c0_90 = arith.constant 0 : index
    %325 = vector.load %arg3[%c0_89, %c0_90] : memref<64x512xf32, #tpu.memory_space<vmem>>, vector<64x512xf32>
    %cst_91 = arith.constant dense<0.000000e+00> : vector<2x512xf32>
    %326 = tpu.matmul %324, %325, %cst_91 {dimension_numbers = #tpu.dot_dimension_numbers<[1], [0], [0], [1], [0, 0, 1, 1], [], []>} : vector<2x64xf32>, vector<64x512xf32>, vector<2x512xf32> -> vector<2x512xf32>
    %327 = vector.broadcast %1 : vector<1x256xf32> to vector<2x256xf32>
    %328 = arith.addf %280, %327 : vector<2x256xf32>
    %329 = vector.extract_strided_slice %326 {offsets = [0, 0], sizes = [2, 256], strides = [1, 1]} : vector<2x512xf32> to vector<2x256xf32>
    %330 = arith.addf %328, %329 : vector<2x256xf32>
    %331 = vector.extract_strided_slice %326 {offsets = [0, 256], sizes = [2, 256], strides = [1, 1]} : vector<2x512xf32> to vector<2x256xf32>
    %332 = arith.negf %330 : vector<2x256xf32>
    %333 = math.exp %332 : vector<2x256xf32>
    %cst_92 = arith.constant 1.000000e+00 : f32
    %334 = vector.broadcast %cst_92 : f32 to vector<2x256xf32>
    %335 = arith.addf %334, %333 : vector<2x256xf32>
    %336 = arith.divf %334, %335 : vector<2x256xf32>
    %337 = vector.extract_strided_slice %330 {offsets = [0, 128], sizes = [2, 128], strides = [1, 1]} : vector<2x256xf32> to vector<2x128xf32>
    %338 = math.tanh %337 : vector<2x128xf32>
    %339 = vector.extract_strided_slice %338 {offsets = [0, 64], sizes = [2, 64], strides = [1, 1]} : vector<2x128xf32> to vector<2x64xf32>
    %340 = vector.extract_strided_slice %336 {offsets = [0, 0], sizes = [2, 64], strides = [1, 1]} : vector<2x256xf32> to vector<2x64xf32>
    %341 = vector.extract_strided_slice %336 {offsets = [0, 64], sizes = [2, 64], strides = [1, 1]} : vector<2x256xf32> to vector<2x64xf32>
    %342 = vector.extract_strided_slice %336 {offsets = [0, 128], sizes = [2, 64], strides = [1, 1]} : vector<2x256xf32> to vector<2x64xf32>
    %343 = arith.mulf %341, %276 : vector<2x64xf32>
    %344 = arith.mulf %340, %339 : vector<2x64xf32>
    %345 = arith.addf %343, %344 : vector<2x64xf32>
    %346 = math.tanh %345 : vector<2x64xf32>
    %347 = arith.mulf %342, %346 : vector<2x64xf32>
    %c0_93 = arith.constant 0 : index
    %c0_94 = arith.constant 0 : index
    %348 = vector.load %arg4[%c0_93, %c0_94] : memref<64x256xf32, #tpu.memory_space<vmem>>, vector<64x256xf32>
    %cst_95 = arith.constant dense<0.000000e+00> : vector<2x256xf32>
    %349 = tpu.matmul %347, %348, %cst_95 {dimension_numbers = #tpu.dot_dimension_numbers<[1], [0], [0], [1], [0, 0, 1, 1], [], []>} : vector<2x64xf32>, vector<64x256xf32>, vector<2x256xf32> -> vector<2x256xf32>
    %c5 = arith.constant 5 : index
    %c0_96 = arith.constant 0 : index
    %c0_97 = arith.constant 0 : index
    %350 = vector.load %arg0[%c5, %c0_96, %c0_97] : memref<8x2x4xf32, #tpu.memory_space<vmem>>, vector<1x2x4xf32>
    %351 = vector.shape_cast %350 : vector<1x2x4xf32> to vector<2x4xf32>
    %352 = vector.extract_strided_slice %351 {offsets = [0, 0], sizes = [2, 1], strides = [1, 1]} : vector<2x4xf32> to vector<2x1xf32>
    %c0_98 = arith.constant 0 : index
    %c0_99 = arith.constant 0 : index
    %353 = vector.load %arg1[%c0_98, %c0_99] : memref<4x256xf32, #tpu.memory_space<vmem>>, vector<1x256xf32>
    %354 = vector.broadcast %352 : vector<2x1xf32> to vector<2x256xf32>
    %355 = vector.broadcast %353 : vector<1x256xf32> to vector<2x256xf32>
    %356 = arith.mulf %354, %355 : vector<2x256xf32>
    %357 = vector.broadcast %0 : vector<1x256xf32> to vector<2x256xf32>
    %358 = arith.addf %357, %356 : vector<2x256xf32>
    %359 = vector.extract_strided_slice %351 {offsets = [0, 1], sizes = [2, 1], strides = [1, 1]} : vector<2x4xf32> to vector<2x1xf32>
    %c1_100 = arith.constant 1 : index
    %c0_101 = arith.constant 0 : index
    %360 = vector.load %arg1[%c1_100, %c0_101] : memref<4x256xf32, #tpu.memory_space<vmem>>, vector<1x256xf32>
    %361 = vector.broadcast %359 : vector<2x1xf32> to vector<2x256xf32>
    %362 = vector.broadcast %360 : vector<1x256xf32> to vector<2x256xf32>
    %363 = arith.mulf %361, %362 : vector<2x256xf32>
    %364 = arith.addf %358, %363 : vector<2x256xf32>
    %365 = vector.extract_strided_slice %351 {offsets = [0, 2], sizes = [2, 1], strides = [1, 1]} : vector<2x4xf32> to vector<2x1xf32>
    %c2_102 = arith.constant 2 : index
    %c0_103 = arith.constant 0 : index
    %366 = vector.load %arg1[%c2_102, %c0_103] : memref<4x256xf32, #tpu.memory_space<vmem>>, vector<1x256xf32>
    %367 = vector.broadcast %365 : vector<2x1xf32> to vector<2x256xf32>
    %368 = vector.broadcast %366 : vector<1x256xf32> to vector<2x256xf32>
    %369 = arith.mulf %367, %368 : vector<2x256xf32>
    %370 = arith.addf %364, %369 : vector<2x256xf32>
    %371 = vector.extract_strided_slice %351 {offsets = [0, 3], sizes = [2, 1], strides = [1, 1]} : vector<2x4xf32> to vector<2x1xf32>
    %c3_104 = arith.constant 3 : index
    %c0_105 = arith.constant 0 : index
    %372 = vector.load %arg1[%c3_104, %c0_105] : memref<4x256xf32, #tpu.memory_space<vmem>>, vector<1x256xf32>
    %373 = vector.broadcast %371 : vector<2x1xf32> to vector<2x256xf32>
    %374 = vector.broadcast %372 : vector<1x256xf32> to vector<2x256xf32>
    %375 = arith.mulf %373, %374 : vector<2x256xf32>
    %376 = arith.addf %370, %375 : vector<2x256xf32>
    %377 = arith.addf %376, %331 : vector<2x256xf32>
    %378 = arith.negf %377 : vector<2x256xf32>
    %379 = math.exp %378 : vector<2x256xf32>
    %cst_106 = arith.constant 1.000000e+00 : f32
    %380 = vector.broadcast %cst_106 : f32 to vector<2x256xf32>
    %381 = arith.addf %380, %379 : vector<2x256xf32>
    %382 = arith.divf %380, %381 : vector<2x256xf32>
    %383 = vector.extract_strided_slice %377 {offsets = [0, 128], sizes = [2, 128], strides = [1, 1]} : vector<2x256xf32> to vector<2x128xf32>
    %384 = math.tanh %383 : vector<2x128xf32>
    %385 = vector.extract_strided_slice %384 {offsets = [0, 64], sizes = [2, 64], strides = [1, 1]} : vector<2x128xf32> to vector<2x64xf32>
    %386 = vector.extract_strided_slice %382 {offsets = [0, 0], sizes = [2, 64], strides = [1, 1]} : vector<2x256xf32> to vector<2x64xf32>
    %387 = vector.extract_strided_slice %382 {offsets = [0, 64], sizes = [2, 64], strides = [1, 1]} : vector<2x256xf32> to vector<2x64xf32>
    %388 = vector.extract_strided_slice %382 {offsets = [0, 128], sizes = [2, 64], strides = [1, 1]} : vector<2x256xf32> to vector<2x64xf32>
    %389 = arith.mulf %387, %322 : vector<2x64xf32>
    %390 = arith.mulf %386, %385 : vector<2x64xf32>
    %391 = arith.addf %389, %390 : vector<2x64xf32>
    %392 = math.tanh %391 : vector<2x64xf32>
    %393 = arith.mulf %388, %392 : vector<2x64xf32>
    %c0_107 = arith.constant 0 : index
    %c0_108 = arith.constant 0 : index
    %394 = vector.load %arg3[%c0_107, %c0_108] : memref<64x512xf32, #tpu.memory_space<vmem>>, vector<64x512xf32>
    %cst_109 = arith.constant dense<0.000000e+00> : vector<2x512xf32>
    %395 = tpu.matmul %393, %394, %cst_109 {dimension_numbers = #tpu.dot_dimension_numbers<[1], [0], [0], [1], [0, 0, 1, 1], [], []>} : vector<2x64xf32>, vector<64x512xf32>, vector<2x512xf32> -> vector<2x512xf32>
    %396 = vector.broadcast %1 : vector<1x256xf32> to vector<2x256xf32>
    %397 = arith.addf %349, %396 : vector<2x256xf32>
    %398 = vector.extract_strided_slice %395 {offsets = [0, 0], sizes = [2, 256], strides = [1, 1]} : vector<2x512xf32> to vector<2x256xf32>
    %399 = arith.addf %397, %398 : vector<2x256xf32>
    %400 = vector.extract_strided_slice %395 {offsets = [0, 256], sizes = [2, 256], strides = [1, 1]} : vector<2x512xf32> to vector<2x256xf32>
    %401 = arith.negf %399 : vector<2x256xf32>
    %402 = math.exp %401 : vector<2x256xf32>
    %cst_110 = arith.constant 1.000000e+00 : f32
    %403 = vector.broadcast %cst_110 : f32 to vector<2x256xf32>
    %404 = arith.addf %403, %402 : vector<2x256xf32>
    %405 = arith.divf %403, %404 : vector<2x256xf32>
    %406 = vector.extract_strided_slice %399 {offsets = [0, 128], sizes = [2, 128], strides = [1, 1]} : vector<2x256xf32> to vector<2x128xf32>
    %407 = math.tanh %406 : vector<2x128xf32>
    %408 = vector.extract_strided_slice %407 {offsets = [0, 64], sizes = [2, 64], strides = [1, 1]} : vector<2x128xf32> to vector<2x64xf32>
    %409 = vector.extract_strided_slice %405 {offsets = [0, 0], sizes = [2, 64], strides = [1, 1]} : vector<2x256xf32> to vector<2x64xf32>
    %410 = vector.extract_strided_slice %405 {offsets = [0, 64], sizes = [2, 64], strides = [1, 1]} : vector<2x256xf32> to vector<2x64xf32>
    %411 = vector.extract_strided_slice %405 {offsets = [0, 128], sizes = [2, 64], strides = [1, 1]} : vector<2x256xf32> to vector<2x64xf32>
    %412 = arith.mulf %410, %345 : vector<2x64xf32>
    %413 = arith.mulf %409, %408 : vector<2x64xf32>
    %414 = arith.addf %412, %413 : vector<2x64xf32>
    %415 = math.tanh %414 : vector<2x64xf32>
    %416 = arith.mulf %411, %415 : vector<2x64xf32>
    %c0_111 = arith.constant 0 : index
    %c0_112 = arith.constant 0 : index
    %417 = vector.load %arg4[%c0_111, %c0_112] : memref<64x256xf32, #tpu.memory_space<vmem>>, vector<64x256xf32>
    %cst_113 = arith.constant dense<0.000000e+00> : vector<2x256xf32>
    %418 = tpu.matmul %416, %417, %cst_113 {dimension_numbers = #tpu.dot_dimension_numbers<[1], [0], [0], [1], [0, 0, 1, 1], [], []>} : vector<2x64xf32>, vector<64x256xf32>, vector<2x256xf32> -> vector<2x256xf32>
    %c6 = arith.constant 6 : index
    %c0_114 = arith.constant 0 : index
    %c0_115 = arith.constant 0 : index
    %419 = vector.load %arg0[%c6, %c0_114, %c0_115] : memref<8x2x4xf32, #tpu.memory_space<vmem>>, vector<1x2x4xf32>
    %420 = vector.shape_cast %419 : vector<1x2x4xf32> to vector<2x4xf32>
    %421 = vector.extract_strided_slice %420 {offsets = [0, 0], sizes = [2, 1], strides = [1, 1]} : vector<2x4xf32> to vector<2x1xf32>
    %c0_116 = arith.constant 0 : index
    %c0_117 = arith.constant 0 : index
    %422 = vector.load %arg1[%c0_116, %c0_117] : memref<4x256xf32, #tpu.memory_space<vmem>>, vector<1x256xf32>
    %423 = vector.broadcast %421 : vector<2x1xf32> to vector<2x256xf32>
    %424 = vector.broadcast %422 : vector<1x256xf32> to vector<2x256xf32>
    %425 = arith.mulf %423, %424 : vector<2x256xf32>
    %426 = vector.broadcast %0 : vector<1x256xf32> to vector<2x256xf32>
    %427 = arith.addf %426, %425 : vector<2x256xf32>
    %428 = vector.extract_strided_slice %420 {offsets = [0, 1], sizes = [2, 1], strides = [1, 1]} : vector<2x4xf32> to vector<2x1xf32>
    %c1_118 = arith.constant 1 : index
    %c0_119 = arith.constant 0 : index
    %429 = vector.load %arg1[%c1_118, %c0_119] : memref<4x256xf32, #tpu.memory_space<vmem>>, vector<1x256xf32>
    %430 = vector.broadcast %428 : vector<2x1xf32> to vector<2x256xf32>
    %431 = vector.broadcast %429 : vector<1x256xf32> to vector<2x256xf32>
    %432 = arith.mulf %430, %431 : vector<2x256xf32>
    %433 = arith.addf %427, %432 : vector<2x256xf32>
    %434 = vector.extract_strided_slice %420 {offsets = [0, 2], sizes = [2, 1], strides = [1, 1]} : vector<2x4xf32> to vector<2x1xf32>
    %c2_120 = arith.constant 2 : index
    %c0_121 = arith.constant 0 : index
    %435 = vector.load %arg1[%c2_120, %c0_121] : memref<4x256xf32, #tpu.memory_space<vmem>>, vector<1x256xf32>
    %436 = vector.broadcast %434 : vector<2x1xf32> to vector<2x256xf32>
    %437 = vector.broadcast %435 : vector<1x256xf32> to vector<2x256xf32>
    %438 = arith.mulf %436, %437 : vector<2x256xf32>
    %439 = arith.addf %433, %438 : vector<2x256xf32>
    %440 = vector.extract_strided_slice %420 {offsets = [0, 3], sizes = [2, 1], strides = [1, 1]} : vector<2x4xf32> to vector<2x1xf32>
    %c3_122 = arith.constant 3 : index
    %c0_123 = arith.constant 0 : index
    %441 = vector.load %arg1[%c3_122, %c0_123] : memref<4x256xf32, #tpu.memory_space<vmem>>, vector<1x256xf32>
    %442 = vector.broadcast %440 : vector<2x1xf32> to vector<2x256xf32>
    %443 = vector.broadcast %441 : vector<1x256xf32> to vector<2x256xf32>
    %444 = arith.mulf %442, %443 : vector<2x256xf32>
    %445 = arith.addf %439, %444 : vector<2x256xf32>
    %446 = arith.addf %445, %400 : vector<2x256xf32>
    %447 = arith.negf %446 : vector<2x256xf32>
    %448 = math.exp %447 : vector<2x256xf32>
    %cst_124 = arith.constant 1.000000e+00 : f32
    %449 = vector.broadcast %cst_124 : f32 to vector<2x256xf32>
    %450 = arith.addf %449, %448 : vector<2x256xf32>
    %451 = arith.divf %449, %450 : vector<2x256xf32>
    %452 = vector.extract_strided_slice %446 {offsets = [0, 128], sizes = [2, 128], strides = [1, 1]} : vector<2x256xf32> to vector<2x128xf32>
    %453 = math.tanh %452 : vector<2x128xf32>
    %454 = vector.extract_strided_slice %453 {offsets = [0, 64], sizes = [2, 64], strides = [1, 1]} : vector<2x128xf32> to vector<2x64xf32>
    %455 = vector.extract_strided_slice %451 {offsets = [0, 0], sizes = [2, 64], strides = [1, 1]} : vector<2x256xf32> to vector<2x64xf32>
    %456 = vector.extract_strided_slice %451 {offsets = [0, 64], sizes = [2, 64], strides = [1, 1]} : vector<2x256xf32> to vector<2x64xf32>
    %457 = vector.extract_strided_slice %451 {offsets = [0, 128], sizes = [2, 64], strides = [1, 1]} : vector<2x256xf32> to vector<2x64xf32>
    %458 = arith.mulf %456, %391 : vector<2x64xf32>
    %459 = arith.mulf %455, %454 : vector<2x64xf32>
    %460 = arith.addf %458, %459 : vector<2x64xf32>
    %461 = math.tanh %460 : vector<2x64xf32>
    %462 = arith.mulf %457, %461 : vector<2x64xf32>
    %c0_125 = arith.constant 0 : index
    %c0_126 = arith.constant 0 : index
    %463 = vector.load %arg3[%c0_125, %c0_126] : memref<64x512xf32, #tpu.memory_space<vmem>>, vector<64x512xf32>
    %cst_127 = arith.constant dense<0.000000e+00> : vector<2x512xf32>
    %464 = tpu.matmul %462, %463, %cst_127 {dimension_numbers = #tpu.dot_dimension_numbers<[1], [0], [0], [1], [0, 0, 1, 1], [], []>} : vector<2x64xf32>, vector<64x512xf32>, vector<2x512xf32> -> vector<2x512xf32>
    %465 = vector.broadcast %1 : vector<1x256xf32> to vector<2x256xf32>
    %466 = arith.addf %418, %465 : vector<2x256xf32>
    %467 = vector.extract_strided_slice %464 {offsets = [0, 0], sizes = [2, 256], strides = [1, 1]} : vector<2x512xf32> to vector<2x256xf32>
    %468 = arith.addf %466, %467 : vector<2x256xf32>
    %469 = vector.extract_strided_slice %464 {offsets = [0, 256], sizes = [2, 256], strides = [1, 1]} : vector<2x512xf32> to vector<2x256xf32>
    %470 = arith.negf %468 : vector<2x256xf32>
    %471 = math.exp %470 : vector<2x256xf32>
    %cst_128 = arith.constant 1.000000e+00 : f32
    %472 = vector.broadcast %cst_128 : f32 to vector<2x256xf32>
    %473 = arith.addf %472, %471 : vector<2x256xf32>
    %474 = arith.divf %472, %473 : vector<2x256xf32>
    %475 = vector.extract_strided_slice %468 {offsets = [0, 128], sizes = [2, 128], strides = [1, 1]} : vector<2x256xf32> to vector<2x128xf32>
    %476 = math.tanh %475 : vector<2x128xf32>
    %477 = vector.extract_strided_slice %476 {offsets = [0, 64], sizes = [2, 64], strides = [1, 1]} : vector<2x128xf32> to vector<2x64xf32>
    %478 = vector.extract_strided_slice %474 {offsets = [0, 0], sizes = [2, 64], strides = [1, 1]} : vector<2x256xf32> to vector<2x64xf32>
    %479 = vector.extract_strided_slice %474 {offsets = [0, 64], sizes = [2, 64], strides = [1, 1]} : vector<2x256xf32> to vector<2x64xf32>
    %480 = vector.extract_strided_slice %474 {offsets = [0, 128], sizes = [2, 64], strides = [1, 1]} : vector<2x256xf32> to vector<2x64xf32>
    %481 = arith.mulf %479, %414 : vector<2x64xf32>
    %482 = arith.mulf %478, %477 : vector<2x64xf32>
    %483 = arith.addf %481, %482 : vector<2x64xf32>
    %484 = math.tanh %483 : vector<2x64xf32>
    %485 = arith.mulf %480, %484 : vector<2x64xf32>
    %c0_129 = arith.constant 0 : index
    %c0_130 = arith.constant 0 : index
    %486 = vector.load %arg4[%c0_129, %c0_130] : memref<64x256xf32, #tpu.memory_space<vmem>>, vector<64x256xf32>
    %cst_131 = arith.constant dense<0.000000e+00> : vector<2x256xf32>
    %487 = tpu.matmul %485, %486, %cst_131 {dimension_numbers = #tpu.dot_dimension_numbers<[1], [0], [0], [1], [0, 0, 1, 1], [], []>} : vector<2x64xf32>, vector<64x256xf32>, vector<2x256xf32> -> vector<2x256xf32>
    %c7 = arith.constant 7 : index
    %c0_132 = arith.constant 0 : index
    %c0_133 = arith.constant 0 : index
    %488 = vector.load %arg0[%c7, %c0_132, %c0_133] : memref<8x2x4xf32, #tpu.memory_space<vmem>>, vector<1x2x4xf32>
    %489 = vector.shape_cast %488 : vector<1x2x4xf32> to vector<2x4xf32>
    %490 = vector.extract_strided_slice %489 {offsets = [0, 0], sizes = [2, 1], strides = [1, 1]} : vector<2x4xf32> to vector<2x1xf32>
    %c0_134 = arith.constant 0 : index
    %c0_135 = arith.constant 0 : index
    %491 = vector.load %arg1[%c0_134, %c0_135] : memref<4x256xf32, #tpu.memory_space<vmem>>, vector<1x256xf32>
    %492 = vector.broadcast %490 : vector<2x1xf32> to vector<2x256xf32>
    %493 = vector.broadcast %491 : vector<1x256xf32> to vector<2x256xf32>
    %494 = arith.mulf %492, %493 : vector<2x256xf32>
    %495 = vector.broadcast %0 : vector<1x256xf32> to vector<2x256xf32>
    %496 = arith.addf %495, %494 : vector<2x256xf32>
    %497 = vector.extract_strided_slice %489 {offsets = [0, 1], sizes = [2, 1], strides = [1, 1]} : vector<2x4xf32> to vector<2x1xf32>
    %c1_136 = arith.constant 1 : index
    %c0_137 = arith.constant 0 : index
    %498 = vector.load %arg1[%c1_136, %c0_137] : memref<4x256xf32, #tpu.memory_space<vmem>>, vector<1x256xf32>
    %499 = vector.broadcast %497 : vector<2x1xf32> to vector<2x256xf32>
    %500 = vector.broadcast %498 : vector<1x256xf32> to vector<2x256xf32>
    %501 = arith.mulf %499, %500 : vector<2x256xf32>
    %502 = arith.addf %496, %501 : vector<2x256xf32>
    %503 = vector.extract_strided_slice %489 {offsets = [0, 2], sizes = [2, 1], strides = [1, 1]} : vector<2x4xf32> to vector<2x1xf32>
    %c2_138 = arith.constant 2 : index
    %c0_139 = arith.constant 0 : index
    %504 = vector.load %arg1[%c2_138, %c0_139] : memref<4x256xf32, #tpu.memory_space<vmem>>, vector<1x256xf32>
    %505 = vector.broadcast %503 : vector<2x1xf32> to vector<2x256xf32>
    %506 = vector.broadcast %504 : vector<1x256xf32> to vector<2x256xf32>
    %507 = arith.mulf %505, %506 : vector<2x256xf32>
    %508 = arith.addf %502, %507 : vector<2x256xf32>
    %509 = vector.extract_strided_slice %489 {offsets = [0, 3], sizes = [2, 1], strides = [1, 1]} : vector<2x4xf32> to vector<2x1xf32>
    %c3_140 = arith.constant 3 : index
    %c0_141 = arith.constant 0 : index
    %510 = vector.load %arg1[%c3_140, %c0_141] : memref<4x256xf32, #tpu.memory_space<vmem>>, vector<1x256xf32>
    %511 = vector.broadcast %509 : vector<2x1xf32> to vector<2x256xf32>
    %512 = vector.broadcast %510 : vector<1x256xf32> to vector<2x256xf32>
    %513 = arith.mulf %511, %512 : vector<2x256xf32>
    %514 = arith.addf %508, %513 : vector<2x256xf32>
    %515 = arith.addf %514, %469 : vector<2x256xf32>
    %516 = arith.negf %515 : vector<2x256xf32>
    %517 = math.exp %516 : vector<2x256xf32>
    %cst_142 = arith.constant 1.000000e+00 : f32
    %518 = vector.broadcast %cst_142 : f32 to vector<2x256xf32>
    %519 = arith.addf %518, %517 : vector<2x256xf32>
    %520 = arith.divf %518, %519 : vector<2x256xf32>
    %521 = vector.extract_strided_slice %515 {offsets = [0, 128], sizes = [2, 128], strides = [1, 1]} : vector<2x256xf32> to vector<2x128xf32>
    %522 = math.tanh %521 : vector<2x128xf32>
    %523 = vector.extract_strided_slice %522 {offsets = [0, 64], sizes = [2, 64], strides = [1, 1]} : vector<2x128xf32> to vector<2x64xf32>
    %524 = vector.extract_strided_slice %520 {offsets = [0, 0], sizes = [2, 64], strides = [1, 1]} : vector<2x256xf32> to vector<2x64xf32>
    %525 = vector.extract_strided_slice %520 {offsets = [0, 64], sizes = [2, 64], strides = [1, 1]} : vector<2x256xf32> to vector<2x64xf32>
    %526 = vector.extract_strided_slice %520 {offsets = [0, 128], sizes = [2, 64], strides = [1, 1]} : vector<2x256xf32> to vector<2x64xf32>
    %527 = arith.mulf %525, %460 : vector<2x64xf32>
    %528 = arith.mulf %524, %523 : vector<2x64xf32>
    %529 = arith.addf %527, %528 : vector<2x64xf32>
    %530 = math.tanh %529 : vector<2x64xf32>
    %531 = arith.mulf %526, %530 : vector<2x64xf32>
    %c0_143 = arith.constant 0 : index
    %c0_144 = arith.constant 0 : index
    %532 = vector.load %arg3[%c0_143, %c0_144] : memref<64x512xf32, #tpu.memory_space<vmem>>, vector<64x512xf32>
    %cst_145 = arith.constant dense<0.000000e+00> : vector<2x512xf32>
    %533 = tpu.matmul %531, %532, %cst_145 {dimension_numbers = #tpu.dot_dimension_numbers<[1], [0], [0], [1], [0, 0, 1, 1], [], []>} : vector<2x64xf32>, vector<64x512xf32>, vector<2x512xf32> -> vector<2x512xf32>
    %534 = vector.broadcast %1 : vector<1x256xf32> to vector<2x256xf32>
    %535 = arith.addf %487, %534 : vector<2x256xf32>
    %536 = vector.extract_strided_slice %533 {offsets = [0, 0], sizes = [2, 256], strides = [1, 1]} : vector<2x512xf32> to vector<2x256xf32>
    %537 = arith.addf %535, %536 : vector<2x256xf32>
    %538 = arith.negf %537 : vector<2x256xf32>
    %539 = math.exp %538 : vector<2x256xf32>
    %cst_146 = arith.constant 1.000000e+00 : f32
    %540 = vector.broadcast %cst_146 : f32 to vector<2x256xf32>
    %541 = arith.addf %540, %539 : vector<2x256xf32>
    %542 = arith.divf %540, %541 : vector<2x256xf32>
    %543 = vector.extract_strided_slice %537 {offsets = [0, 128], sizes = [2, 128], strides = [1, 1]} : vector<2x256xf32> to vector<2x128xf32>
    %544 = math.tanh %543 : vector<2x128xf32>
    %545 = vector.extract_strided_slice %544 {offsets = [0, 64], sizes = [2, 64], strides = [1, 1]} : vector<2x128xf32> to vector<2x64xf32>
    %546 = vector.extract_strided_slice %542 {offsets = [0, 0], sizes = [2, 64], strides = [1, 1]} : vector<2x256xf32> to vector<2x64xf32>
    %547 = vector.extract_strided_slice %542 {offsets = [0, 64], sizes = [2, 64], strides = [1, 1]} : vector<2x256xf32> to vector<2x64xf32>
    %548 = vector.extract_strided_slice %542 {offsets = [0, 128], sizes = [2, 64], strides = [1, 1]} : vector<2x256xf32> to vector<2x64xf32>
    %549 = arith.mulf %547, %483 : vector<2x64xf32>
    %550 = arith.mulf %546, %545 : vector<2x64xf32>
    %551 = arith.addf %549, %550 : vector<2x64xf32>
    %552 = math.tanh %551 : vector<2x64xf32>
    %553 = arith.mulf %548, %552 : vector<2x64xf32>
    %c0_147 = arith.constant 0 : index
    %c0_148 = arith.constant 0 : index
    %554 = vector.load %arg6[%c0_147, %c0_148] : memref<64x32xf32, #tpu.memory_space<vmem>>, vector<64x32xf32>
    %cst_149 = arith.constant dense<0.000000e+00> : vector<2x32xf32>
    %555 = tpu.matmul %553, %554, %cst_149 {dimension_numbers = #tpu.dot_dimension_numbers<[1], [0], [0], [1], [0, 0, 1, 1], [], []>} : vector<2x64xf32>, vector<64x32xf32>, vector<2x32xf32> -> vector<2x32xf32>
    %c0_150 = arith.constant 0 : index
    %c0_151 = arith.constant 0 : index
    %556 = vector.load %arg7[%c0_150, %c0_151] : memref<1x32xf32, #tpu.memory_space<vmem>>, vector<1x32xf32>
    %557 = vector.broadcast %556 : vector<1x32xf32> to vector<2x32xf32>
    %558 = arith.addf %555, %557 : vector<2x32xf32>
    %cst_152 = arith.constant 0.000000e+00 : f32
    %559 = vector.broadcast %cst_152 : f32 to vector<2x32xf32>
    %560 = arith.maximumf %558, %559 : vector<2x32xf32>
    %c0_153 = arith.constant 0 : index
    %c0_154 = arith.constant 0 : index
    %561 = vector.load %arg8[%c0_153, %c0_154] : memref<32x4xf32, #tpu.memory_space<vmem>>, vector<32x4xf32>
    %cst_155 = arith.constant dense<0.000000e+00> : vector<2x4xf32>
    %562 = tpu.matmul %560, %561, %cst_155 {dimension_numbers = #tpu.dot_dimension_numbers<[1], [0], [0], [1], [0, 0, 1, 1], [], []>} : vector<2x32xf32>, vector<32x4xf32>, vector<2x4xf32> -> vector<2x4xf32>
    %c0_156 = arith.constant 0 : index
    %c0_157 = arith.constant 0 : index
    %563 = vector.load %arg9[%c0_156, %c0_157] : memref<1x4xf32, #tpu.memory_space<vmem>>, vector<1x4xf32>
    %564 = vector.broadcast %563 : vector<1x4xf32> to vector<2x4xf32>
    %565 = arith.addf %562, %564 : vector<2x4xf32>
    %c0_158 = arith.constant 0 : index
    %c0_159 = arith.constant 0 : index
    %566 = vector.load %arg10[%c0_158, %c0_159] : memref<2x4xf32, #tpu.memory_space<vmem>>, vector<2x4xf32>
    tpu.vector_store %arg10[%c0_158, %c0_159], %565 {strides = array<i32>} : memref<2x4xf32, #tpu.memory_space<vmem>>, vector<2x4xf32>,
    return
  }
}

</mosaic_0001>

<bundles_post_ra>
// kernel: water_quality_lstm_forward.1
= control target key start
LH: loop header
LB: loop body
LE: loop exit
PB: predicated region body
PF: predicated region fallthrough
CT: control target
= control target key end

     0   :  { %15 = vsyncpa [#allocation3], 0  ;;  %s3914_s0 = inlined_call_operand.vmem [shape: f32[8,2,4], index: 0, kind: input, shape index: {}]   ;;  %s3915_s1 = inlined_call_operand.vmem [shape: f32[4,256], index: 1, kind: input, shape index: {}]   ;;  %s3916_s2 = inlined_call_operand.vmem [shape: f32[1,256], index: 2, kind: input, shape index: {}]   ;;  %s3917_s3 = inlined_call_operand.hbm [shape: f32[64,512], index: 3, kind: input, shape index: {}]   ;;  %s3918_s4 = inlined_call_operand.hbm [shape: f32[64,256], index: 4, kind: input, shape index: {}]   ;;  %s3919_s5 = inlined_call_operand.vmem [shape: f32[1,256], index: 5, kind: input, shape index: {}]   ;;  %s3920_s6 = inlined_call_operand.vmem [shape: f32[64,32], index: 6, kind: input, shape index: {}]   ;;  %s3921_s7 = inlined_call_operand.vmem [shape: f32[1,32], index: 7, kind: input, shape index: {}]   ;;  %s3922_s8 = inlined_call_operand.vmem [shape: f32[32,4], index: 8, kind: input, shape index: {}]   ;;  %s3923_s9 = inlined_call_operand.vmem [shape: f32[1,4], index: 9, kind: input, shape index: {}]   ;;  %s3924_s10 = inlined_call_operand.hbm [shape: f32[2,4], index: 10, kind: output, shape index: {}]  }
   0x1   :  { %16 = vsyncpa [#allocation6], 0 }
   0x2   :  { %17 = vsyncpa [#allocation4], 0  ;;  %s28_s15 = sshll.u32 %s3917_s3, 4  ;;  %s2852_s16 = smov [#allocation2]   ;;  %s29_s15 = int_to_ptr.hbm [resolvable:$true] %s28_s15 }
   0x3   :  { %s30_s17 = sshll.u32 %s2852_s16, 4  ;;  %s41_s20 = sshll.u32 %s3918_s4, 4  ;;  %s31_s17 = int_to_ptr.vmem [resolvable:$true] %s30_s17  ;;  %s42_s20 = int_to_ptr.hbm [resolvable:$true] %s41_s20 }
   0x4   :  { %s2853_s21 = smov 512   ;;  %s2854_s22 = smov 32  }
   0x5   :  { %36 = dma.hbm_to_vmem [thread:$0]  %s29_s15, 4096, %s31_s17, [#allocation3], %s2853_s21, %s2853_s21, %s2854_s22  }
   0x6   :  { %s2855_s23 = smov [#allocation5]   ;;  %s2856_s25 = smov 256  }
   0x7   :  { %s43_s24 = sshll.u32 %s2855_s23, 4  ;;  %s2857_s26 = smov 16   ;;  %s44_s24 = int_to_ptr.vmem [resolvable:$true] %s43_s24 }
   0x8   :  { %49 = dma.hbm_to_vmem [thread:$0]  %s42_s20, 2048, %s44_s24, [#allocation6], %s2856_s25, %s2856_s25, %s2857_s26  }
   0x9   :  { %2846 = dma.done.wait [#allocation3], 4096  }
   0xa   :  { %2847 = vsyncadd [#allocation3], 4294963200 }
   0xb   :  { %2848 = dma.done.wait [#allocation6], 2048  }
   0xc   :  { %2849 = vsyncadd [#allocation6], 4294965248  ;;  %v3927_v0 = vmov 0   ;;  %v3925_v1 = vmov 2   ;;  %v70_v2 = vld [vmem:[%s3914_s0] sm:$0x3] }
   0xd   :  { %2478 = vset.pattern.permute.xlu0 %v3927_v0  ;;  %2480 = vset.pattern.permute.xlu1 %v3925_v1  ;;  %v3929_v3 = vmov 1   ;;  %v3931_v4 = vmov 3   ;;  %v2936_v5 = vld [vmem:[%s3914_s0 + $0x2] sm:$0x3]  ;;  %v68_v11 = vld [vmem:[%s3916_s2] sm:$0x3] }
   0xe   :  { %2482 = vset.pattern.permute.xlu2 %v3927_v0  ;;  %74 = vperm.xlu0 %2478, %v70_v2   ;;  %v71_v6 = vld [vmem:[%s3915_s1] ss:$4 sm:$0x3]  ;;  %v2378_v12 = vld [vmem:[%s3915_s1 + $0x1] ss:$4 sm:$0x3] }
   0xf   :  { %109 = vperm.xlu1 %2480, %v70_v2   ;;  %v2944_v9 = vperm.slane %v71_v6, 0  ;;  %v2946_v10 = vperm.slane %v71_v6, 1  ;;  %v2379_v13 = vld [vmem:[%s3915_s1 + $0x2] ss:$4 sm:$0x3]  ;;  %v2957_v14 = vperm.slane %v68_v11, 0 }
  0x10   :  { %v2959_v15 = vperm.slane %v68_v11, 1  ;;  %v2380_v16 = vld [vmem:[%s3915_s1 + $0x3] ss:$4 sm:$0x3]  ;;  %v2966_v19 = vperm.slane %v2378_v12, 0  ;;  %v2968_v20 = vperm.slane %v2378_v12, 1 }
  0x11   :  { %3987 = vst [vmem:[#allocation11_spill] sm:$0xff] %v2944_v9  ;;  %v2970_v21 = vperm.slane %v2379_v13, 0  ;;  %v2972_v22 = vperm.slane %v2379_v13, 1  ;;  %v2974_v23 = vperm.slane %v2380_v16, 1  ;;  %s2862_s1 = smov 64   ;;  %v2987_v39 = vperm.slane %v2380_v16, 0 }
  0x12   :  { %3988 = vst [vmem:[#allocation12_spill] sm:$0xff] %v2946_v10  ;;  %v2995_v57 = vld [vmem:[#allocation2 + $0xe0] sm:$0xff]  ;;  %v2997_v58 = vld [vmem:[#allocation2 + $0xe8] sm:$0xff]  ;;  %v2999_v59 = vld [vmem:[#allocation2 + $0xf0] sm:$0xff]  ;;  %vm226_vm8 = vcmask 523264   ;;  %s2863_s29 = smov [#allocation7]  }
  0x13   :  { %3989 = vst [vmem:[#allocation13_spill] sm:$0xff] %v2957_v14  ;;  %238 = vmatpush.msra.mxu0 %v2995_v57  ;;  %258 = vmatpush.msra.mxu1 %v2997_v58  ;;  %v3003_v60 = vld [vmem:[#allocation2 + $0xf8] sm:$0xff]  ;;  %v3005_v61 = vld [vmem:[#allocation2 + $0xc0] sm:$0xff]  ;;  %v3007_v62 = vld [vmem:[#allocation2 + $0xc8] sm:$0xff]  ;;  %s2365_s30 = sshll.u32 %s2863_s29, 4  ;;  %s2366_s30 = int_to_ptr.vmem [resolvable:$true] %s2365_s30 }
  0x14   :  { %3990 = vst [vmem:[#allocation14_spill] sm:$0xff] %v2959_v15  ;;  %278 = vmatpush.msra.mxu2 %v2999_v59  ;;  %298 = vmatpush.msra.mxu3 %v3003_v60  ;;  %v3011_v63 = vld [vmem:[#allocation2 + $0xd0] sm:$0xff]  ;;  %v3015_v6 = vld [vmem:[#allocation2 + $0xa0] sm:$0xff]  ;;  %v3023_v11 = vld [vmem:[#allocation2 + $0xb8] sm:$0xff] }
  0x15   :  { %3991 = vst [vmem:[#allocation15_spill] sm:$0xff] %v2966_v19  ;;  %239 = vmatpush.msra.mxu0 %v3005_v61  ;;  %259 = vmatpush.msra.mxu1 %v3007_v62  ;;  %v3027_v12 = vld [vmem:[#allocation2 + $0x80] sm:$0xff]  ;;  %v3029_v13 = vld [vmem:[#allocation2 + $0x88] sm:$0xff]  ;;  %v3033_v16 = vld [vmem:[#allocation2 + $0x90] sm:$0xff] }
  0x16   :  { %2479 = vset.pattern.permute.xlu0 %v3929_v3  ;;  %3992 = vst [vmem:[#allocation16_spill] sm:$0xff] %v2968_v20  ;;  %279 = vmatpush.msra.mxu2 %v3011_v63 }
  0x17   :  { %2481 = vset.pattern.permute.xlu1 %v3931_v4  ;;  %94 = vperm.xlu0 %2479, %v70_v2   ;;  %3993 = vst [vmem:[#allocation17_spill] sm:$0xff] %v2970_v21 }
  0x18   :  { %124 = vperm.xlu1 %2481, %v70_v2   ;;  %3994 = vst [vmem:[#allocation18_spill] sm:$0xff] %v2972_v22  ;;  %v3013_v2 = vld [vmem:[#allocation2 + $0xd8] sm:$0xff]  ;;  %240 = vmatpush.msra.mxu0 %v3015_v6 }
  0x19   :  { %3995 = vst [vmem:[#allocation19_spill] sm:$0xff] %v2974_v23  ;;  %299 = vmatpush.msra.mxu3 %v3013_v2 }
  0x1a   :  { %3996 = vst [vmem:[#allocation20_spill] sm:$0xff] %v2987_v39  ;;  %241 = vmatpush.msra.mxu0 %v3027_v12 }
  0x1b   :  { %300 = vmatpush.msra.mxu3 %v3023_v11 }
  0x1f   :  { %403 = vperm.xlu0 %2479, %v2936_v5  }
  0x20   :  { %2483 = vset.pattern.permute.xlu1 %v3925_v1 }
  0x27   :  { %2485 = vset.pattern.permute.xlu0 %v3927_v0 }
  0x80   :  { %v75_v7 = vpop.permute.xlu0 %74 }
  0x81   :  { %v110_v8 = vpop.permute.xlu1 %109  ;;  %v82_v17 = vmul.f32 %v2944_v9, %v75_v7  ;;  %v83_v18 = vmul.f32 %v2946_v10, %v75_v7  ;;  %v3019_v7 = vld [vmem:[#allocation2 + $0xa8] sm:$0xff] }
  0x82   :  { %v117_v30 = vmul.f32 %v2970_v21, %v110_v8  ;;  %v118_v31 = vmul.f32 %v2972_v22, %v110_v8  ;;  %v3021_v8 = vld [vmem:[#allocation2 + $0xb0] sm:$0xff]  ;;  %260 = vmatpush.msra.mxu1 %v3019_v7 }
  0x83   :  { %v89_v26 = vadd.f32 %v2957_v14, %v82_v17  ;;  %v90_v27 = vadd.f32 %v2959_v15, %v83_v18  ;;  %v3035_v17 = vld [vmem:[#allocation2 + $0x98] sm:$0xff]  ;;  %280 = vmatpush.msra.mxu2 %v3021_v8  ;;  %v3039_v18 = vld [vmem:[#allocation2 + $0x60] sm:$0xff] }
  0x84   :  { %261 = vmatpush.msra.mxu1 %v3029_v13  ;;  %301 = vmatpush.msra.mxu3 %v3035_v17 }
  0x85   :  { %281 = vmatpush.msra.mxu2 %v3033_v16  ;;  %242 = vmatpush.msra.mxu0 %v3039_v18 }
  0x89   :  { %v95_v24 = vpop.permute.xlu0 %94 }
  0x8a   :  { %v125_v25 = vpop.permute.xlu1 %124  ;;  %v102_v28 = vmul.f32 %v2966_v19, %v95_v24  ;;  %v103_v29 = vmul.f32 %v2968_v20, %v95_v24  ;;  %v3041_v24 = vld [vmem:[#allocation2 + $0x68] sm:$0xff] }
  0x8b   :  { %v133_v34 = vmul.f32 %v2974_v23, %v125_v25  ;;  %v132_v40 = vmul.f32 %v2987_v39, %v125_v25  ;;  %v3045_v25 = vld [vmem:[#allocation2 + $0x70] sm:$0xff]  ;;  %262 = vmatpush.msra.mxu1 %v3041_v24 }
  0x8c   :  { %v104_v32 = vadd.f32 %v102_v28, %v89_v26  ;;  %v105_v33 = vadd.f32 %v103_v29, %v90_v27  ;;  %v3047_v26 = vld [vmem:[#allocation2 + $0x78] sm:$0xff]  ;;  %v3051_v27 = vld [vmem:[#allocation2 + $0x40] sm:$0xff]  ;;  %v3053_v28 = vld [vmem:[#allocation2 + $0x48] sm:$0xff]  ;;  %282 = vmatpush.msra.mxu2 %v3045_v25 }
  0x8d   :  { %v3057_v29 = vld [vmem:[#allocation2 + $0x50] sm:$0xff]  ;;  %302 = vmatpush.msra.mxu3 %v3047_v26  ;;  %243 = vmatpush.msra.mxu0 %v3051_v27 }
  0x8e   :  { %v119_v35 = vadd.f32 %v117_v30, %v104_v32  ;;  %v120_v36 = vadd.f32 %v118_v31, %v105_v33  ;;  %v3059_v30 = vld [vmem:[#allocation2 + $0x58] sm:$0xff]  ;;  %v3063_v31 = vld [vmem:[#allocation2 + $0x20] sm:$0xff]  ;;  %v3065_v32 = vld [vmem:[#allocation2 + $0x28] sm:$0xff]  ;;  %263 = vmatpush.msra.mxu1 %v3053_v28  ;;  %283 = vmatpush.msra.mxu2 %v3057_v29 }
  0x8f   :  { %3997 = vst [vmem:[#allocation21_spill] sm:$0xff] %v3063_v31  ;;  %v3069_v33 = vld [vmem:[#allocation2 + $0x30] sm:$0xff]  ;;  %303 = vmatpush.msra.mxu3 %v3059_v30  ;;  %244 = vmatpush.msra.mxu0 %v3063_v31 }
  0x90   :  { %v2983_v37 = vadd.f32 %v133_v34, %v120_v36  ;;  %v134_v41 = vadd.f32 %v132_v40, %v119_v35  ;;  %3998 = vst [vmem:[#allocation22_spill] sm:$0xff] %v3065_v32  ;;  %v3071_v34 = vld [vmem:[#allocation2 + $0x38] sm:$0xff]  ;;  %264 = vmatpush.msra.mxu1 %v3065_v32  ;;  %284 = vmatpush.msra.mxu2 %v3069_v33 }
  0x91   :  { %304 = vmatpush.msra.mxu3 %v3071_v34 }
  0x92   :  { %2512 = vtanh.f32 %v2983_v37  ;;  %v2381_v42 = vmul.f32 -1.442695, %v134_v41  ;;  %v2382_v41 = vmul.f32 -1.442695, %v2983_v37 }
  0x94   :  { %2514 = vpow2.f32 %v2381_v42 }
  0x98   :  { %v2513_v38 = vpop.eup %2512 }
  0x99   :  { %179 = vrot.lane.b32.xlu2 %v2513_v38, %s2862_s1 }
  0x9a   :  { %v2515_v43 = vpop.eup %2514 }
  0x9b   :  { %v144_v44 = vadd.f32 1.0, %v2515_v43 }
  0x9d   :  { %2516 = vrcp.f32 %v144_v44  ;;  %v157_v50 = vand.u32 2147483648, %v144_v44  ;;  %vm151_vm1 = vweird.f32 %v144_v44  ;;  %v155_v51 = vand.u32 2147483647, %v144_v44 }
  0x9f   :  { %v158_v53 = vor.u32 1.1754944e-38, %v157_v50  ;;  %vm156_vm3 = vcmp.eq.f32.partialorder %v155_v51, 8.507059e+37 }
  0xa3   :  { %v2517_v45 = vpop.eup %2516 }
  0xa4   :  { %v147_v46 = vmul.f32 %v2517_v45, %v144_v44  ;;  %vm152_vm0 = vweird.f32 %v2517_v45  ;;  %v3086_v44 = vld [vmem:[#allocation2] sm:$0xff] }
  0xa5   :  { %vm153_vm2 = vmor %vm151_vm1, %vm152_vm0  ;;  %3999 = vst [vmem:[#allocation23_spill] sm:$0xff] %v3086_v44  ;;  %245 = vmatpush.msra.mxu0 %v3086_v44 }
  0xa6   :  { %v148_v47 = vsub.f32 1.0, %v147_v46  ;;  %v3090_v46 = vld [vmem:[#allocation2 + $0x10] sm:$0xff] }
  0xa7   :  { %285 = vmatpush.msra.mxu2 %v3090_v46  ;;  %495 = vmatpush.msrb.mxu0 %v2995_v57 }
  0xa8   :  { %v149_v48 = vmul.f32 %v2517_v45, %v148_v47  ;;  %v3094_v47 = vld [vmem:[#allocation2 + $0x18] sm:$0xff] }
  0xa9   :  { %305 = vmatpush.msra.mxu3 %v3094_v47  ;;  %535 = vmatpush.msrb.mxu2 %v2999_v59 }
  0xaa   :  { %v150_v49 = vadd.f32 %v2517_v45, %v149_v48  ;;  %496 = vmatpush.msrb.mxu0 %v3005_v61 }
  0xab   :  { %555 = vmatpush.msrb.mxu3 %v3003_v60  ;;  %536 = vmatpush.msrb.mxu2 %v3011_v63 }
  0xac   :  { %v154_v52 = vsel %vm153_vm2, %v2517_v45, %v150_v49  ;;  %v3088_v45 = vld [vmem:[#allocation2 + $0x8] sm:$0xff]  ;;  %497 = vmatpush.msrb.mxu0 %v3015_v6 }
  0xad   :  { %v159_v55 = vsel %vm156_vm3, %v158_v53, %v154_v52  ;;  %4000 = vst [vmem:[#allocation24_spill] sm:$0xff] %v3088_v45  ;;  %265 = vmatpush.msra.mxu1 %v3088_v45  ;;  %556 = vmatpush.msrb.mxu3 %v3013_v2 }
  0xae   :  { %v177_v35 = vmul.f32 0.0, %v159_v55  ;;  %537 = vmatpush.msrb.mxu2 %v3021_v8  ;;  %498 = vmatpush.msrb.mxu0 %v3027_v12 }
  0xaf   :  { %515 = vmatpush.msrb.mxu1 %v2997_v58  ;;  %557 = vmatpush.msrb.mxu3 %v3023_v11 }
  0xb0   :  { %538 = vmatpush.msrb.mxu2 %v3033_v16  ;;  %499 = vmatpush.msrb.mxu0 %v3039_v18 }
  0xb1   :  { %516 = vmatpush.msrb.mxu1 %v3007_v62  ;;  %558 = vmatpush.msrb.mxu3 %v3035_v17 }
  0xb2   :  { %539 = vmatpush.msrb.mxu2 %v3045_v25  ;;  %500 = vmatpush.msrb.mxu0 %v3051_v27 }
  0xb3   :  { %517 = vmatpush.msrb.mxu1 %v3019_v7  ;;  %559 = vmatpush.msrb.mxu3 %v3047_v26 }
  0xb4   :  { %540 = vmatpush.msrb.mxu2 %v3057_v29  ;;  %501 = vmatpush.msrb.mxu0 %v3063_v31 }
  0xb5   :  { %518 = vmatpush.msrb.mxu1 %v3029_v13  ;;  %560 = vmatpush.msrb.mxu3 %v3059_v30 }
  0xb6   :  { %541 = vmatpush.msrb.mxu2 %v3069_v33  ;;  %502 = vmatpush.msrb.mxu0 %v3086_v44 }
  0xb7   :  { %519 = vmatpush.msrb.mxu1 %v3041_v24  ;;  %561 = vmatpush.msrb.mxu3 %v3071_v34 }
  0xb8   :  { %542 = vmatpush.msrb.mxu2 %v3090_v46 }
  0xb9   :  { %520 = vmatpush.msrb.mxu1 %v3053_v28  ;;  %562 = vmatpush.msrb.mxu3 %v3094_v47 }
  0xbb   :  { %521 = vmatpush.msrb.mxu1 %v3065_v32 }
  0xbd   :  { %522 = vmatpush.msrb.mxu1 %v3088_v45 }
  0xf3   :  { %v180_v54 = vpop.permute.xlu2 %179 }
  0xf4   :  { %v182_v56 = vmul.f32 %v180_v54, %v159_v55 }
  0xf6   :  { %184 = vrot.lane.b32.xlu2 %v182_v56, %s2862_s1 }
  0xfe   :  { %395 = vperm.xlu2 %2482, %v2936_v5  }
 0x106   :  { %2484 = vset.pattern.permute.xlu2 %v3931_v4 }
 0x107   :  { %419 = vperm.xlu2 %2484, %v2936_v5  }
 0x10f   :  { %2487 = vset.pattern.permute.xlu2 %v3925_v1 }
 0x150   :  { %v185_v36 = vpop.permute.xlu2 %184 }
 0x151   :  { %v3079_v38 = vadd.f32 %v185_v36, %v177_v35 }
 0x153   :  { %2518 = vtanh.f32 %v3079_v38 }
 0x154   :  { %2520 = vpow2.f32 %v2382_v41  ;;  %v69_v41 = vld [vmem:[%s3919_s5] sm:$0x3] }
 0x158   :  { %v396_v36 = vpop.permute.xlu2 %395 }
 0x159   :  { %v2519_v40 = vpop.eup %2518 }
 0x15a   :  { %190 = vrot.lane.b32.xlu1 %v2519_v40, %s2862_s1  ;;  %v2521_v42 = vpop.eup %2520  ;;  %v399_v40 = vmul.f32 %v396_v36, %v2946_v10 }
 0x15b   :  { %v145_v43 = vadd.f32 1.0, %v2521_v42  ;;  %v404_v42 = vpop.permute.xlu0 %403 }
 0x15d   :  { %2522 = vrcp.f32 %v145_v43  ;;  %v172_v51 = vand.u32 2147483648, %v145_v43  ;;  %vm166_vm5 = vweird.f32 %v145_v43  ;;  %v170_v52 = vand.u32 2147483647, %v145_v43 }
 0x15f   :  { %v173_v54 = vor.u32 1.1754944e-38, %v172_v51  ;;  %vm171_vm7 = vcmp.eq.f32.partialorder %v170_v52, 8.507059e+37 }
 0x162   :  { %411 = vperm.xlu1 %2483, %v2936_v5  }
 0x163   :  { %v2523_v5 = vpop.eup %2522 }
 0x164   :  { %v162_v37 = vmul.f32 %v2523_v5, %v145_v43  ;;  %vm167_vm4 = vweird.f32 %v2523_v5 }
 0x165   :  { %vm168_vm6 = vmor %vm166_vm5, %vm167_vm4 }
 0x166   :  { %v163_v48 = vsub.f32 1.0, %v162_v37  ;;  %v3155_v37 = vperm.slane %v69_v41, 1 }
 0x168   :  { %v164_v49 = vmul.f32 %v2523_v5, %v163_v48  ;;  %4001 = vst [vmem:[#allocation25_spill] sm:$0xff] %v3155_v37  ;;  %v407_v48 = vmul.f32 %v404_v42, %v2968_v20 }
 0x16a   :  { %2486 = vset.pattern.permute.xlu1 %v3929_v3  ;;  %v165_v50 = vadd.f32 %v2523_v5, %v164_v49 }
 0x16c   :  { %v169_v53 = vsel %vm168_vm6, %v2523_v5, %v165_v50  ;;  %v401_v5 = vadd.f32 %v399_v40, %v2959_v15  ;;  %v420_v50 = vpop.permute.xlu2 %419 }
 0x16d   :  { %v174_v55 = vsel %vm171_vm7, %v173_v54, %v169_v53 }
 0x16e   :  { %v409_v51 = vadd.f32 %v407_v48, %v401_v5  ;;  %v398_v5 = vmul.f32 %v396_v36, %v2944_v9 }
 0x170   :  { %v400_v48 = vadd.f32 %v398_v5, %v2957_v14 }
 0x1cc   :  { %v191_v56 = vpop.permute.xlu1 %190 }
 0x1cd   :  { %v193_v35 = vmul.f32 %v191_v56, %v174_v55  ;;  %v423_v55 = vmul.f32 %v420_v50, %v2974_v23 }
 0x1cf   :  { %2383 = vmatmul.msk.f32.vlgmr.msra.gmra.mxu0 %vm226_vm8, %v193_v35  ;;  %2384 = vmatmul.msk.f32.vlgmr.msra.gmra.mxu1 %vm226_vm8, %v193_v35 }
 0x1d0   :  { %2385 = vmatmul.msk.f32.vlgmr.msra.gmra.mxu2 %vm226_vm8, %v193_v35  ;;  %2386 = vmatmul.msk.f32.vlgmr.msra.gmra.mxu3 %vm226_vm8, %v193_v35 }
 0x1d1   :  { %772 = vmatpush.msra.mxu2 %v2995_v57  ;;  %792 = vmatpush.msra.mxu3 %v2997_v58 }
 0x1d3   :  { %773 = vmatpush.msra.mxu2 %v3005_v61  ;;  %793 = vmatpush.msra.mxu3 %v3007_v62 }
 0x1d4   :  { %v412_v43 = vpop.permute.xlu1 %411 }
 0x1d5   :  { %774 = vmatpush.msra.mxu2 %v3015_v6  ;;  %794 = vmatpush.msra.mxu3 %v3019_v7  ;;  %v415_v49 = vmul.f32 %v412_v43, %v2972_v22  ;;  %v4008_v22 = vmov 2  }
 0x1d7   :  { %775 = vmatpush.msra.mxu2 %v3027_v12  ;;  %795 = vmatpush.msra.mxu3 %v3029_v13  ;;  %v417_v54 = vadd.f32 %v415_v49, %v409_v51  ;;  %v3171_v49 = vperm.slane %v69_v41, 0  ;;  %v406_v51 = vmul.f32 %v404_v42, %v2966_v19 }
 0x1d9   :  { %776 = vmatpush.msra.mxu2 %v3039_v18  ;;  %796 = vmatpush.msra.mxu3 %v3041_v24  ;;  %v425_v56 = vadd.f32 %v423_v55, %v417_v54  ;;  %4002 = vst [vmem:[#allocation26_spill] sm:$0xff] %v3171_v49  ;;  %v408_v55 = vadd.f32 %v406_v51, %v400_v48 }
 0x1db   :  { %777 = vmatpush.msra.mxu2 %v3051_v27  ;;  %797 = vmatpush.msra.mxu3 %v3053_v28 }
 0x1dd   :  { %778 = vmatpush.msra.mxu2 %v3063_v31  ;;  %798 = vmatpush.msra.mxu3 %v3065_v32 }
 0x1df   :  { %779 = vmatpush.msra.mxu2 %v3086_v44  ;;  %799 = vmatpush.msra.mxu3 %v3088_v45 }
 0x24c   :  { %v267_v52 = vpop.f32.mrf.mxu1  ;;  %v247_v54 = vpop.f32.mrf.mxu0 }
 0x24d   :  { %v3160_v53 = vadd.f32 %v3155_v37, %v267_v52  ;;  %v414_v52 = vmul.f32 %v412_v43, %v2970_v21 }
 0x24f   :  { %2524 = vtanh.f32 %v3160_v53 }
 0x253   :  { %v307_v35 = vpop.f32.mrf.mxu3  ;;  %v287_v4 = vpop.f32.mrf.mxu2 }
 0x254   :  { %v3164_v40 = vadd.f32 %v425_v56, %v307_v35  ;;  %v317_v56 = vadd.f32 %v3171_v49, %v247_v54  ;;  %v416_v35 = vadd.f32 %v414_v52, %v408_v55 }
 0x255   :  { %v2525_v1 = vpop.eup %2524 }
 0x256   :  { %2526 = vtanh.f32 %v3164_v40  ;;  %360 = vrot.lane.b32.xlu1 %v2525_v1, %s2862_s1  ;;  %v422_v1 = vmul.f32 %v420_v50, %v2987_v39  ;;  %v2387_v3 = vmul.f32 -1.442695, %v317_v56 }
 0x258   :  { %2528 = vpow2.f32 %v2387_v3 }
 0x25c   :  { %v2527_v0 = vpop.eup %2526 }
 0x25d   :  { %469 = vrot.lane.b32.xlu0 %v2527_v0, %s2862_s1  ;;  %v424_v0 = vadd.f32 %v422_v1, %v416_v35 }
 0x25e   :  { %v2529_v5 = vpop.eup %2528 }
 0x25f   :  { %v426_v37 = vadd.f32 %v424_v0, %v287_v4  ;;  %v325_v41 = vadd.f32 1.0, %v2529_v5 }
 0x261   :  { %v2390_v36 = vmul.f32 -1.442695, %v426_v37  ;;  %v338_v35 = vand.u32 2147483648, %v325_v41  ;;  %vm332_vm10 = vweird.f32 %v325_v41  ;;  %v336_v3 = vand.u32 2147483647, %v325_v41 }
 0x263   :  { %2530 = vpow2.f32 %v2390_v36  ;;  %v339_v1 = vor.u32 1.1754944e-38, %v338_v35  ;;  %vm337_vm12 = vcmp.eq.f32.partialorder %v336_v3, 8.507059e+37 }
 0x264   :  { %2532 = vrcp.f32 %v325_v41 }
 0x269   :  { %v2531_v14 = vpop.eup %2530 }
 0x26a   :  { %v434_v42 = vadd.f32 1.0, %v2531_v14  ;;  %v2533_v43 = vpop.eup %2532 }
 0x26b   :  { %v328_v48 = vmul.f32 %v2533_v43, %v325_v41  ;;  %vm333_vm9 = vweird.f32 %v2533_v43 }
 0x26c   :  { %2534 = vrcp.f32 %v434_v42  ;;  %vm334_vm11 = vmor %vm332_vm10, %vm333_vm9  ;;  %v447_v49 = vand.u32 2147483648, %v434_v42  ;;  %vm441_vm14 = vweird.f32 %v434_v42 }
 0x26d   :  { %v329_v54 = vsub.f32 1.0, %v328_v48  ;;  %v445_v48 = vand.u32 2147483647, %v434_v42 }
 0x26f   :  { %v330_v55 = vmul.f32 %v2533_v43, %v329_v54  ;;  %vm446_vm0 = vcmp.eq.f32.partialorder %v445_v48, 8.507059e+37  ;;  %v3202_v48 = vld [vmem:[#allocation5 + $0x58] sm:$0xff] }
 0x271   :  { %v331_v56 = vadd.f32 %v2533_v43, %v330_v55 }
 0x272   :  { %v2535_v51 = vpop.eup %2534 }
 0x273   :  { %v437_v52 = vmul.f32 %v2535_v51, %v434_v42  ;;  %v335_v37 = vsel %vm334_vm11, %v2533_v43, %v331_v56  ;;  %vm442_vm13 = vweird.f32 %v2535_v51 }
 0x274   :  { %v340_v0 = vsel %vm337_vm12, %v339_v1, %v335_v37  ;;  %vm443_vm15 = vmor %vm441_vm14, %vm442_vm13  ;;  %v2391_v37 = vmul.f32 -1.442695, %v3164_v40  ;;  %v3191_v1 = vld [vmem:[#allocation5 + $0x78] sm:$0xff] }
 0x275   :  { %v438_v50 = vsub.f32 1.0, %v437_v52  ;;  %v448_v52 = vor.u32 1.1754944e-38, %v447_v49  ;;  %v358_v42 = vmul.f32 0.0, %v340_v0  ;;  %598 = vmatpush.msra.mxu1 %v3191_v1 }
 0x277   :  { %v439_v4 = vmul.f32 %v2535_v51, %v438_v50 }
 0x279   :  { %v440_v36 = vadd.f32 %v2535_v51, %v439_v4 }
 0x27b   :  { %v444_v54 = vsel %vm443_vm15, %v2535_v51, %v440_v36  ;;  %v2388_v36 = vmul.f32 -1.442695, %v3160_v53 }
 0x27c   :  { %v449_v55 = vsel %vm446_vm0, %v448_v52, %v444_v54  ;;  %v3208_v54 = vld [vmem:[#allocation5 + $0x40] sm:$0xff]  ;;  %v3210_v52 = vld [vmem:[#allocation5 + $0x48] sm:$0xff] }
 0x27d   :  { %v467_v43 = vmul.f32 %v449_v55, %v3079_v38  ;;  %v3189_v38 = vld [vmem:[#allocation5 + $0x70] sm:$0xff] }
 0x27e   :  { %578 = vmatpush.msra.mxu0 %v3189_v38 }
 0x2c8   :  { %v361_v14 = vpop.permute.xlu1 %360 }
 0x2c9   :  { %v363_v5 = vmul.f32 %v361_v14, %v340_v0  ;;  %v3193_v14 = vld [vmem:[#allocation5 + $0x60] sm:$0xff]  ;;  %v3198_v0 = vld [vmem:[#allocation5 + $0x68] sm:$0xff] }
 0x2ca   :  { %579 = vmatpush.msra.mxu0 %v3193_v14  ;;  %599 = vmatpush.msra.mxu1 %v3198_v0 }
 0x2cb   :  { %365 = vrot.lane.b32.xlu0 %v363_v5, %s2862_s1  ;;  %v3200_v5 = vld [vmem:[#allocation5 + $0x50] sm:$0xff] }
 0x2cc   :  { %580 = vmatpush.msra.mxu0 %v3200_v5  ;;  %600 = vmatpush.msra.mxu1 %v3202_v48 }
 0x2ce   :  { %581 = vmatpush.msra.mxu0 %v3208_v54  ;;  %601 = vmatpush.msra.mxu1 %v3210_v52 }
 0x2cf   :  { %v470_v41 = vpop.permute.xlu0 %469 }
 0x2d0   :  { %v472_v50 = vmul.f32 %v470_v41, %v449_v55  ;;  %v2400_v41 = vld [vmem:[%s3914_s0 + $0x4] sm:$0x3]  ;;  %v3217_v55 = vld [vmem:[#allocation5 + $0x30] sm:$0xff] }
 0x2d1   :  { %582 = vmatpush.msra.mxu0 %v3217_v55 }
 0x2d2   :  { %474 = vrot.lane.b32.xlu2 %v472_v50, %s2862_s1  ;;  %v3219_v50 = vld [vmem:[#allocation5 + $0x38] sm:$0xff] }
 0x2d3   :  { %672 = vperm.xlu0 %2485, %v2400_v41   ;;  %602 = vmatpush.msra.mxu1 %v3219_v50 }
 0x32c   :  { %v475_v56 = vpop.permute.xlu2 %474 }
 0x32d   :  { %v3180_v35 = vadd.f32 %v475_v56, %v467_v43  ;;  %v3221_v43 = vld [vmem:[#allocation5 + $0x20] sm:$0xff] }
 0x32e   :  { %583 = vmatpush.msra.mxu0 %v3221_v43 }
 0x32f   :  { %4003 = vst [vmem:[#allocation27_spill] sm:$0xff] %v3180_v35  ;;  %2536 = vtanh.f32 %v3180_v35  ;;  %v4006_v35 = vmov 1  }
 0x330   :  { %2490 = vset.pattern.permute.xlu0 %v4006_v35 }
 0x335   :  { %v2537_v3 = vpop.eup %2536 }
 0x336   :  { %480 = vrot.lane.b32.xlu1 %v2537_v3, %s2862_s1  ;;  %v3225_v3 = vld [vmem:[#allocation5 + $0x28] sm:$0xff] }
 0x337   :  { %603 = vmatpush.msra.mxu1 %v3225_v3 }
 0x33d   :  { %v366_v4 = vpop.permute.xlu0 %365 }
 0x33e   :  { %v3184_v51 = vadd.f32 %v366_v4, %v358_v42  ;;  %680 = vperm.xlu1 %2486, %v2400_v41   ;;  %v3227_v42 = vld [vmem:[#allocation5 + $0x10] sm:$0xff]  ;;  %v3229_v4 = vld [vmem:[#allocation5 + $0x18] sm:$0xff] }
 0x33f   :  { %584 = vmatpush.msra.mxu0 %v3227_v42  ;;  %604 = vmatpush.msra.mxu1 %v3229_v4 }
 0x340   :  { %4004 = vst [vmem:[#allocation28_spill] sm:$0xff] %v3184_v51  ;;  %2538 = vtanh.f32 %v3184_v51  ;;  %v4005_v51 = vmov 3  }
 0x341   :  { %2540 = vpow2.f32 %v2391_v37  ;;  %v3233_v37 = vld [vmem:[#allocation5] sm:$0xff] }
 0x342   :  { %2542 = vpow2.f32 %v2388_v36  ;;  %v3235_v36 = vld [vmem:[#allocation5 + $0x8] sm:$0xff]  ;;  %585 = vmatpush.msra.mxu0 %v3233_v37 }
 0x343   :  { %605 = vmatpush.msra.mxu1 %v3235_v36 }
 0x346   :  { %v2539_v49 = vpop.eup %2538  ;;  %2488 = vset.pattern.permute.xlu1 %v4005_v51 }
 0x347   :  { %371 = vrot.lane.b32.xlu2 %v2539_v49, %s2862_s1  ;;  %v2541_v40 = vpop.eup %2540  ;;  %696 = vperm.xlu1 %2488, %v2400_v41  }
 0x348   :  { %v435_v53 = vadd.f32 1.0, %v2541_v40  ;;  %v2543_v56 = vpop.eup %2542 }
 0x349   :  { %v326_v49 = vadd.f32 1.0, %v2543_v56  ;;  %v4007_v56 = vmov 0  }
 0x34a   :  { %2544 = vrcp.f32 %v435_v53  ;;  %v462_v10 = vand.u32 2147483648, %v435_v53  ;;  %vm456_vm2 = vweird.f32 %v435_v53  ;;  %v460_v45 = vand.u32 2147483647, %v435_v53 }
 0x34b   :  { %2546 = vrcp.f32 %v326_v49  ;;  %v353_v31 = vand.u32 2147483648, %v326_v49  ;;  %vm347_vm6 = vweird.f32 %v326_v49 }
 0x34c   :  { %v463_v35 = vor.u32 1.1754944e-38, %v462_v10  ;;  %vm461_vm4 = vcmp.eq.f32.partialorder %v460_v45, 8.507059e+37 }
 0x34d   :  { %v354_v10 = vor.u32 1.1754944e-38, %v353_v31 }
 0x34f   :  { %688 = vperm.xlu2 %2487, %v2400_v41   ;;  %2491 = vset.pattern.permute.xlu1 %v4008_v22 }
 0x350   :  { %v2545_v40 = vpop.eup %2544 }
 0x351   :  { %v452_v39 = vmul.f32 %v2545_v40, %v435_v53  ;;  %v2547_v19 = vpop.eup %2546  ;;  %vm457_vm1 = vweird.f32 %v2545_v40 }
 0x352   :  { %v343_v9 = vmul.f32 %v2547_v19, %v326_v49  ;;  %vm458_vm3 = vmor %vm456_vm2, %vm457_vm1  ;;  %vm348_vm5 = vweird.f32 %v2547_v19 }
 0x353   :  { %v453_v21 = vsub.f32 1.0, %v452_v39  ;;  %vm349_vm7 = vmor %vm347_vm6, %vm348_vm5 }
 0x354   :  { %v344_v15 = vsub.f32 1.0, %v343_v9 }
 0x355   :  { %v454_v23 = vmul.f32 %v2545_v40, %v453_v21  ;;  %v351_v21 = vand.u32 2147483647, %v326_v49 }
 0x356   :  { %v345_v51 = vmul.f32 %v2547_v19, %v344_v15 }
 0x357   :  { %2489 = vset.pattern.permute.xlu2 %v4007_v56  ;;  %v455_v20 = vadd.f32 %v2545_v40, %v454_v23  ;;  %vm352_vm9 = vcmp.eq.f32.partialorder %v351_v21, 8.507059e+37  ;;  %v4009_v23 = vld [vmem:[#allocation21_spill] sm:$0xff] }
 0x358   :  { %v346_v56 = vadd.f32 %v2547_v19, %v345_v51 }
 0x359   :  { %v459_v44 = vsel %vm458_vm3, %v2545_v40, %v455_v20 }
 0x35a   :  { %v464_v41 = vsel %vm461_vm4, %v463_v35, %v459_v44  ;;  %v350_v9 = vsel %vm349_vm7, %v2547_v19, %v346_v56  ;;  %v4018_v35 = vld [vmem:[#allocation25_spill] sm:$0xff]  ;;  %v4019_v56 = vld [vmem:[#allocation11_spill] sm:$0xff] }
 0x35b   :  { %v355_v20 = vsel %vm352_vm9, %v354_v10, %v350_v9  ;;  %v4021_v9 = vld [vmem:[#allocation13_spill] sm:$0xff] }
 0x3a1   :  { %v372_v15 = vpop.permute.xlu2 %371 }
 0x3a2   :  { %v374_v19 = vmul.f32 %v372_v15, %v355_v20  ;;  %v4022_v20 = vld [vmem:[#allocation17_spill] sm:$0xff] }
 0x3a8   :  { %v481_v32 = vpop.permute.xlu1 %480 }
 0x3a9   :  { %v483_v39 = vmul.f32 %v481_v32, %v464_v41 }
 0x3ab   :  { %2392 = vmatmul.msk.f32.vlgmr.msrb.gmra.mxu0 %vm226_vm8, %v483_v39  ;;  %2393 = vmatmul.msk.f32.vlgmr.msrb.gmra.mxu1 %vm226_vm8, %v483_v39 }
 0x3ac   :  { %2394 = vmatmul.msk.f32.vlgmr.msrb.gmra.mxu2 %vm226_vm8, %v483_v39  ;;  %2395 = vmatmul.msk.f32.vlgmr.msrb.gmra.mxu3 %vm226_vm8, %v483_v39  ;;  %v4020_v39 = vld [vmem:[#allocation15_spill] sm:$0xff] }
 0x3ad   :  { %812 = vmatpush.msrb.mxu0 %v2999_v59  ;;  %832 = vmatpush.msrb.mxu1 %v3003_v60  ;;  %v4012_v59 = vld [vmem:[#allocation24_spill] sm:$0xff]  ;;  %v673_v60 = vpop.permute.xlu0 %672 }
 0x3ae   :  { %855 = vmatpush.msrb.mxu2 %v3189_v38  ;;  %875 = vmatpush.msrb.mxu3 %v3191_v1  ;;  %v675_v41 = vmul.f32 %v673_v60, %v4019_v56 }
 0x3af   :  { %813 = vmatpush.msrb.mxu0 %v3011_v63  ;;  %833 = vmatpush.msrb.mxu1 %v3013_v2  ;;  %v4014_v2 = vld [vmem:[#allocation16_spill] sm:$0xff] }
 0x3b0   :  { %856 = vmatpush.msrb.mxu2 %v3193_v14  ;;  %876 = vmatpush.msrb.mxu3 %v3198_v0  ;;  %v677_v10 = vadd.f32 %v675_v41, %v4021_v9 }
 0x3b1   :  { %814 = vmatpush.msrb.mxu0 %v3021_v8  ;;  %834 = vmatpush.msrb.mxu1 %v3023_v11  ;;  %v689_v11 = vpop.permute.xlu2 %688 }
 0x3b2   :  { %857 = vmatpush.msrb.mxu2 %v3200_v5  ;;  %877 = vmatpush.msrb.mxu3 %v3202_v48 }
 0x3b3   :  { %2396 = vmatmul.msk.f32.vlgmr.msra.gmra.mxu0 %vm226_vm8, %v374_v19  ;;  %2397 = vmatmul.msk.f32.vlgmr.msra.gmra.mxu1 %vm226_vm8, %v374_v19  ;;  %v691_v19 = vmul.f32 %v689_v11, %v4022_v20 }
 0x3b4   :  { %815 = vmatpush.msrb.mxu0 %v3033_v16  ;;  %835 = vmatpush.msrb.mxu1 %v3035_v17 }
 0x3b5   :  { %858 = vmatpush.msrb.mxu2 %v3208_v54  ;;  %878 = vmatpush.msrb.mxu3 %v3210_v52 }
 0x3b6   :  { %816 = vmatpush.msrb.mxu0 %v3045_v25  ;;  %836 = vmatpush.msrb.mxu1 %v3047_v26 }
 0x3b7   :  { %859 = vmatpush.msrb.mxu2 %v3217_v55  ;;  %879 = vmatpush.msrb.mxu3 %v3219_v50 }
 0x3b8   :  { %817 = vmatpush.msrb.mxu0 %v3057_v29  ;;  %837 = vmatpush.msrb.mxu1 %v3059_v30 }
 0x3b9   :  { %860 = vmatpush.msrb.mxu2 %v3221_v43  ;;  %880 = vmatpush.msrb.mxu3 %v3225_v3 }
 0x3ba   :  { %818 = vmatpush.msrb.mxu0 %v3069_v33  ;;  %838 = vmatpush.msrb.mxu1 %v3071_v34 }
 0x3bb   :  { %861 = vmatpush.msrb.mxu2 %v3227_v42  ;;  %881 = vmatpush.msrb.mxu3 %v3229_v4 }
 0x3bc   :  { %819 = vmatpush.msrb.mxu0 %v3090_v46  ;;  %839 = vmatpush.msrb.mxu1 %v3094_v47 }
 0x3bd   :  { %862 = vmatpush.msrb.mxu2 %v3233_v37  ;;  %882 = vmatpush.msrb.mxu3 %v3235_v36 }
 0x3be   :  { %1049 = vmatpush.msra.mxu0 %v2995_v57  ;;  %1069 = vmatpush.msra.mxu1 %v2997_v58  ;;  %v4010_v57 = vld [vmem:[#allocation22_spill] sm:$0xff]  ;;  %v4011_v58 = vld [vmem:[#allocation23_spill] sm:$0xff] }
 0x3c0   :  { %1050 = vmatpush.msra.mxu0 %v3005_v61  ;;  %1070 = vmatpush.msra.mxu1 %v3007_v62  ;;  %v681_v61 = vpop.permute.xlu1 %680  ;;  %v4013_v62 = vld [vmem:[#allocation12_spill] sm:$0xff] }
 0x3c1   :  { %v676_v63 = vmul.f32 %v673_v60, %v4013_v62  ;;  %v683_v21 = vmul.f32 %v681_v61, %v4020_v39 }
 0x3c2   :  { %1051 = vmatpush.msra.mxu0 %v3015_v6  ;;  %1071 = vmatpush.msra.mxu1 %v3019_v7  ;;  %v684_v6 = vmul.f32 %v681_v61, %v4014_v2  ;;  %v4015_v7 = vld [vmem:[#allocation14_spill] sm:$0xff] }
 0x3c3   :  { %v678_v8 = vadd.f32 %v676_v63, %v4015_v7  ;;  %v685_v15 = vadd.f32 %v683_v21, %v677_v10 }
 0x3c4   :  { %1052 = vmatpush.msra.mxu0 %v3027_v12  ;;  %1072 = vmatpush.msra.mxu1 %v3029_v13  ;;  %v4016_v13 = vld [vmem:[#allocation18_spill] sm:$0xff] }
 0x3c5   :  { %v686_v12 = vadd.f32 %v684_v6, %v678_v8  ;;  %v692_v16 = vmul.f32 %v689_v11, %v4016_v13 }
 0x3c6   :  { %1053 = vmatpush.msra.mxu0 %v3039_v18  ;;  %1073 = vmatpush.msra.mxu1 %v3041_v24 }
 0x3c7   :  { %v694_v24 = vadd.f32 %v692_v16, %v686_v12 }
 0x3c8   :  { %1054 = vmatpush.msra.mxu0 %v3051_v27  ;;  %1074 = vmatpush.msra.mxu1 %v3053_v28  ;;  %v697_v17 = vpop.permute.xlu1 %696  ;;  %v4017_v27 = vld [vmem:[#allocation19_spill] sm:$0xff] }
 0x3c9   :  { %v700_v28 = vmul.f32 %v697_v17, %v4017_v27 }
 0x3ca   :  { %1055 = vmatpush.msra.mxu0 %v4009_v23  ;;  %1075 = vmatpush.msra.mxu1 %v4010_v57  ;;  %v693_v23 = vadd.f32 %v691_v19, %v685_v15  ;;  %v4023_v57 = vld [vmem:[#allocation20_spill] sm:$0xff] }
 0x3cb   :  { %v702_v31 = vadd.f32 %v700_v28, %v694_v24  ;;  %v699_v63 = vmul.f32 %v697_v17, %v4023_v57 }
 0x3cc   :  { %1056 = vmatpush.msra.mxu0 %v4011_v58  ;;  %1076 = vmatpush.msra.mxu1 %v4012_v59 }
 0x3cd   :  { %v701_v8 = vadd.f32 %v699_v63, %v693_v23 }
 0x428   :  { %v524_v18 = vpop.f32.mrf.mxu1 }
 0x42f   :  { %v564_v32 = vpop.f32.mrf.mxu3  ;;  %v544_v6 = vpop.f32.mrf.mxu2 }
 0x430   :  { %v3304_v44 = vadd.f32 %v702_v31, %v564_v32  ;;  %v607_v45 = vpop.f32.mrf.mxu1  ;;  %v703_v12 = vadd.f32 %v701_v8, %v544_v6  ;;  %v4024_v31 = vld [vmem:[#allocation26_spill] sm:$0xff] }
 0x431   :  { %v608_v51 = vadd.f32 %v607_v45, %v4018_v35 }
 0x432   :  { %2548 = vtanh.f32 %v3304_v44  ;;  %v2401_v16 = vmul.f32 -1.442695, %v703_v12 }
 0x433   :  { %v3308_v53 = vadd.f32 %v608_v51, %v524_v18  ;;  %v504_v18 = vpop.f32.mrf.mxu0 }
 0x435   :  { %2550 = vtanh.f32 %v3308_v53 }
 0x436   :  { %2552 = vpow2.f32 %v2401_v16 }
 0x438   :  { %v2549_v49 = vpop.eup %2548 }
 0x439   :  { %746 = vrot.lane.b32.xlu2 %v2549_v49, %s2862_s1 }
 0x43b   :  { %v2551_v40 = vpop.eup %2550  ;;  %v587_v60 = vpop.f32.mrf.mxu0 }
 0x43c   :  { %653 = vrot.lane.b32.xlu0 %v2551_v40, %s2862_s1  ;;  %v2553_v24 = vpop.eup %2552  ;;  %v588_v61 = vadd.f32 %v587_v60, %v4024_v31 }
 0x43d   :  { %v711_v28 = vadd.f32 1.0, %v2553_v24 }
 0x43e   :  { %v610_v45 = vadd.f32 %v588_v61, %v504_v18 }
 0x43f   :  { %2554 = vrcp.f32 %v711_v28  ;;  %v724_v21 = vand.u32 2147483648, %v711_v28  ;;  %vm718_vm11 = vweird.f32 %v711_v28  ;;  %v722_v10 = vand.u32 2147483647, %v711_v28 }
 0x440   :  { %v2398_v49 = vmul.f32 -1.442695, %v610_v45 }
 0x441   :  { %v725_v23 = vor.u32 1.1754944e-38, %v724_v21  ;;  %vm723_vm13 = vcmp.eq.f32.partialorder %v722_v10, 8.507059e+37  ;;  %v4026_v10 = vld [vmem:[#allocation28_spill] sm:$0xff] }
 0x442   :  { %2556 = vpow2.f32 %v2398_v49 }
 0x445   :  { %v2555_v32 = vpop.eup %2554 }
 0x446   :  { %v714_v51 = vmul.f32 %v2555_v32, %v711_v28  ;;  %vm719_vm10 = vweird.f32 %v2555_v32 }
 0x447   :  { %vm720_vm12 = vmor %vm718_vm11, %vm719_vm10 }
 0x448   :  { %v715_v11 = vsub.f32 1.0, %v714_v51  ;;  %v2557_v17 = vpop.eup %2556 }
 0x449   :  { %v618_v15 = vadd.f32 1.0, %v2557_v17 }
 0x44a   :  { %v716_v40 = vmul.f32 %v2555_v32, %v715_v11 }
 0x44b   :  { %2558 = vrcp.f32 %v618_v15  ;;  %v631_v61 = vand.u32 2147483648, %v618_v15  ;;  %vm625_vm15 = vweird.f32 %v618_v15  ;;  %v629_v28 = vand.u32 2147483647, %v618_v15 }
 0x44c   :  { %v717_v41 = vadd.f32 %v2555_v32, %v716_v40  ;;  %v4025_v40 = vld [vmem:[#allocation27_spill] sm:$0xff] }
 0x44d   :  { %vm630_vm1 = vcmp.eq.f32.partialorder %v629_v28, 8.507059e+37 }
 0x44e   :  { %v721_v19 = vsel %vm720_vm12, %v2555_v32, %v717_v41  ;;  %v632_v32 = vor.u32 1.1754944e-38, %v631_v61 }
 0x44f   :  { %v726_v6 = vsel %vm723_vm13, %v725_v23, %v721_v19 }
 0x450   :  { %v744_v17 = vmul.f32 %v726_v6, %v4025_v40  ;;  %v4029_v40 = vmov 1  }
 0x451   :  { %v2559_v12 = vpop.eup %2558 }
 0x452   :  { %v621_v16 = vmul.f32 %v2559_v12, %v618_v15  ;;  %vm626_vm14 = vweird.f32 %v2559_v12 }
 0x453   :  { %vm627_vm0 = vmor %vm625_vm15, %vm626_vm14 }
 0x454   :  { %v622_v18 = vsub.f32 1.0, %v621_v16 }
 0x456   :  { %v623_v24 = vmul.f32 %v2559_v12, %v622_v18 }
 0x458   :  { %v624_v60 = vadd.f32 %v2559_v12, %v623_v24 }
 0x45a   :  { %v628_v45 = vsel %vm627_vm0, %v2559_v12, %v624_v60  ;;  %v2399_v12 = vmul.f32 -1.442695, %v3308_v53  ;;  %v2411_v60 = vld [vmem:[%s3914_s0 + $0x6] sm:$0x3]  ;;  %v4028_v53 = vmov 3  }
 0x45b   :  { %v633_v49 = vsel %vm630_vm1, %v632_v32, %v628_v45 }
 0x45c   :  { %v651_v19 = vmul.f32 %v633_v49, %v4026_v10 }
 0x493   :  { %v747_v63 = vpop.permute.xlu2 %746 }
 0x494   :  { %v749_v8 = vmul.f32 %v747_v63, %v726_v6  ;;  %v2402_v6 = vmul.f32 -1.442695, %v3304_v44  ;;  %v4027_v44 = vmov 0  }
 0x496   :  { %751 = vrot.lane.b32.xlu1 %v749_v8, %s2862_s1 }
 0x4ae   :  { %v654_v51 = vpop.permute.xlu0 %653 }
 0x4af   :  { %v656_v11 = vmul.f32 %v654_v51, %v633_v49 }
 0x4b1   :  { %658 = vrot.lane.b32.xlu2 %v656_v11, %s2862_s1 }
 0x4b9   :  { %949 = vperm.xlu2 %2489, %v2411_v60  }
 0x4c1   :  { %2492 = vset.pattern.permute.xlu2 %v4028_v53 }
 0x4c2   :  { %973 = vperm.xlu2 %2492, %v2411_v60  }
 0x4ca   :  { %2494 = vset.pattern.permute.xlu2 %v4029_v40 }
 0x508   :  { %v752_v41 = vpop.permute.xlu1 %751 }
 0x509   :  { %v3322_v21 = vadd.f32 %v752_v41, %v744_v17 }
 0x50b   :  { %2560 = vtanh.f32 %v3322_v21  ;;  %v659_v23 = vpop.permute.xlu2 %658 }
 0x50c   :  { %v3326_v15 = vadd.f32 %v659_v23, %v651_v19 }
 0x50e   :  { %2562 = vtanh.f32 %v3326_v15 }
 0x50f   :  { %2564 = vpow2.f32 %v2402_v6 }
 0x510   :  { %2566 = vpow2.f32 %v2399_v12 }
 0x511   :  { %v2561_v63 = vpop.eup %2560 }
 0x512   :  { %757 = vrot.lane.b32.xlu0 %v2561_v63, %s2862_s1 }
 0x514   :  { %v2563_v8 = vpop.eup %2562 }
 0x515   :  { %664 = vrot.lane.b32.xlu1 %v2563_v8, %s2862_s1  ;;  %v2565_v16 = vpop.eup %2564 }
 0x516   :  { %v712_v18 = vadd.f32 1.0, %v2565_v16  ;;  %v2567_v24 = vpop.eup %2566 }
 0x517   :  { %v619_v61 = vadd.f32 1.0, %v2567_v24 }
 0x518   :  { %2568 = vrcp.f32 %v712_v18  ;;  %v739_v10 = vand.u32 2147483648, %v712_v18  ;;  %vm733_vm3 = vweird.f32 %v712_v18  ;;  %v737_v19 = vand.u32 2147483647, %v712_v18 }
 0x519   :  { %2570 = vrcp.f32 %v619_v61  ;;  %vm640_vm7 = vweird.f32 %v619_v61 }
 0x51a   :  { %957 = vperm.xlu0 %2490, %v2411_v60   ;;  %v740_v8 = vor.u32 1.1754944e-38, %v739_v10  ;;  %vm738_vm5 = vcmp.eq.f32.partialorder %v737_v19, 8.507059e+37  ;;  %v3366_v19 = vld [vmem:[#allocation2 + $0xb0] sm:$0xff] }
 0x51d   :  { %965 = vperm.xlu1 %2491, %v2411_v60   ;;  %v646_v60 = vand.u32 2147483648, %v619_v61 }
 0x51e   :  { %v2569_v28 = vpop.eup %2568 }
 0x51f   :  { %v729_v45 = vmul.f32 %v2569_v28, %v712_v18  ;;  %v2571_v51 = vpop.eup %2570  ;;  %vm734_vm2 = vweird.f32 %v2569_v28  ;;  %v950_v18 = vpop.permute.xlu2 %949 }
 0x520   :  { %v636_v11 = vmul.f32 %v2571_v51, %v619_v61  ;;  %vm735_vm4 = vmor %vm733_vm3, %vm734_vm2  ;;  %vm641_vm6 = vweird.f32 %v2571_v51 }
 0x521   :  { %v730_v32 = vsub.f32 1.0, %v729_v45  ;;  %v644_v45 = vand.u32 2147483647, %v619_v61  ;;  %vm3344_vm9 = vmor %vm640_vm7, %vm641_vm6  ;;  %v647_v61 = vor.u32 1.1754944e-38, %v646_v60  ;;  %v3436_v60 = vld [vmem:[#allocation2 + $0x20] sm:$0xff] }
 0x522   :  { %2495 = vset.pattern.permute.xlu0 %v4008_v22  ;;  %v637_v41 = vsub.f32 1.0, %v636_v11  ;;  %4037 = vst [vmem:[#allocation17_spill] sm:$0xff] %v3436_v60 }
 0x523   :  { %v731_v49 = vmul.f32 %v2569_v28, %v730_v32  ;;  %v3350_v32 = vld [vmem:[#allocation2 + $0xf0] sm:$0xff]  ;;  %vm645_vm10 = vcmp.eq.f32.partialorder %v644_v45, 8.507059e+37  ;;  %v3439_v45 = vld [vmem:[#allocation2 + $0x28] sm:$0xff] }
 0x524   :  { %v638_v63 = vmul.f32 %v2571_v51, %v637_v41  ;;  %4038 = vst [vmem:[#allocation20_spill] sm:$0xff] %v3439_v45 }
 0x525   :  { %2493 = vset.pattern.permute.xlu1 %v4027_v44  ;;  %v732_v17 = vadd.f32 %v2569_v28, %v731_v49  ;;  %v3353_v49 = vld [vmem:[#allocation2 + $0xf8] sm:$0xff] }
 0x526   :  { %v639_v24 = vadd.f32 %v2571_v51, %v638_v63  ;;  %v3376_v63 = vld [vmem:[#allocation2 + $0x90] sm:$0xff] }
 0x527   :  { %v736_v23 = vsel %vm735_vm4, %v2569_v28, %v732_v17  ;;  %v3358_v17 = vld [vmem:[#allocation2 + $0xd0] sm:$0xff] }
 0x528   :  { %v741_v6 = vsel %vm738_vm5, %v740_v8, %v736_v23  ;;  %v643_v28 = vsel %vm3344_vm9, %v2571_v51, %v639_v24  ;;  %v3361_v51 = vld [vmem:[#allocation2 + $0xd8] sm:$0xff]  ;;  %v3433_v24 = vld [vmem:[#allocation2 + $0x48] sm:$0xff] }
 0x529   :  { %v648_v41 = vsel %vm645_vm10, %v647_v61, %v643_v28  ;;  %v3369_v23 = vld [vmem:[#allocation2 + $0xb8] sm:$0xff]  ;;  %4036 = vst [vmem:[#allocation13_spill] sm:$0xff] %v3433_v24  ;;  %v953_v28 = vmul.f32 %v950_v18, %v4013_v62 }
 0x52a   :  { %v3379_v8 = vld [vmem:[#allocation2 + $0x98] sm:$0xff] }
 0x584   :  { %v758_v12 = vpop.permute.xlu0 %757 }
 0x585   :  { %v760_v16 = vmul.f32 %v758_v12, %v741_v6  ;;  %v3424_v6 = vld [vmem:[#allocation2 + $0x60] sm:$0xff]  ;;  %v3427_v12 = vld [vmem:[#allocation2 + $0x68] sm:$0xff] }
 0x586   :  { %4033 = vst [vmem:[#allocation22_spill] sm:$0xff] %v3424_v6 }
 0x587   :  { %2403 = vmatmul.msk.f32.vlgmr.msra.gmra.mxu2 %vm226_vm8, %v760_v16  ;;  %2404 = vmatmul.msk.f32.vlgmr.msra.gmra.mxu3 %vm226_vm8, %v760_v16  ;;  %v665_v11 = vpop.permute.xlu1 %664  ;;  %4034 = vst [vmem:[#allocation23_spill] sm:$0xff] %v3427_v12 }
 0x588   :  { %2405 = vmatmul.msk.f32.vlgmr.msrb.gmra.mxu0 %vm226_vm8, %v760_v16  ;;  %2406 = vmatmul.msk.f32.vlgmr.msrb.gmra.mxu1 %vm226_vm8, %v760_v16  ;;  %v667_v10 = vmul.f32 %v665_v11, %v648_v41  ;;  %v3430_v16 = vld [vmem:[#allocation2 + $0x40] sm:$0xff]  ;;  %v955_v11 = vadd.f32 %v953_v28, %v4015_v7 }
 0x589   :  { %1089 = vmatpush.msra.mxu2 %v3350_v32  ;;  %1109 = vmatpush.msra.mxu3 %v3353_v49  ;;  %4035 = vst [vmem:[#allocation24_spill] sm:$0xff] %v3430_v16 }
 0x58a   :  { %1132 = vmatpush.msrb.mxu0 %v3189_v38  ;;  %1152 = vmatpush.msrb.mxu1 %v3191_v1 }
 0x58b   :  { %1090 = vmatpush.msra.mxu2 %v3358_v17  ;;  %1110 = vmatpush.msra.mxu3 %v3361_v51 }
 0x58c   :  { %1133 = vmatpush.msrb.mxu0 %v3193_v14  ;;  %1153 = vmatpush.msrb.mxu1 %v3198_v0  ;;  %v958_v61 = vpop.permute.xlu0 %957 }
 0x58d   :  { %1091 = vmatpush.msra.mxu2 %v3366_v19  ;;  %1111 = vmatpush.msra.mxu3 %v3369_v23  ;;  %v961_v41 = vmul.f32 %v958_v61, %v4014_v2 }
 0x58e   :  { %1134 = vmatpush.msrb.mxu0 %v3200_v5  ;;  %1154 = vmatpush.msrb.mxu1 %v3202_v48 }
 0x58f   :  { %2407 = vmatmul.msk.f32.vlgmr.msrb.gmra.mxu2 %vm226_vm8, %v667_v10  ;;  %2408 = vmatmul.msk.f32.vlgmr.msrb.gmra.mxu3 %vm226_vm8, %v667_v10  ;;  %v966_v10 = vpop.permute.xlu1 %965 }
 0x590   :  { %1092 = vmatpush.msra.mxu2 %v3376_v63  ;;  %1112 = vmatpush.msra.mxu3 %v3379_v8 }
 0x591   :  { %1135 = vmatpush.msrb.mxu0 %v3208_v54  ;;  %1155 = vmatpush.msrb.mxu1 %v3210_v52 }
 0x592   :  { %1093 = vmatpush.msra.mxu2 %v3045_v25  ;;  %1113 = vmatpush.msra.mxu3 %v3047_v26  ;;  %v3400_v25 = vld [vmem:[#allocation2 + $0xe0] sm:$0xff]  ;;  %v3403_v26 = vld [vmem:[#allocation2 + $0xe8] sm:$0xff] }
 0x593   :  { %1136 = vmatpush.msrb.mxu0 %v3217_v55  ;;  %1156 = vmatpush.msrb.mxu1 %v3219_v50 }
 0x594   :  { %1094 = vmatpush.msra.mxu2 %v3057_v29  ;;  %1114 = vmatpush.msra.mxu3 %v3059_v30  ;;  %v3406_v29 = vld [vmem:[#allocation2 + $0xc0] sm:$0xff]  ;;  %v3409_v30 = vld [vmem:[#allocation2 + $0xc8] sm:$0xff] }
 0x595   :  { %1137 = vmatpush.msrb.mxu0 %v3221_v43  ;;  %1157 = vmatpush.msrb.mxu1 %v3225_v3 }
 0x596   :  { %1095 = vmatpush.msra.mxu2 %v3069_v33  ;;  %1115 = vmatpush.msra.mxu3 %v3071_v34  ;;  %v3412_v33 = vld [vmem:[#allocation2 + $0xa0] sm:$0xff]  ;;  %v3415_v34 = vld [vmem:[#allocation2 + $0xa8] sm:$0xff] }
 0x597   :  { %1138 = vmatpush.msrb.mxu0 %v3227_v42  ;;  %1158 = vmatpush.msrb.mxu1 %v3229_v4 }
 0x598   :  { %1096 = vmatpush.msra.mxu2 %v3090_v46  ;;  %1116 = vmatpush.msra.mxu3 %v3094_v47  ;;  %v3418_v46 = vld [vmem:[#allocation2 + $0x80] sm:$0xff]  ;;  %v3421_v47 = vld [vmem:[#allocation2 + $0x88] sm:$0xff] }
 0x599   :  { %1139 = vmatpush.msrb.mxu0 %v3233_v37  ;;  %1159 = vmatpush.msrb.mxu1 %v3235_v36  ;;  %4032 = vst [vmem:[#allocation21_spill] sm:$0xff] %v3421_v47 }
 0x59a   :  { %1326 = vmatpush.msrb.mxu2 %v3400_v25  ;;  %1346 = vmatpush.msrb.mxu3 %v3403_v26 }
 0x59c   :  { %1327 = vmatpush.msrb.mxu2 %v3406_v29  ;;  %1347 = vmatpush.msrb.mxu3 %v3409_v30 }
 0x59e   :  { %1328 = vmatpush.msrb.mxu2 %v3412_v33  ;;  %1348 = vmatpush.msrb.mxu3 %v3415_v34 }
 0x5a0   :  { %1329 = vmatpush.msrb.mxu2 %v3418_v46  ;;  %1349 = vmatpush.msrb.mxu3 %v3421_v47 }
 0x5a2   :  { %1330 = vmatpush.msrb.mxu2 %v3424_v6  ;;  %1350 = vmatpush.msrb.mxu3 %v3427_v12 }
 0x5a4   :  { %1331 = vmatpush.msrb.mxu2 %v3430_v16  ;;  %1351 = vmatpush.msrb.mxu3 %v3433_v24  ;;  %v963_v24 = vadd.f32 %v961_v41, %v955_v11  ;;  %v974_v16 = vpop.permute.xlu2 %973 }
 0x5a6   :  { %1332 = vmatpush.msrb.mxu2 %v3436_v60  ;;  %1352 = vmatpush.msrb.mxu3 %v3439_v45  ;;  %v969_v60 = vmul.f32 %v966_v10, %v4016_v13  ;;  %v977_v45 = vmul.f32 %v974_v16, %v4017_v27 }
 0x5a8   :  { %1333 = vmatpush.msrb.mxu2 %v4011_v58  ;;  %1353 = vmatpush.msrb.mxu3 %v4012_v59  ;;  %v971_v12 = vadd.f32 %v969_v60, %v963_v24 }
 0x5aa   :  { %v979_v6 = vadd.f32 %v977_v45, %v971_v12  ;;  %v960_v45 = vmul.f32 %v958_v61, %v4020_v39 }
 0x605   :  { %v841_v58 = vpop.f32.mrf.mxu1 }
 0x606   :  { %v3449_v47 = vadd.f32 %v979_v6, %v841_v58  ;;  %v952_v6 = vmul.f32 %v950_v18, %v4019_v56 }
 0x608   :  { %2572 = vtanh.f32 %v3449_v47  ;;  %v954_v60 = vadd.f32 %v952_v6, %v4021_v9 }
 0x60a   :  { %v801_v59 = vpop.f32.mrf.mxu3  ;;  %v781_v12 = vpop.f32.mrf.mxu2  ;;  %v962_v58 = vadd.f32 %v960_v45, %v954_v60 }
 0x60e   :  { %v2573_v62 = vpop.eup %2572 }
 0x60f   :  { %1023 = vrot.lane.b32.xlu1 %v2573_v62, %s2862_s1 }
 0x612   :  { %v884_v28 = vpop.f32.mrf.mxu3  ;;  %v864_v41 = vpop.f32.mrf.mxu2 }
 0x613   :  { %v885_v2 = vadd.f32 %v884_v28, %v4018_v35  ;;  %v865_v62 = vadd.f32 %v864_v41, %v4024_v31  ;;  %v968_v28 = vmul.f32 %v966_v10, %v4022_v20  ;;  %v976_v35 = vmul.f32 %v974_v16, %v4023_v57 }
 0x615   :  { %v3454_v11 = vadd.f32 %v885_v2, %v801_v59  ;;  %v887_v2 = vadd.f32 %v865_v62, %v781_v12  ;;  %v970_v59 = vadd.f32 %v968_v28, %v962_v58 }
 0x617   :  { %2574 = vtanh.f32 %v3454_v11  ;;  %v2409_v27 = vmul.f32 -1.442695, %v887_v2  ;;  %v978_v13 = vadd.f32 %v976_v35, %v970_v59 }
 0x619   :  { %2576 = vpow2.f32 %v2409_v27 }
 0x61d   :  { %v2575_v24 = vpop.eup %2574 }
 0x61e   :  { %930 = vrot.lane.b32.xlu2 %v2575_v24, %s2862_s1  ;;  %v821_v24 = vpop.f32.mrf.mxu0 }
 0x61f   :  { %v980_v7 = vadd.f32 %v978_v13, %v821_v24  ;;  %v2577_v56 = vpop.eup %2576 }
 0x620   :  { %v895_v6 = vadd.f32 1.0, %v2577_v56 }
 0x621   :  { %v2412_v18 = vmul.f32 -1.442695, %v980_v7 }
 0x622   :  { %v908_v35 = vand.u32 2147483648, %v895_v6  ;;  %vm902_vm12 = vweird.f32 %v895_v6  ;;  %v906_v13 = vand.u32 2147483647, %v895_v6 }
 0x623   :  { %2578 = vpow2.f32 %v2412_v18 }
 0x624   :  { %2580 = vrcp.f32 %v895_v6  ;;  %v909_v27 = vor.u32 1.1754944e-38, %v908_v35  ;;  %vm907_vm14 = vcmp.eq.f32.partialorder %v906_v13, 8.507059e+37 }
 0x629   :  { %v2579_v61 = vpop.eup %2578 }
 0x62a   :  { %v988_v39 = vadd.f32 1.0, %v2579_v61  ;;  %v2581_v41 = vpop.eup %2580 }
 0x62b   :  { %v898_v60 = vmul.f32 %v2581_v41, %v895_v6  ;;  %vm903_vm11 = vweird.f32 %v2581_v41 }
 0x62c   :  { %2582 = vrcp.f32 %v988_v39  ;;  %vm904_vm13 = vmor %vm902_vm12, %vm903_vm11  ;;  %v1001_v18 = vand.u32 2147483648, %v988_v39  ;;  %vm995_vm0 = vweird.f32 %v988_v39  ;;  %v999_v61 = vand.u32 2147483647, %v988_v39 }
 0x62d   :  { %v899_v10 = vsub.f32 1.0, %v898_v60 }
 0x62e   :  { %vm1000_vm2 = vcmp.eq.f32.partialorder %v999_v61, 8.507059e+37 }
 0x62f   :  { %v900_v45 = vmul.f32 %v2581_v41, %v899_v10  ;;  %v1002_v10 = vor.u32 1.1754944e-38, %v1001_v18 }
 0x631   :  { %v901_v16 = vadd.f32 %v2581_v41, %v900_v45 }
 0x632   :  { %v2583_v12 = vpop.eup %2582 }
 0x633   :  { %v991_v62 = vmul.f32 %v2583_v12, %v988_v39  ;;  %v905_v7 = vsel %vm904_vm13, %v2581_v41, %v901_v16  ;;  %vm996_vm15 = vweird.f32 %v2583_v12 }
 0x634   :  { %v910_v2 = vsel %vm907_vm14, %v909_v27, %v905_v7  ;;  %vm997_vm1 = vmor %vm995_vm0, %vm996_vm15 }
 0x635   :  { %v992_v58 = vsub.f32 1.0, %v991_v62  ;;  %v928_v62 = vmul.f32 %v910_v2, %v3326_v15  ;;  %v2413_v15 = vmul.f32 -1.442695, %v3449_v47 }
 0x637   :  { %v993_v56 = vmul.f32 %v2583_v12, %v992_v58 }
 0x639   :  { %v994_v24 = vadd.f32 %v2583_v12, %v993_v56 }
 0x63b   :  { %v998_v60 = vsel %vm997_vm1, %v2583_v12, %v994_v24 }
 0x63c   :  { %v1003_v45 = vsel %vm1000_vm2, %v1002_v10, %v998_v60 }
 0x63d   :  { %v1021_v58 = vmul.f32 %v1003_v45, %v3322_v21  ;;  %v2422_v21 = vld [vmem:[%s3914_s0 + $0x8] sm:$0x3] }
 0x678   :  { %v931_v28 = vpop.permute.xlu2 %930 }
 0x679   :  { %v933_v59 = vmul.f32 %v931_v28, %v910_v2  ;;  %v2410_v28 = vmul.f32 -1.442695, %v3454_v11 }
 0x67b   :  { %935 = vrot.lane.b32.xlu1 %v933_v59, %s2862_s1 }
 0x681   :  { %v1024_v6 = vpop.permute.xlu1 %1023 }
 0x682   :  { %v1026_v41 = vmul.f32 %v1024_v6, %v1003_v45 }
 0x683   :  { %1226 = vperm.xlu1 %2493, %v2422_v21  }
 0x684   :  { %1028 = vrot.lane.b32.xlu0 %v1026_v41, %s2862_s1 }
 0x68b   :  { %2496 = vset.pattern.permute.xlu1 %v4028_v53 }
 0x68c   :  { %1250 = vperm.xlu1 %2496, %v2422_v21  }
 0x694   :  { %2498 = vset.pattern.permute.xlu1 %v4029_v40 }
 0x6ed   :  { %v936_v16 = vpop.permute.xlu1 %935 }
 0x6ee   :  { %v3467_v35 = vadd.f32 %v936_v16, %v928_v62 }
 0x6f0   :  { %2584 = vtanh.f32 %v3467_v35 }
 0x6f6   :  { %v2585_v13 = vpop.eup %2584  ;;  %v1029_v39 = vpop.permute.xlu0 %1028 }
 0x6f7   :  { %v3471_v7 = vadd.f32 %v1029_v39, %v1021_v58  ;;  %941 = vrot.lane.b32.xlu0 %v2585_v13, %s2862_s1 }
 0x6f9   :  { %2586 = vtanh.f32 %v3471_v7 }
 0x6fa   :  { %2588 = vpow2.f32 %v2413_v15 }
 0x6ff   :  { %v2587_v12 = vpop.eup %2586  ;;  %1242 = vperm.xlu0 %2495, %v2422_v21  }
 0x700   :  { %1034 = vrot.lane.b32.xlu2 %v2587_v12, %s2862_s1  ;;  %v2589_v27 = vpop.eup %2588 }
 0x701   :  { %v989_v56 = vadd.f32 1.0, %v2589_v27 }
 0x703   :  { %2590 = vrcp.f32 %v989_v56  ;;  %v1016_v10 = vand.u32 2147483648, %v989_v56  ;;  %vm1010_vm4 = vweird.f32 %v989_v56  ;;  %v1014_v6 = vand.u32 2147483647, %v989_v56 }
 0x704   :  { %2592 = vpow2.f32 %v2410_v28  ;;  %v3513_v28 = vld [vmem:[#allocation2 + $0x50] sm:$0xff] }
 0x705   :  { %v1017_v62 = vor.u32 1.1754944e-38, %v1016_v10  ;;  %vm1015_vm6 = vcmp.eq.f32.partialorder %v1014_v6, 8.507059e+37  ;;  %v4047_v10 = vld [vmem:[#allocation14_spill] sm:$0xff] }
 0x707   :  { %2497 = vset.pattern.permute.xlu0 %v4027_v44 }
 0x708   :  { %1234 = vperm.xlu2 %2494, %v2422_v21   ;;  %v3521_v21 = vld [vmem:[#allocation2 + $0x30] sm:$0xff] }
 0x709   :  { %v2591_v2 = vpop.eup %2590 }
 0x70a   :  { %v2593_v59 = vpop.eup %2592  ;;  %v1006_v24 = vmul.f32 %v2591_v2, %v989_v56  ;;  %vm1011_vm3 = vweird.f32 %v2591_v2 }
 0x70b   :  { %v896_v47 = vadd.f32 1.0, %v2593_v59  ;;  %vm1012_vm5 = vmor %vm1010_vm4, %vm1011_vm3  ;;  %v4045_v59 = vld [vmem:[#allocation20_spill] sm:$0xff] }
 0x70c   :  { %v1007_v11 = vsub.f32 1.0, %v1006_v24  ;;  %v3553_v24 = vld [vmem:[#allocation2] sm:$0xff] }
 0x70d   :  { %2594 = vrcp.f32 %v896_v47  ;;  %v923_v27 = vand.u32 2147483648, %v896_v47  ;;  %vm917_vm9 = vweird.f32 %v896_v47  ;;  %v921_v56 = vand.u32 2147483647, %v896_v47 }
 0x70e   :  { %v1008_v18 = vmul.f32 %v2591_v2, %v1007_v11  ;;  %v1227_v11 = vpop.permute.xlu1 %1226 }
 0x70f   :  { %vm922_vm11 = vcmp.eq.f32.partialorder %v921_v56, 8.507059e+37 }
 0x710   :  { %2499 = vset.pattern.permute.xlu2 %v4008_v22  ;;  %v1009_v60 = vadd.f32 %v2591_v2, %v1008_v18  ;;  %v4046_v18 = vld [vmem:[#allocation12_spill] sm:$0xff] }
 0x712   :  { %v1013_v41 = vsel %vm1012_vm5, %v2591_v2, %v1009_v60  ;;  %v3532_v2 = vld [vmem:[#allocation2 + $0x18] sm:$0xff] }
 0x713   :  { %v2595_v61 = vpop.eup %2594  ;;  %v1018_v16 = vsel %vm1015_vm6, %v1017_v62, %v1013_v41 }
 0x714   :  { %v913_v45 = vmul.f32 %v2595_v61, %v896_v47  ;;  %vm918_vm7 = vweird.f32 %v2595_v61  ;;  %v3556_v47 = vld [vmem:[#allocation2 + $0x8] sm:$0xff] }
 0x715   :  { %vm919_vm10 = vmor %vm917_vm9, %vm918_vm7 }
 0x716   :  { %v914_v13 = vsub.f32 1.0, %v913_v45  ;;  %v4048_v45 = vld [vmem:[#allocation16_spill] sm:$0xff] }
 0x718   :  { %v915_v12 = vmul.f32 %v2595_v61, %v914_v13 }
 0x71a   :  { %v916_v15 = vadd.f32 %v2595_v61, %v915_v12 }
 0x75a   :  { %v1035_v58 = vpop.permute.xlu2 %1034 }
 0x75b   :  { %v1037_v39 = vmul.f32 %v1035_v58, %v1018_v16  ;;  %v4049_v58 = vld [vmem:[#allocation18_spill] sm:$0xff] }
 0x75d   :  { %2414 = vmatmul.msk.f32.vlgmr.msra.gmra.mxu0 %vm226_vm8, %v1037_v39  ;;  %2415 = vmatmul.msk.f32.vlgmr.msra.gmra.mxu1 %vm226_vm8, %v1037_v39 }
 0x75e   :  { %2416 = vmatmul.msk.f32.vlgmr.msra.gmra.mxu2 %vm226_vm8, %v1037_v39  ;;  %2417 = vmatmul.msk.f32.vlgmr.msra.gmra.mxu3 %vm226_vm8, %v1037_v39  ;;  %v1251_v39 = vpop.permute.xlu1 %1250 }
 0x75f   :  { %1366 = vmatpush.msra.mxu0 %v3350_v32  ;;  %1386 = vmatpush.msra.mxu1 %v3353_v49 }
 0x760   :  { %1409 = vmatpush.msra.mxu2 %v3189_v38  ;;  %1429 = vmatpush.msra.mxu3 %v3191_v1  ;;  %v920_v38 = vsel %vm919_vm10, %v2595_v61, %v916_v15  ;;  %v924_v1 = vor.u32 1.1754944e-38, %v923_v27  ;;  %v1230_v61 = vmul.f32 %v1227_v11, %v4046_v18  ;;  %v4050_v15 = vld [vmem:[#allocation19_spill] sm:$0xff] }
 0x761   :  { %1367 = vmatpush.msra.mxu0 %v3358_v17  ;;  %1387 = vmatpush.msra.mxu1 %v3361_v51  ;;  %v1254_v27 = vmul.f32 %v1251_v39, %v4050_v15 }
 0x762   :  { %1410 = vmatpush.msra.mxu2 %v3193_v14  ;;  %1430 = vmatpush.msra.mxu3 %v3198_v0  ;;  %v3505_v14 = vld [vmem:[#allocation2 + $0x70] sm:$0xff]  ;;  %v3508_v0 = vld [vmem:[#allocation2 + $0x78] sm:$0xff]  ;;  %v1235_v60 = vpop.permute.xlu2 %1234  ;;  %v1232_v6 = vadd.f32 %v1230_v61, %v4047_v10 }
 0x763   :  { %1368 = vmatpush.msra.mxu0 %v3366_v19  ;;  %1388 = vmatpush.msra.mxu1 %v3369_v23  ;;  %v1238_v41 = vmul.f32 %v1235_v60, %v4048_v45  ;;  %v4051_v61 = vld [vmem:[#allocation25_spill] sm:$0xff] }
 0x764   :  { %1411 = vmatpush.msra.mxu2 %v3200_v5  ;;  %1431 = vmatpush.msra.mxu3 %v3202_v48  ;;  %v925_v5 = vsel %vm922_vm11, %v924_v1, %v920_v38 }
 0x765   :  { %1369 = vmatpush.msra.mxu0 %v3376_v63  ;;  %1389 = vmatpush.msra.mxu1 %v3379_v8  ;;  %v1240_v16 = vadd.f32 %v1238_v41, %v1232_v6 }
 0x766   :  { %1412 = vmatpush.msra.mxu2 %v3208_v54  ;;  %1432 = vmatpush.msra.mxu3 %v3210_v52  ;;  %v3516_v54 = vld [vmem:[#allocation2 + $0x58] sm:$0xff] }
 0x767   :  { %1370 = vmatpush.msra.mxu0 %v3505_v14  ;;  %1390 = vmatpush.msra.mxu1 %v3508_v0 }
 0x768   :  { %1413 = vmatpush.msra.mxu2 %v3217_v55  ;;  %1433 = vmatpush.msra.mxu3 %v3219_v50  ;;  %v3524_v55 = vld [vmem:[#allocation2 + $0x38] sm:$0xff]  ;;  %v3529_v50 = vld [vmem:[#allocation2 + $0x10] sm:$0xff] }
 0x769   :  { %v942_v48 = vpop.permute.xlu0 %941  ;;  %1371 = vmatpush.msra.mxu0 %v3513_v28  ;;  %1391 = vmatpush.msra.mxu1 %v3516_v54 }
 0x76a   :  { %v944_v52 = vmul.f32 %v942_v48, %v925_v5  ;;  %1414 = vmatpush.msra.mxu2 %v3221_v43  ;;  %1434 = vmatpush.msra.mxu3 %v3225_v3  ;;  %v4039_v43 = vld [vmem:[#allocation21_spill] sm:$0xff]  ;;  %v4040_v3 = vld [vmem:[#allocation22_spill] sm:$0xff] }
 0x76b   :  { %1372 = vmatpush.msra.mxu0 %v3521_v21  ;;  %1392 = vmatpush.msra.mxu1 %v3524_v55 }
 0x76c   :  { %2418 = vmatmul.msk.f32.vlgmr.msrb.gmra.mxu0 %vm226_vm8, %v944_v52  ;;  %2419 = vmatmul.msk.f32.vlgmr.msrb.gmra.mxu1 %vm226_vm8, %v944_v52 }
 0x76d   :  { %1373 = vmatpush.msra.mxu0 %v3529_v50  ;;  %1393 = vmatpush.msra.mxu1 %v3532_v2 }
 0x76e   :  { %1415 = vmatpush.msra.mxu2 %v3227_v42  ;;  %1435 = vmatpush.msra.mxu3 %v3229_v4  ;;  %v4041_v42 = vld [vmem:[#allocation23_spill] sm:$0xff]  ;;  %v4042_v4 = vld [vmem:[#allocation24_spill] sm:$0xff] }
 0x76f   :  { %1603 = vmatpush.msrb.mxu0 %v3400_v25  ;;  %1623 = vmatpush.msrb.mxu1 %v3403_v26 }
 0x770   :  { %1416 = vmatpush.msra.mxu2 %v3233_v37  ;;  %1436 = vmatpush.msra.mxu3 %v3235_v36  ;;  %v4043_v37 = vld [vmem:[#allocation13_spill] sm:$0xff] }
 0x771   :  { %1604 = vmatpush.msrb.mxu0 %v3406_v29  ;;  %1624 = vmatpush.msrb.mxu1 %v3409_v30  ;;  %v4044_v36 = vld [vmem:[#allocation17_spill] sm:$0xff]  ;;  %v1243_v62 = vpop.permute.xlu0 %1242 }
 0x772   :  { %v1246_v13 = vmul.f32 %v1243_v62, %v4049_v58  ;;  %v1245_v15 = vmul.f32 %v1243_v62, %v4022_v20 }
 0x773   :  { %1605 = vmatpush.msrb.mxu0 %v3412_v33  ;;  %1625 = vmatpush.msrb.mxu1 %v3415_v34 }
 0x774   :  { %v1248_v12 = vadd.f32 %v1246_v13, %v1240_v16  ;;  %v4052_v16 = vld [vmem:[#allocation11_spill] sm:$0xff] }
 0x775   :  { %1606 = vmatpush.msrb.mxu0 %v3418_v46  ;;  %1626 = vmatpush.msrb.mxu1 %v4039_v43  ;;  %v1229_v13 = vmul.f32 %v1227_v11, %v4052_v16 }
 0x776   :  { %v1256_v56 = vadd.f32 %v1254_v27, %v1248_v12  ;;  %v4053_v27 = vld [vmem:[#allocation15_spill] sm:$0xff] }
 0x777   :  { %1607 = vmatpush.msrb.mxu0 %v4040_v3  ;;  %1627 = vmatpush.msrb.mxu1 %v4041_v42  ;;  %v1231_v12 = vadd.f32 %v1229_v13, %v4021_v9 }
 0x779   :  { %1608 = vmatpush.msrb.mxu0 %v4042_v4  ;;  %1628 = vmatpush.msrb.mxu1 %v4043_v37 }
 0x77b   :  { %1609 = vmatpush.msrb.mxu0 %v4044_v36  ;;  %1629 = vmatpush.msrb.mxu1 %v4045_v59 }
 0x77d   :  { %1610 = vmatpush.msrb.mxu0 %v3553_v24  ;;  %1630 = vmatpush.msrb.mxu1 %v3556_v47 }
 0x7da   :  { %v1078_v38 = vpop.f32.mrf.mxu1 }
 0x7e1   :  { %v1118_v1 = vpop.f32.mrf.mxu3 }
 0x7e2   :  { %v3564_v5 = vadd.f32 %v1256_v56, %v1118_v1  ;;  %v1237_v56 = vmul.f32 %v1235_v60, %v4053_v27 }
 0x7e4   :  { %2596 = vtanh.f32 %v3564_v5  ;;  %v1239_v1 = vadd.f32 %v1237_v56, %v1231_v12 }
 0x7e6   :  { %v1247_v58 = vadd.f32 %v1245_v15, %v1239_v1 }
 0x7e9   :  { %v1161_v48 = vpop.f32.mrf.mxu1 }
 0x7ea   :  { %v2597_v52 = vpop.eup %2596  ;;  %v1162_v10 = vadd.f32 %v1161_v48, %v4051_v61  ;;  %v1253_v48 = vmul.f32 %v1251_v39, %v4023_v57 }
 0x7eb   :  { %1300 = vrot.lane.b32.xlu2 %v2597_v52, %s2862_s1 }
 0x7ec   :  { %v3569_v6 = vadd.f32 %v1162_v10, %v1078_v38  ;;  %v1255_v52 = vadd.f32 %v1253_v48, %v1247_v58  ;;  %v1098_v10 = vpop.f32.mrf.mxu2 }
 0x7ee   :  { %2598 = vtanh.f32 %v3569_v6  ;;  %v1257_v38 = vadd.f32 %v1255_v52, %v1098_v10 }
 0x7f0   :  { %v2423_v61 = vmul.f32 -1.442695, %v1257_v38 }
 0x7f2   :  { %2600 = vpow2.f32 %v2423_v61 }
 0x7f4   :  { %v2599_v41 = vpop.eup %2598 }
 0x7f5   :  { %1207 = vrot.lane.b32.xlu1 %v2599_v41, %s2862_s1  ;;  %v1058_v41 = vpop.f32.mrf.mxu0 }
 0x7f8   :  { %v2601_v45 = vpop.eup %2600 }
 0x7f9   :  { %v1265_v18 = vadd.f32 1.0, %v2601_v45 }
 0x7fb   :  { %2602 = vrcp.f32 %v1265_v18  ;;  %v1278_v58 = vand.u32 2147483648, %v1265_v18  ;;  %vm1272_vm13 = vweird.f32 %v1265_v18  ;;  %v1276_v1 = vand.u32 2147483647, %v1265_v18 }
 0x7fd   :  { %v1141_v16 = vpop.f32.mrf.mxu0  ;;  %v1279_v45 = vor.u32 1.1754944e-38, %v1278_v58  ;;  %vm1277_vm15 = vcmp.eq.f32.partialorder %v1276_v1, 8.507059e+37 }
 0x7fe   :  { %v1142_v13 = vadd.f32 %v1141_v16, %v4024_v31 }
 0x800   :  { %v1164_v12 = vadd.f32 %v1142_v13, %v1058_v41 }
 0x801   :  { %v2603_v11 = vpop.eup %2602 }
 0x802   :  { %v1268_v60 = vmul.f32 %v2603_v11, %v1265_v18  ;;  %v2420_v62 = vmul.f32 -1.442695, %v1164_v12  ;;  %vm1273_vm12 = vweird.f32 %v2603_v11 }
 0x803   :  { %vm1274_vm14 = vmor %vm1272_vm13, %vm1273_vm12 }
 0x804   :  { %v1269_v56 = vsub.f32 1.0, %v1268_v60  ;;  %2604 = vpow2.f32 %v2420_v62 }
 0x806   :  { %v1270_v15 = vmul.f32 %v2603_v11, %v1269_v56 }
 0x808   :  { %v1271_v39 = vadd.f32 %v2603_v11, %v1270_v15 }
 0x80a   :  { %v1275_v61 = vsel %vm1274_vm14, %v2603_v11, %v1271_v39  ;;  %v2605_v48 = vpop.eup %2604 }
 0x80b   :  { %v1280_v10 = vsel %vm1277_vm15, %v1279_v45, %v1275_v61  ;;  %v1172_v16 = vadd.f32 1.0, %v2605_v48 }
 0x80c   :  { %v1298_v61 = vmul.f32 %v1280_v10, %v3471_v7  ;;  %v2424_v7 = vmul.f32 -1.442695, %v3564_v5 }
 0x80d   :  { %2606 = vrcp.f32 %v1172_v16  ;;  %v1185_v62 = vand.u32 2147483648, %v1172_v16  ;;  %vm1179_vm1 = vweird.f32 %v1172_v16  ;;  %v1183_v18 = vand.u32 2147483647, %v1172_v16 }
 0x80f   :  { %v1186_v15 = vor.u32 1.1754944e-38, %v1185_v62  ;;  %vm1184_vm3 = vcmp.eq.f32.partialorder %v1183_v18, 8.507059e+37  ;;  %v2421_v62 = vmul.f32 -1.442695, %v3569_v6  ;;  %v3609_v6 = vld [vmem:[#allocation5 + $0x70] sm:$0xff] }
 0x813   :  { %v2607_v41 = vpop.eup %2606 }
 0x814   :  { %v1175_v13 = vmul.f32 %v2607_v41, %v1172_v16  ;;  %vm1180_vm0 = vweird.f32 %v2607_v41 }
 0x815   :  { %vm1181_vm2 = vmor %vm1179_vm1, %vm1180_vm0 }
 0x816   :  { %v1176_v60 = vsub.f32 1.0, %v1175_v13 }
 0x818   :  { %v1177_v12 = vmul.f32 %v2607_v41, %v1176_v60 }
 0x81a   :  { %v1178_v56 = vadd.f32 %v2607_v41, %v1177_v12  ;;  %v2433_v12 = vld [vmem:[%s3914_s0 + $0xa] sm:$0x3] }
 0x81c   :  { %v1182_v11 = vsel %vm1181_vm2, %v2607_v41, %v1178_v56 }
 0x81d   :  { %v1187_v58 = vsel %vm1184_vm3, %v1186_v15, %v1182_v11 }
 0x845   :  { %v1301_v52 = vpop.permute.xlu2 %1300 }
 0x846   :  { %v1303_v38 = vmul.f32 %v1301_v52, %v1280_v10 }
 0x848   :  { %1305 = vrot.lane.b32.xlu2 %v1303_v38, %s2862_s1  ;;  %v1205_v38 = vmul.f32 %v1187_v58, %v3467_v35 }
 0x867   :  { %v1208_v39 = vpop.permute.xlu1 %1207 }
 0x868   :  { %v1210_v1 = vmul.f32 %v1208_v39, %v1187_v58 }
 0x86a   :  { %1212 = vrot.lane.b32.xlu0 %v1210_v1, %s2862_s1 }
 0x872   :  { %1503 = vperm.xlu0 %2497, %v2433_v12  }
 0x87a   :  { %2502 = vset.pattern.permute.xlu0 %v4029_v40 }
 0x8a2   :  { %v1306_v45 = vpop.permute.xlu2 %1305 }
 0x8a3   :  { %v3582_v48 = vadd.f32 %v1306_v45, %v1298_v61 }
 0x8a5   :  { %2608 = vtanh.f32 %v3582_v48 }
 0x8ab   :  { %v2609_v52 = vpop.eup %2608 }
 0x8ac   :  { %1311 = vrot.lane.b32.xlu1 %v2609_v52, %s2862_s1 }
 0x8b4   :  { %1511 = vperm.xlu1 %2498, %v2433_v12  }
 0x8bc   :  { %2500 = vset.pattern.permute.xlu1 %v4028_v53 }
 0x8bd   :  { %1527 = vperm.xlu1 %2500, %v2433_v12  }
 0x8c5   :  { %2503 = vset.pattern.permute.xlu1 %v4008_v22 }
 0x8dc   :  { %v1213_v16 = vpop.permute.xlu0 %1212 }
 0x8dd   :  { %v3587_v41 = vadd.f32 %v1213_v16, %v1205_v38 }
 0x8df   :  { %2610 = vtanh.f32 %v3587_v41 }
 0x8e0   :  { %2612 = vpow2.f32 %v2424_v7  ;;  %v3617_v7 = vld [vmem:[#allocation5 + $0x60] sm:$0xff] }
 0x8e5   :  { %v2611_v13 = vpop.eup %2610 }
 0x8e6   :  { %1218 = vrot.lane.b32.xlu2 %v2611_v13, %s2862_s1  ;;  %v2613_v10 = vpop.eup %2612  ;;  %v3612_v13 = vld [vmem:[#allocation5 + $0x78] sm:$0xff] }
 0x8e7   :  { %v1266_v60 = vadd.f32 1.0, %v2613_v10  ;;  %v3628_v10 = vld [vmem:[#allocation5 + $0x58] sm:$0xff] }
 0x8e9   :  { %2614 = vrcp.f32 %v1266_v60  ;;  %v1293_v15 = vand.u32 2147483648, %v1266_v60  ;;  %vm1287_vm5 = vweird.f32 %v1266_v60  ;;  %v1291_v39 = vand.u32 2147483647, %v1266_v60 }
 0x8ea   :  { %2616 = vpow2.f32 %v2421_v62  ;;  %v3666_v62 = vld [vmem:[#allocation5] sm:$0xff] }
 0x8eb   :  { %v1294_v1 = vor.u32 1.1754944e-38, %v1293_v15  ;;  %vm1292_vm7 = vcmp.eq.f32.partialorder %v1291_v39, 8.507059e+37 }
 0x8ee   :  { %1519 = vperm.xlu2 %2499, %v2433_v12   ;;  %v3653_v12 = vld [vmem:[#allocation5 + $0x28] sm:$0xff] }
 0x8ef   :  { %v2615_v35 = vpop.eup %2614 }
 0x8f0   :  { %v1283_v5 = vmul.f32 %v2615_v35, %v1266_v60  ;;  %vm1288_vm4 = vweird.f32 %v2615_v35  ;;  %v2617_v61 = vpop.eup %2616  ;;  %v3650_v60 = vld [vmem:[#allocation5 + $0x20] sm:$0xff] }
 0x8f1   :  { %vm1289_vm6 = vmor %vm1287_vm5, %vm1288_vm4  ;;  %v3600_v16 = vadd.f32 1.0, %v2617_v61 }
 0x8f2   :  { %v1284_v56 = vsub.f32 1.0, %v1283_v5  ;;  %v3661_v5 = vld [vmem:[#allocation5 + $0x18] sm:$0xff] }
 0x8f3   :  { %2618 = vrcp.f32 %v3600_v16  ;;  %v1200_v39 = vand.u32 2147483648, %v3600_v16  ;;  %vm1194_vm10 = vweird.f32 %v3600_v16 }
 0x8f4   :  { %v1285_v18 = vmul.f32 %v2615_v35, %v1284_v56 }
 0x8f5   :  { %v1201_v61 = vor.u32 1.1754944e-38, %v1200_v39  ;;  %v4059_v39 = vld [vmem:[#allocation11_spill] sm:$0xff] }
 0x8f6   :  { %2501 = vset.pattern.permute.xlu2 %v4027_v44  ;;  %v1286_v11 = vadd.f32 %v2615_v35, %v1285_v18  ;;  %v3669_v18 = vld [vmem:[#allocation5 + $0x8] sm:$0xff] }
 0x8f8   :  { %v1290_v58 = vsel %vm1289_vm6, %v2615_v35, %v1286_v11  ;;  %v3658_v35 = vld [vmem:[#allocation5 + $0x10] sm:$0xff] }
 0x8f9   :  { %v1295_v45 = vsel %vm1292_vm7, %v1294_v1, %v1290_v58  ;;  %v1198_v58 = vand.u32 2147483647, %v3600_v16 }
 0x8fb   :  { %vm1199_vm12 = vcmp.eq.f32.partialorder %v1198_v58, 8.507059e+37 }
 0x91e   :  { %v1312_v52 = vpop.permute.xlu1 %1311 }
 0x91f   :  { %v1314_v38 = vmul.f32 %v1312_v52, %v1295_v45 }
 0x921   :  { %2425 = vmatmul.msk.f32.vlgmr.msrb.gmra.mxu2 %vm226_vm8, %v1314_v38  ;;  %2426 = vmatmul.msk.f32.vlgmr.msrb.gmra.mxu3 %vm226_vm8, %v1314_v38 }
 0x922   :  { %2427 = vmatmul.msk.f32.vlgmr.msra.gmra.mxu0 %vm226_vm8, %v1314_v38  ;;  %2428 = vmatmul.msk.f32.vlgmr.msra.gmra.mxu1 %vm226_vm8, %v1314_v38 }
 0x923   :  { %1643 = vmatpush.msrb.mxu2 %v3350_v32  ;;  %1663 = vmatpush.msrb.mxu3 %v3353_v49  ;;  %v3620_v32 = vld [vmem:[#allocation5 + $0x68] sm:$0xff]  ;;  %v3625_v49 = vld [vmem:[#allocation5 + $0x50] sm:$0xff] }
 0x924   :  { %1686 = vmatpush.msra.mxu0 %v3609_v6  ;;  %1706 = vmatpush.msra.mxu1 %v3612_v13 }
 0x925   :  { %1644 = vmatpush.msrb.mxu2 %v3358_v17  ;;  %1664 = vmatpush.msrb.mxu3 %v3361_v51  ;;  %v2619_v17 = vpop.eup %2618  ;;  %v3633_v51 = vld [vmem:[#allocation5 + $0x40] sm:$0xff] }
 0x926   :  { %1687 = vmatpush.msra.mxu0 %v3617_v7  ;;  %1707 = vmatpush.msra.mxu1 %v3620_v32  ;;  %vm1195_vm9 = vweird.f32 %v2619_v17 }
 0x927   :  { %1645 = vmatpush.msrb.mxu2 %v3366_v19  ;;  %1665 = vmatpush.msrb.mxu3 %v3369_v23  ;;  %v3636_v19 = vld [vmem:[#allocation5 + $0x48] sm:$0xff]  ;;  %v3641_v23 = vld [vmem:[#allocation5 + $0x30] sm:$0xff]  ;;  %vm1196_vm11 = vmor %vm1194_vm10, %vm1195_vm9 }
 0x928   :  { %1688 = vmatpush.msra.mxu0 %v3625_v49  ;;  %1708 = vmatpush.msra.mxu1 %v3628_v10 }
 0x929   :  { %1646 = vmatpush.msrb.mxu2 %v3376_v63  ;;  %1666 = vmatpush.msrb.mxu3 %v3379_v8  ;;  %v3644_v63 = vld [vmem:[#allocation5 + $0x38] sm:$0xff]  ;;  %v1190_v8 = vmul.f32 %v2619_v17, %v3600_v16 }
 0x92a   :  { %1689 = vmatpush.msra.mxu0 %v3633_v51  ;;  %1709 = vmatpush.msra.mxu1 %v3636_v19 }
 0x92b   :  { %1647 = vmatpush.msrb.mxu2 %v3505_v14  ;;  %1667 = vmatpush.msrb.mxu3 %v3508_v0  ;;  %v1191_v56 = vsub.f32 1.0, %v1190_v8 }
 0x92c   :  { %1690 = vmatpush.msra.mxu0 %v3641_v23  ;;  %1710 = vmatpush.msra.mxu1 %v3644_v63 }
 0x92d   :  { %1648 = vmatpush.msrb.mxu2 %v3513_v28  ;;  %1668 = vmatpush.msrb.mxu3 %v3516_v54  ;;  %v1192_v11 = vmul.f32 %v2619_v17, %v1191_v56 }
 0x92e   :  { %1691 = vmatpush.msra.mxu0 %v3650_v60  ;;  %1711 = vmatpush.msra.mxu1 %v3653_v12 }
 0x92f   :  { %1649 = vmatpush.msrb.mxu2 %v3521_v21  ;;  %1669 = vmatpush.msrb.mxu3 %v3524_v55  ;;  %v1193_v15 = vadd.f32 %v2619_v17, %v1192_v11 }
 0x930   :  { %1692 = vmatpush.msra.mxu0 %v3658_v35  ;;  %1712 = vmatpush.msra.mxu1 %v3661_v5 }
 0x931   :  { %1650 = vmatpush.msrb.mxu2 %v3529_v50  ;;  %1670 = vmatpush.msrb.mxu3 %v3532_v2  ;;  %v1197_v1 = vsel %vm1196_vm11, %v2619_v17, %v1193_v15  ;;  %v4058_v17 = vld [vmem:[#allocation19_spill] sm:$0xff] }
 0x932   :  { %1693 = vmatpush.msra.mxu0 %v3666_v62  ;;  %1713 = vmatpush.msra.mxu1 %v3669_v18  ;;  %v1202_v45 = vsel %vm1199_vm12, %v1201_v61, %v1197_v1 }
 0x940   :  { %v1219_v52 = vpop.permute.xlu2 %1218 }
 0x941   :  { %v1221_v38 = vmul.f32 %v1219_v52, %v1202_v45 }
 0x943   :  { %2429 = vmatmul.msk.f32.vlgmr.msra.gmra.mxu2 %vm226_vm8, %v1221_v38  ;;  %2430 = vmatmul.msk.f32.vlgmr.msra.gmra.mxu3 %vm226_vm8, %v1221_v38 }
 0x944   :  { %1880 = vmatpush.msra.mxu2 %v3400_v25  ;;  %1900 = vmatpush.msra.mxu3 %v3403_v26  ;;  %v1504_v25 = vpop.permute.xlu0 %1503  ;;  %v1512_v26 = vpop.permute.xlu1 %1511 }
 0x945   :  { %v1506_v58 = vmul.f32 %v1504_v25, %v4059_v39  ;;  %v1514_v61 = vmul.f32 %v1512_v26, %v4053_v27 }
 0x946   :  { %1881 = vmatpush.msra.mxu2 %v3406_v29  ;;  %1901 = vmatpush.msra.mxu3 %v3409_v30  ;;  %v4054_v29 = vld [vmem:[#allocation12_spill] sm:$0xff] }
 0x947   :  { %v1507_v30 = vmul.f32 %v1504_v25, %v4054_v29  ;;  %v1508_v45 = vadd.f32 %v1506_v58, %v4021_v9 }
 0x948   :  { %1882 = vmatpush.msra.mxu2 %v3412_v33  ;;  %1902 = vmatpush.msra.mxu3 %v3415_v34  ;;  %v4055_v33 = vld [vmem:[#allocation16_spill] sm:$0xff] }
 0x949   :  { %v1515_v34 = vmul.f32 %v1512_v26, %v4055_v33  ;;  %v1516_v52 = vadd.f32 %v1514_v61, %v1508_v45 }
 0x94a   :  { %1883 = vmatpush.msra.mxu2 %v3418_v46  ;;  %1903 = vmatpush.msra.mxu3 %v4039_v43  ;;  %v4056_v46 = vld [vmem:[#allocation14_spill] sm:$0xff] }
 0x94b   :  { %v1509_v43 = vadd.f32 %v1507_v30, %v4056_v46 }
 0x94c   :  { %1884 = vmatpush.msra.mxu2 %v4040_v3  ;;  %1904 = vmatpush.msra.mxu3 %v4041_v42  ;;  %v1520_v3 = vpop.permute.xlu2 %1519  ;;  %v1528_v16 = vpop.permute.xlu1 %1527 }
 0x94d   :  { %v1517_v42 = vadd.f32 %v1515_v34, %v1509_v43  ;;  %v1522_v38 = vmul.f32 %v1520_v3, %v4022_v20  ;;  %v4060_v34 = vld [vmem:[#allocation25_spill] sm:$0xff] }
 0x94e   :  { %1885 = vmatpush.msra.mxu2 %v4042_v4  ;;  %1905 = vmatpush.msra.mxu3 %v4043_v37  ;;  %v4057_v4 = vld [vmem:[#allocation18_spill] sm:$0xff] }
 0x94f   :  { %v1523_v37 = vmul.f32 %v1520_v3, %v4057_v4 }
 0x950   :  { %1886 = vmatpush.msra.mxu2 %v4044_v36  ;;  %1906 = vmatpush.msra.mxu3 %v4045_v59  ;;  %v1531_v59 = vmul.f32 %v1528_v16, %v4058_v17 }
 0x951   :  { %v1525_v36 = vadd.f32 %v1523_v37, %v1517_v42  ;;  %v1524_v37 = vadd.f32 %v1522_v38, %v1516_v52 }
 0x952   :  { %1887 = vmatpush.msra.mxu2 %v3553_v24  ;;  %1907 = vmatpush.msra.mxu3 %v3556_v47 }
 0x953   :  { %v1533_v8 = vadd.f32 %v1531_v59, %v1525_v36  ;;  %v1530_v36 = vmul.f32 %v1528_v16, %v4023_v57 }
 0x955   :  { %v1532_v59 = vadd.f32 %v1530_v36, %v1524_v37 }
 0x99f   :  { %v1395_v56 = vpop.f32.mrf.mxu1  ;;  %v1375_v25 = vpop.f32.mrf.mxu0 }
 0x9a0   :  { %v3698_v11 = vadd.f32 %v1533_v8, %v1395_v56  ;;  %v1534_v56 = vadd.f32 %v1532_v59, %v1375_v25 }
 0x9a2   :  { %2620 = vtanh.f32 %v3698_v11  ;;  %v2434_v26 = vmul.f32 -1.442695, %v1534_v56 }
 0x9a4   :  { %v1355_v1 = vpop.f32.mrf.mxu3  ;;  %v1335_v59 = vpop.f32.mrf.mxu2 }
 0x9a8   :  { %v2621_v15 = vpop.eup %2620 }
 0x9a9   :  { %1577 = vrot.lane.b32.xlu2 %v2621_v15, %s2862_s1 }
 0x9c6   :  { %v1438_v30 = vpop.f32.mrf.mxu3 }
 0x9c7   :  { %v1439_v43 = vadd.f32 %v1438_v30, %v4060_v34 }
 0x9c9   :  { %v3707_v42 = vadd.f32 %v1439_v43, %v1355_v1 }
 0x9cb   :  { %2622 = vtanh.f32 %v3707_v42 }
 0x9cc   :  { %2624 = vpow2.f32 %v2434_v26 }
 0x9d1   :  { %v2623_v8 = vpop.eup %2622 }
 0x9d2   :  { %1484 = vrot.lane.b32.xlu0 %v2623_v8, %s2862_s1  ;;  %v2625_v15 = vpop.eup %2624  ;;  %v1418_v8 = vpop.f32.mrf.mxu2 }
 0x9d3   :  { %v1542_v3 = vadd.f32 1.0, %v2625_v15  ;;  %v1419_v56 = vadd.f32 %v1418_v8, %v4024_v31 }
 0x9d5   :  { %2626 = vrcp.f32 %v1542_v3  ;;  %v1555_v16 = vand.u32 2147483648, %v1542_v3  ;;  %vm1549_vm14 = vweird.f32 %v1542_v3  ;;  %v1553_v38 = vand.u32 2147483647, %v1542_v3 }
 0x9d6   :  { %v1441_v26 = vadd.f32 %v1419_v56, %v1335_v59 }
 0x9d7   :  { %v1556_v43 = vor.u32 1.1754944e-38, %v1555_v16  ;;  %vm1554_vm0 = vcmp.eq.f32.partialorder %v1553_v38, 8.507059e+37 }
 0x9d8   :  { %v2431_v15 = vmul.f32 -1.442695, %v1441_v26 }
 0x9da   :  { %2628 = vpow2.f32 %v2431_v15 }
 0x9db   :  { %v2627_v58 = vpop.eup %2626 }
 0x9dc   :  { %v1545_v61 = vmul.f32 %v2627_v58, %v1542_v3  ;;  %vm1550_vm13 = vweird.f32 %v2627_v58 }
 0x9dd   :  { %vm1551_vm15 = vmor %vm1549_vm14, %vm1550_vm13 }
 0x9de   :  { %v1546_v1 = vsub.f32 1.0, %v1545_v61 }
 0x9e0   :  { %v1547_v45 = vmul.f32 %v2627_v58, %v1546_v1  ;;  %v2629_v61 = vpop.eup %2628 }
 0x9e1   :  { %v1449_v1 = vadd.f32 1.0, %v2629_v61 }
 0x9e2   :  { %v1548_v52 = vadd.f32 %v2627_v58, %v1547_v45 }
 0x9e3   :  { %2630 = vrcp.f32 %v1449_v1  ;;  %v1462_v38 = vand.u32 2147483648, %v1449_v1  ;;  %vm1456_vm2 = vweird.f32 %v1449_v1 }
 0x9e4   :  { %v1552_v30 = vsel %vm1551_vm15, %v2627_v58, %v1548_v52 }
 0x9e5   :  { %v1557_v36 = vsel %vm1554_vm0, %v1556_v43, %v1552_v30  ;;  %v1460_v30 = vand.u32 2147483647, %v1449_v1 }
 0x9e6   :  { %v1575_v56 = vmul.f32 %v1557_v36, %v3582_v48  ;;  %v2435_v48 = vmul.f32 -1.442695, %v3698_v11 }
 0x9e7   :  { %vm1461_vm4 = vcmp.eq.f32.partialorder %v1460_v30, 8.507059e+37 }
 0x9e9   :  { %v2631_v3 = vpop.eup %2630 }
 0x9ea   :  { %v1452_v45 = vmul.f32 %v2631_v3, %v1449_v1  ;;  %vm1457_vm1 = vweird.f32 %v2631_v3 }
 0x9eb   :  { %vm1458_vm3 = vmor %vm1456_vm2, %vm1457_vm1 }
 0x9ec   :  { %v1453_v58 = vsub.f32 1.0, %v1452_v45 }
 0x9ee   :  { %v1454_v52 = vmul.f32 %v2631_v3, %v1453_v58 }
 0x9f0   :  { %v1455_v16 = vadd.f32 %v2631_v3, %v1454_v52 }
 0x9f2   :  { %v1459_v43 = vsel %vm1458_vm3, %v2631_v3, %v1455_v16  ;;  %v2444_v16 = vld [vmem:[%s3914_s0 + $0xc] sm:$0x3] }
 0xa03   :  { %v1578_v37 = vpop.permute.xlu2 %1577 }
 0xa04   :  { %v1580_v25 = vmul.f32 %v1578_v37, %v1557_v36  ;;  %v1463_v37 = vor.u32 1.1754944e-38, %v1462_v38 }
 0xa06   :  { %1582 = vrot.lane.b32.xlu1 %v1580_v25, %s2862_s1  ;;  %v1464_v59 = vsel %vm1461_vm4, %v1463_v37, %v1459_v43 }
 0xa07   :  { %v1482_v1 = vmul.f32 %v1464_v59, %v3587_v41 }
 0xa44   :  { %v1485_v25 = vpop.permute.xlu0 %1484 }
 0xa45   :  { %v1487_v8 = vmul.f32 %v1485_v25, %v1464_v59  ;;  %v2432_v59 = vmul.f32 -1.442695, %v3707_v42 }
 0xa47   :  { %1489 = vrot.lane.b32.xlu2 %v1487_v8, %s2862_s1 }
 0xa4f   :  { %1780 = vperm.xlu2 %2501, %v2444_v16  }
 0xa57   :  { %2504 = vset.pattern.permute.xlu2 %v4028_v53 }
 0xa58   :  { %1804 = vperm.xlu2 %2504, %v2444_v16  }
 0xa60   :  { %2506 = vset.pattern.permute.xlu2 %v4029_v40  ;;  %v2752_v40 = vld [vmem:[#allocation2 + $0xf0] sm:$0xff] }
 0xa78   :  { %v1583_v26 = vpop.permute.xlu1 %1582 }
 0xa79   :  { %v3716_v15 = vadd.f32 %v1583_v26, %v1575_v56 }
 0xa7b   :  { %2632 = vtanh.f32 %v3716_v15 }
 0xa81   :  { %v2633_v61 = vpop.eup %2632 }
 0xa82   :  { %1588 = vrot.lane.b32.xlu0 %v2633_v61, %s2862_s1  ;;  %v2753_v61 = vld [vmem:[#allocation2 + $0xf8] sm:$0xff] }
 0xa8a   :  { %1788 = vperm.xlu0 %2502, %v2444_v16  }
 0xa92   :  { %2507 = vset.pattern.permute.xlu0 %v4008_v22 }
 0xaa1   :  { %v1490_v3 = vpop.permute.xlu2 %1489 }
 0xaa2   :  { %v3721_v45 = vadd.f32 %v1490_v3, %v1482_v1  ;;  %v2754_v1 = vld [vmem:[#allocation2 + $0xd0] sm:$0xff]  ;;  %v2755_v3 = vld [vmem:[#allocation2 + $0xd8] sm:$0xff] }
 0xaa4   :  { %2634 = vtanh.f32 %v3721_v45 }
 0xaa5   :  { %2636 = vpow2.f32 %v2435_v48  ;;  %v2756_v48 = vld [vmem:[#allocation2 + $0xb0] sm:$0xff] }
 0xaaa   :  { %v2635_v58 = vpop.eup %2634 }
 0xaab   :  { %1495 = vrot.lane.b32.xlu1 %v2635_v58, %s2862_s1  ;;  %v2637_v36 = vpop.eup %2636 }
 0xaac   :  { %v1543_v52 = vadd.f32 1.0, %v2637_v36  ;;  %v2757_v36 = vld [vmem:[#allocation2 + $0xb8] sm:$0xff] }
 0xaae   :  { %2638 = vrcp.f32 %v1543_v52  ;;  %v1570_v37 = vand.u32 2147483648, %v1543_v52  ;;  %vm1564_vm6 = vweird.f32 %v1543_v52  ;;  %v1568_v25 = vand.u32 2147483647, %v1543_v52 }
 0xaaf   :  { %2640 = vpow2.f32 %v2432_v59  ;;  %v2763_v59 = vld [vmem:[#allocation2 + $0xc8] sm:$0xff] }
 0xab0   :  { %v1571_v56 = vor.u32 1.1754944e-38, %v1570_v37  ;;  %vm1569_vm9 = vcmp.eq.f32.partialorder %v1568_v25, 8.507059e+37  ;;  %v2761_v37 = vld [vmem:[#allocation2 + $0xe8] sm:$0xff]  ;;  %v2762_v25 = vld [vmem:[#allocation2 + $0xc0] sm:$0xff] }
 0xab3   :  { %1796 = vperm.xlu1 %2503, %v2444_v16   ;;  %v2759_v16 = vld [vmem:[#allocation2 + $0x98] sm:$0xff] }
 0xab4   :  { %v2639_v41 = vpop.eup %2638 }
 0xab5   :  { %v1560_v38 = vmul.f32 %v2639_v41, %v1543_v52  ;;  %vm1565_vm5 = vweird.f32 %v2639_v41  ;;  %v2641_v42 = vpop.eup %2640  ;;  %v2758_v52 = vld [vmem:[#allocation2 + $0x90] sm:$0xff] }
 0xab6   :  { %vm1566_vm7 = vmor %vm1564_vm6, %vm1565_vm5  ;;  %v1450_v58 = vadd.f32 1.0, %v2641_v42  ;;  %v2771_v42 = vld [vmem:[#allocation2 + $0x48] sm:$0xff] }
 0xab7   :  { %v1561_v11 = vsub.f32 1.0, %v1560_v38 }
 0xab8   :  { %2642 = vrcp.f32 %v1450_v58  ;;  %vm1471_vm11 = vweird.f32 %v1450_v58 }
 0xab9   :  { %v1562_v30 = vmul.f32 %v2639_v41, %v1561_v11 }
 0xabb   :  { %2505 = vset.pattern.permute.xlu1 %v4027_v44  ;;  %v1563_v43 = vadd.f32 %v2639_v41, %v1562_v30 }
 0xabd   :  { %v1567_v8 = vsel %vm1566_vm7, %v2639_v41, %v1563_v43 }
 0xabe   :  { %v1572_v22 = vsel %vm1569_vm9, %v1571_v56, %v1567_v8  ;;  %v2764_v8 = vld [vmem:[#allocation2 + $0xa0] sm:$0xff]  ;;  %v2765_v56 = vld [vmem:[#allocation2 + $0xa8] sm:$0xff] }
 0xaf4   :  { %v1589_v44 = vpop.permute.xlu0 %1588 }
 0xaf5   :  { %v1591_v26 = vmul.f32 %v1589_v44, %v1572_v22  ;;  %v2766_v22 = vld [vmem:[#allocation2 + $0x80] sm:$0xff]  ;;  %v2767_v44 = vld [vmem:[#allocation2 + $0x88] sm:$0xff] }
 0xaf7   :  { %2436 = vmatmul.msk.f32.vlgmr.msrb.gmra.mxu0 %vm226_vm8, %v1591_v26  ;;  %2437 = vmatmul.msk.f32.vlgmr.msrb.gmra.mxu1 %vm226_vm8, %v1591_v26 }
 0xaf8   :  { %2438 = vmatmul.msk.f32.vlgmr.msrb.gmra.mxu2 %vm226_vm8, %v1591_v26  ;;  %2439 = vmatmul.msk.f32.vlgmr.msrb.gmra.mxu3 %vm226_vm8, %v1591_v26  ;;  %v2768_v26 = vld [vmem:[#allocation2 + $0x60] sm:$0xff] }
 0xaf9   :  { %1920 = vmatpush.msrb.mxu0 %v2752_v40  ;;  %1940 = vmatpush.msrb.mxu1 %v2753_v61  ;;  %v2769_v40 = vld [vmem:[#allocation2 + $0x68] sm:$0xff]  ;;  %v2770_v61 = vld [vmem:[#allocation2 + $0x40] sm:$0xff] }
 0xafa   :  { %1963 = vmatpush.msrb.mxu2 %v3609_v6  ;;  %1983 = vmatpush.msrb.mxu3 %v3612_v13 }
 0xafb   :  { %1921 = vmatpush.msrb.mxu0 %v2754_v1  ;;  %1941 = vmatpush.msrb.mxu1 %v2755_v3  ;;  %v2772_v1 = vld [vmem:[#allocation2 + $0x20] sm:$0xff]  ;;  %v2773_v3 = vld [vmem:[#allocation2 + $0x28] sm:$0xff] }
 0xafc   :  { %1964 = vmatpush.msrb.mxu2 %v3617_v7  ;;  %1984 = vmatpush.msrb.mxu3 %v3620_v32 }
 0xafd   :  { %1922 = vmatpush.msrb.mxu0 %v2756_v48  ;;  %1942 = vmatpush.msrb.mxu1 %v2757_v36  ;;  %v1789_v36 = vpop.permute.xlu0 %1788 }
 0xafe   :  { %1965 = vmatpush.msrb.mxu2 %v3625_v49  ;;  %1985 = vmatpush.msrb.mxu3 %v3628_v10 }
 0xaff   :  { %1923 = vmatpush.msrb.mxu0 %v2758_v52  ;;  %1943 = vmatpush.msrb.mxu1 %v2759_v16  ;;  %v1792_v16 = vmul.f32 %v1789_v36, %v4055_v33 }
 0xb00   :  { %1966 = vmatpush.msrb.mxu2 %v3633_v51  ;;  %1986 = vmatpush.msrb.mxu3 %v3636_v19 }
 0xb01   :  { %1924 = vmatpush.msrb.mxu0 %v3505_v14  ;;  %1944 = vmatpush.msrb.mxu1 %v3508_v0  ;;  %v2643_v14 = vpop.eup %2642 }
 0xb02   :  { %1967 = vmatpush.msrb.mxu2 %v3641_v23  ;;  %1987 = vmatpush.msrb.mxu3 %v3644_v63  ;;  %v1467_v0 = vmul.f32 %v2643_v14, %v1450_v58  ;;  %vm1472_vm10 = vweird.f32 %v2643_v14 }
 0xb03   :  { %1925 = vmatpush.msrb.mxu0 %v3513_v28  ;;  %1945 = vmatpush.msrb.mxu1 %v3516_v54  ;;  %vm1473_vm12 = vmor %vm1471_vm11, %vm1472_vm10 }
 0xb04   :  { %1968 = vmatpush.msrb.mxu2 %v3650_v60  ;;  %1988 = vmatpush.msrb.mxu3 %v3653_v12  ;;  %v1468_v28 = vsub.f32 1.0, %v1467_v0 }
 0xb05   :  { %1926 = vmatpush.msrb.mxu0 %v3521_v21  ;;  %1946 = vmatpush.msrb.mxu1 %v3524_v55  ;;  %v1477_v21 = vand.u32 2147483648, %v1450_v58  ;;  %v1475_v55 = vand.u32 2147483647, %v1450_v58  ;;  %v1781_v58 = vpop.permute.xlu2 %1780 }
 0xb06   :  { %1969 = vmatpush.msrb.mxu2 %v3658_v35  ;;  %1989 = vmatpush.msrb.mxu3 %v3661_v5  ;;  %v1469_v54 = vmul.f32 %v2643_v14, %v1468_v28  ;;  %v1784_v48 = vmul.f32 %v1781_v58, %v4054_v29 }
 0xb07   :  { %1927 = vmatpush.msrb.mxu0 %v3529_v50  ;;  %1947 = vmatpush.msrb.mxu1 %v3532_v2  ;;  %v1478_v11 = vor.u32 1.1754944e-38, %v1477_v21  ;;  %vm1476_vm13 = vcmp.eq.f32.partialorder %v1475_v55, 8.507059e+37  ;;  %v2760_v2 = vld [vmem:[#allocation2 + $0xe0] sm:$0xff] }
 0xb08   :  { %1970 = vmatpush.msrb.mxu2 %v3666_v62  ;;  %1990 = vmatpush.msrb.mxu3 %v3669_v18  ;;  %v1470_v41 = vadd.f32 %v2643_v14, %v1469_v54  ;;  %v1786_v52 = vadd.f32 %v1784_v48, %v4056_v46 }
 0xb0a   :  { %v1474_v38 = vsel %vm1473_vm12, %v2643_v14, %v1470_v41  ;;  %v1794_v0 = vadd.f32 %v1792_v16, %v1786_v52 }
 0xb0b   :  { %v1479_v30 = vsel %vm1476_vm13, %v1478_v11, %v1474_v38 }
 0xb0d   :  { %v1805_v54 = vpop.permute.xlu2 %1804 }
 0xb0e   :  { %v1808_v21 = vmul.f32 %v1805_v54, %v4058_v17 }
 0xb1d   :  { %v1496_v50 = vpop.permute.xlu1 %1495 }
 0xb1e   :  { %v1498_v43 = vmul.f32 %v1496_v50, %v1479_v30 }
 0xb20   :  { %2440 = vmatmul.msk.f32.vlgmr.msra.gmra.mxu0 %vm226_vm8, %v1498_v43  ;;  %2441 = vmatmul.msk.f32.vlgmr.msra.gmra.mxu1 %vm226_vm8, %v1498_v43 }
 0xb21   :  { %2157 = vmatpush.msra.mxu0 %v2760_v2  ;;  %2177 = vmatpush.msra.mxu1 %v2761_v37  ;;  %v1783_v37 = vmul.f32 %v1781_v58, %v4059_v39 }
 0xb23   :  { %2158 = vmatpush.msra.mxu0 %v2762_v25  ;;  %2178 = vmatpush.msra.mxu1 %v2763_v59  ;;  %v1785_v25 = vadd.f32 %v1783_v37, %v4021_v9  ;;  %v1791_v59 = vmul.f32 %v1789_v36, %v4053_v27 }
 0xb25   :  { %2159 = vmatpush.msra.mxu0 %v2764_v8  ;;  %2179 = vmatpush.msra.mxu1 %v2765_v56  ;;  %v1797_v14 = vpop.permute.xlu1 %1796  ;;  %v1793_v8 = vadd.f32 %v1791_v59, %v1785_v25 }
 0xb26   :  { %v1800_v28 = vmul.f32 %v1797_v14, %v4057_v4  ;;  %v1799_v56 = vmul.f32 %v1797_v14, %v4022_v20 }
 0xb27   :  { %2160 = vmatpush.msra.mxu0 %v2766_v22  ;;  %2180 = vmatpush.msra.mxu1 %v2767_v44  ;;  %v1807_v44 = vmul.f32 %v1805_v54, %v4023_v57 }
 0xb28   :  { %v1802_v41 = vadd.f32 %v1800_v28, %v1794_v0  ;;  %v1801_v22 = vadd.f32 %v1799_v56, %v1793_v8 }
 0xb29   :  { %2161 = vmatpush.msra.mxu0 %v2768_v26  ;;  %2181 = vmatpush.msra.mxu1 %v2769_v40 }
 0xb2a   :  { %v1810_v55 = vadd.f32 %v1808_v21, %v1802_v41  ;;  %v1809_v26 = vadd.f32 %v1807_v44, %v1801_v22 }
 0xb2b   :  { %2162 = vmatpush.msra.mxu0 %v2770_v61  ;;  %2182 = vmatpush.msra.mxu1 %v2771_v42 }
 0xb2d   :  { %2163 = vmatpush.msra.mxu0 %v2772_v1  ;;  %2183 = vmatpush.msra.mxu1 %v2773_v3 }
 0xb2f   :  { %2164 = vmatpush.msra.mxu0 %v3553_v24  ;;  %2184 = vmatpush.msra.mxu1 %v3556_v47 }
 0xb74   :  { %v1632_v11 = vpop.f32.mrf.mxu1  ;;  %v1612_v40 = vpop.f32.mrf.mxu0 }
 0xb7b   :  { %v1672_v24 = vpop.f32.mrf.mxu3  ;;  %v1652_v61 = vpop.f32.mrf.mxu2 }
 0xb7c   :  { %v3771_v38 = vadd.f32 %v1810_v55, %v1672_v24  ;;  %v1811_v42 = vadd.f32 %v1809_v26, %v1652_v61 }
 0xb7e   :  { %2644 = vtanh.f32 %v3771_v38  ;;  %v2445_v1 = vmul.f32 -1.442695, %v1811_v42 }
 0xb84   :  { %v2645_v47 = vpop.eup %2644 }
 0xb85   :  { %1854 = vrot.lane.b32.xlu1 %v2645_v47, %s2862_s1 }
 0xb9d   :  { %v1715_v30 = vpop.f32.mrf.mxu1  ;;  %v1695_v3 = vpop.f32.mrf.mxu0 }
 0xb9e   :  { %v1716_v50 = vadd.f32 %v1715_v30, %v4060_v34  ;;  %v1696_v48 = vadd.f32 %v1695_v3, %v4024_v31 }
 0xba0   :  { %v3776_v43 = vadd.f32 %v1716_v50, %v1632_v11  ;;  %v1718_v58 = vadd.f32 %v1696_v48, %v1612_v40 }
 0xba2   :  { %2646 = vtanh.f32 %v3776_v43  ;;  %v2442_v16 = vmul.f32 -1.442695, %v1718_v58 }
 0xba3   :  { %2648 = vpow2.f32 %v2445_v1 }
 0xba4   :  { %2650 = vpow2.f32 %v2442_v16 }
 0xba8   :  { %v2647_v2 = vpop.eup %2646 }
 0xba9   :  { %1761 = vrot.lane.b32.xlu2 %v2647_v2, %s2862_s1  ;;  %v2649_v52 = vpop.eup %2648 }
 0xbaa   :  { %v1819_v0 = vadd.f32 1.0, %v2649_v52  ;;  %v2651_v36 = vpop.eup %2650 }
 0xbab   :  { %v1726_v28 = vadd.f32 1.0, %v2651_v36 }
 0xbac   :  { %2652 = vrcp.f32 %v1819_v0  ;;  %v1832_v11 = vand.u32 2147483648, %v1819_v0  ;;  %vm1826_vm15 = vweird.f32 %v1819_v0  ;;  %v1830_v30 = vand.u32 2147483647, %v1819_v0 }
 0xbad   :  { %2654 = vrcp.f32 %v1726_v28  ;;  %v1739_v44 = vand.u32 2147483648, %v1726_v28  ;;  %vm1733_vm3 = vweird.f32 %v1726_v28  ;;  %v1737_v26 = vand.u32 2147483647, %v1726_v28 }
 0xbae   :  { %v1833_v37 = vor.u32 1.1754944e-38, %v1832_v11  ;;  %vm1831_vm1 = vcmp.eq.f32.partialorder %v1830_v30, 8.507059e+37 }
 0xbaf   :  { %v1740_v61 = vor.u32 1.1754944e-38, %v1739_v44  ;;  %vm1738_vm5 = vcmp.eq.f32.partialorder %v1737_v26, 8.507059e+37 }
 0xbb2   :  { %v2653_v14 = vpop.eup %2652 }
 0xbb3   :  { %v1822_v41 = vmul.f32 %v2653_v14, %v1819_v0  ;;  %v2655_v55 = vpop.eup %2654  ;;  %vm1827_vm14 = vweird.f32 %v2653_v14 }
 0xbb4   :  { %v1729_v47 = vmul.f32 %v2655_v55, %v1726_v28  ;;  %vm1828_vm0 = vmor %vm1826_vm15, %vm1827_vm14  ;;  %vm1734_vm2 = vweird.f32 %v2655_v55 }
 0xbb5   :  { %v1823_v54 = vsub.f32 1.0, %v1822_v41  ;;  %vm1735_vm4 = vmor %vm1733_vm3, %vm1734_vm2 }
 0xbb6   :  { %v1730_v2 = vsub.f32 1.0, %v1729_v47  ;;  %v2443_v47 = vmul.f32 -1.442695, %v3776_v43 }
 0xbb7   :  { %v1824_v21 = vmul.f32 %v2653_v14, %v1823_v54 }
 0xbb8   :  { %v1731_v56 = vmul.f32 %v2655_v55, %v1730_v2 }
 0xbb9   :  { %v1825_v24 = vadd.f32 %v2653_v14, %v1824_v21  ;;  %v2455_v21 = vld [vmem:[%s3914_s0 + $0xe] sm:$0x3] }
 0xbba   :  { %v1732_v22 = vadd.f32 %v2655_v55, %v1731_v56 }
 0xbbb   :  { %v1829_v50 = vsel %vm1828_vm0, %v2653_v14, %v1825_v24 }
 0xbbc   :  { %v1834_v59 = vsel %vm1831_vm1, %v1833_v37, %v1829_v50  ;;  %v1736_v40 = vsel %vm1735_vm4, %v2655_v55, %v1732_v22 }
 0xbbd   :  { %v1741_v1 = vsel %vm1738_vm5, %v1740_v61, %v1736_v40  ;;  %v1852_v48 = vmul.f32 %v1834_v59, %v3716_v15  ;;  %v2446_v15 = vmul.f32 -1.442695, %v3771_v38 }
 0xbbe   :  { %v1759_v0 = vmul.f32 %v1741_v1, %v3721_v45 }
 0xbf7   :  { %v1855_v25 = vpop.permute.xlu1 %1854 }
 0xbf8   :  { %v1857_v8 = vmul.f32 %v1855_v25, %v1834_v59 }
 0xbfa   :  { %1859 = vrot.lane.b32.xlu0 %v1857_v8, %s2862_s1 }
 0xc03   :  { %v1762_v42 = vpop.permute.xlu2 %1761 }
 0xc04   :  { %v1764_v3 = vmul.f32 %v1762_v42, %v1741_v1 }
 0xc06   :  { %1766 = vrot.lane.b32.xlu1 %v1764_v3, %s2862_s1 }
 0xc0e   :  { %2057 = vperm.xlu1 %2505, %v2455_v21  }
 0xc16   :  { %2508 = vset.pattern.permute.xlu1 %v4028_v53 }
 0xc17   :  { %2081 = vperm.xlu1 %2508, %v2455_v21  }
 0xc6c   :  { %v1860_v58 = vpop.permute.xlu0 %1859 }
 0xc6d   :  { %v3789_v52 = vadd.f32 %v1860_v58, %v1852_v48 }
 0xc6f   :  { %2656 = vtanh.f32 %v3789_v52 }
 0xc75   :  { %v2657_v16 = vpop.eup %2656 }
 0xc76   :  { %1865 = vrot.lane.b32.xlu2 %v2657_v16, %s2862_s1 }
 0xc78   :  { %v1767_v36 = vpop.permute.xlu1 %1766 }
 0xc79   :  { %v3794_v14 = vadd.f32 %v1767_v36, %v1759_v0 }
 0xc7b   :  { %2658 = vtanh.f32 %v3794_v14 }
 0xc7c   :  { %2660 = vpow2.f32 %v2446_v15 }
 0xc7e   :  { %2065 = vperm.xlu2 %2506, %v2455_v21  }
 0xc81   :  { %v2659_v28 = vpop.eup %2658 }
 0xc82   :  { %1772 = vrot.lane.b32.xlu0 %v2659_v28, %s2862_s1  ;;  %v2661_v41 = vpop.eup %2660 }
 0xc83   :  { %v1820_v54 = vadd.f32 1.0, %v2661_v41 }
 0xc85   :  { %2662 = vrcp.f32 %v1820_v54  ;;  %v1847_v30 = vand.u32 2147483648, %v1820_v54  ;;  %vm1841_vm7 = vweird.f32 %v1820_v54  ;;  %v1845_v50 = vand.u32 2147483647, %v1820_v54 }
 0xc86   :  { %2664 = vpow2.f32 %v2443_v47 }
 0xc87   :  { %v1848_v37 = vor.u32 1.1754944e-38, %v1847_v30  ;;  %vm1846_vm10 = vcmp.eq.f32.partialorder %v1845_v50, 8.507059e+37 }
 0xc8a   :  { %2073 = vperm.xlu0 %2507, %v2455_v21  }
 0xc8b   :  { %v2663_v45 = vpop.eup %2662 }
 0xc8c   :  { %v1837_v55 = vmul.f32 %v2663_v45, %v1820_v54  ;;  %vm1842_vm6 = vweird.f32 %v2663_v45  ;;  %v2665_v8 = vpop.eup %2664 }
 0xc8d   :  { %vm1843_vm9 = vmor %vm1841_vm7, %vm1842_vm6  ;;  %v1727_v56 = vadd.f32 1.0, %v2665_v8 }
 0xc8e   :  { %v1838_v24 = vsub.f32 1.0, %v1837_v55 }
 0xc8f   :  { %2666 = vrcp.f32 %v1727_v56  ;;  %vm1748_vm12 = vweird.f32 %v1727_v56 }
 0xc90   :  { %v1839_v38 = vmul.f32 %v2663_v45, %v1838_v24 }
 0xc92   :  { %2509 = vset.pattern.permute.xlu0 %v4028_v53  ;;  %v1840_v11 = vadd.f32 %v2663_v45, %v1839_v38 }
 0xc94   :  { %v1844_v2 = vsel %vm1843_vm9, %v2663_v45, %v1840_v11 }
 0xc95   :  { %v1849_v25 = vsel %vm1846_vm10, %v1848_v37, %v1844_v2 }
 0xcd0   :  { %v1866_v59 = vpop.permute.xlu2 %1865 }
 0xcd1   :  { %v1868_v53 = vmul.f32 %v1866_v59, %v1849_v25 }
 0xcd3   :  { %2447 = vmatmul.msk.f32.vlgmr.msra.gmra.mxu2 %vm226_vm8, %v1868_v53  ;;  %2448 = vmatmul.msk.f32.vlgmr.msra.gmra.mxu3 %vm226_vm8, %v1868_v53 }
 0xcd4   :  { %2449 = vmatmul.msk.f32.vlgmr.msrb.gmra.mxu0 %vm226_vm8, %v1868_v53  ;;  %2450 = vmatmul.msk.f32.vlgmr.msrb.gmra.mxu1 %vm226_vm8, %v1868_v53 }
 0xcd5   :  { %2200 = vmatpush.msra.mxu2 %v3609_v6  ;;  %2220 = vmatpush.msra.mxu3 %v3612_v13  ;;  %v2667_v6 = vpop.eup %2666 }
 0xcd6   :  { %v1744_v13 = vmul.f32 %v2667_v6, %v1727_v56  ;;  %vm1749_vm11 = vweird.f32 %v2667_v6 }
 0xcd7   :  { %2201 = vmatpush.msra.mxu2 %v3617_v7  ;;  %2221 = vmatpush.msra.mxu3 %v3620_v32  ;;  %vm1750_vm13 = vmor %vm1748_vm12, %vm1749_vm11 }
 0xcd8   :  { %v1745_v7 = vsub.f32 1.0, %v1744_v13 }
 0xcd9   :  { %2202 = vmatpush.msra.mxu2 %v3625_v49  ;;  %2222 = vmatpush.msra.mxu3 %v3628_v10  ;;  %v1754_v10 = vand.u32 2147483648, %v1727_v56 }
 0xcda   :  { %v1746_v32 = vmul.f32 %v2667_v6, %v1745_v7 }
 0xcdb   :  { %2203 = vmatpush.msra.mxu2 %v3633_v51  ;;  %2223 = vmatpush.msra.mxu3 %v3636_v19  ;;  %v1752_v51 = vand.u32 2147483647, %v1727_v56 }
 0xcdc   :  { %v1747_v49 = vadd.f32 %v2667_v6, %v1746_v32 }
 0xcdd   :  { %2204 = vmatpush.msra.mxu2 %v3641_v23  ;;  %2224 = vmatpush.msra.mxu3 %v3644_v63  ;;  %v1755_v23 = vor.u32 1.1754944e-38, %v1754_v10  ;;  %vm1753_vm14 = vcmp.eq.f32.partialorder %v1752_v51, 8.507059e+37 }
 0xcde   :  { %v1751_v19 = vsel %vm1750_vm13, %v2667_v6, %v1747_v49 }
 0xcdf   :  { %2205 = vmatpush.msra.mxu2 %v3650_v60  ;;  %2225 = vmatpush.msra.mxu3 %v3653_v12  ;;  %v1756_v63 = vsel %vm1753_vm14, %v1755_v23, %v1751_v19 }
 0xce1   :  { %2206 = vmatpush.msra.mxu2 %v3658_v35  ;;  %2226 = vmatpush.msra.mxu3 %v3661_v5  ;;  %v2058_v35 = vpop.permute.xlu1 %2057 }
 0xce2   :  { %v2061_v5 = vmul.f32 %v2058_v35, %v4054_v29 }
 0xce3   :  { %2207 = vmatpush.msra.mxu2 %v3666_v62  ;;  %2227 = vmatpush.msra.mxu3 %v3669_v18  ;;  %v2066_v62 = vpop.permute.xlu2 %2065 }
 0xce4   :  { %v2063_v18 = vadd.f32 %v2061_v5, %v4056_v46  ;;  %v2069_v43 = vmul.f32 %v2066_v62, %v4055_v33  ;;  %v2068_v36 = vmul.f32 %v2066_v62, %v4053_v27 }
 0xce6   :  { %v2071_v44 = vadd.f32 %v2069_v43, %v2063_v18 }
 0xce9   :  { %v2082_v40 = vpop.permute.xlu1 %2081 }
 0xcea   :  { %v2085_v42 = vmul.f32 %v2082_v40, %v4058_v17  ;;  %v2060_v17 = vmul.f32 %v2058_v35, %v4059_v39  ;;  %v2084_v54 = vmul.f32 %v2082_v40, %v4023_v57 }
 0xcec   :  { %v2062_v0 = vadd.f32 %v2060_v17, %v4021_v9 }
 0xcee   :  { %v2070_v28 = vadd.f32 %v2068_v36, %v2062_v0 }
 0xcf4   :  { %v1773_v60 = vpop.permute.xlu0 %1772 }
 0xcf5   :  { %v1775_v12 = vmul.f32 %v1773_v60, %v1756_v63 }
 0xcf7   :  { %2451 = vmatmul.msk.f32.vlgmr.msrb.gmra.mxu2 %vm226_vm8, %v1775_v12  ;;  %2452 = vmatmul.msk.f32.vlgmr.msrb.gmra.mxu3 %vm226_vm8, %v1775_v12 }
 0xcfc   :  { %v2074_v22 = vpop.permute.xlu0 %2073 }
 0xcfd   :  { %v2077_v26 = vmul.f32 %v2074_v22, %v4057_v4  ;;  %v2076_v15 = vmul.f32 %v2074_v22, %v4022_v20 }
 0xcff   :  { %v2079_v61 = vadd.f32 %v2077_v26, %v2071_v44  ;;  %v2078_v41 = vadd.f32 %v2076_v15, %v2070_v28 }
 0xd01   :  { %v2087_v1 = vadd.f32 %v2085_v42, %v2079_v61  ;;  %v2086_v21 = vadd.f32 %v2084_v54, %v2078_v41 }
 0xd51   :  { %v1949_v3 = vpop.f32.mrf.mxu1  ;;  %v1929_v45 = vpop.f32.mrf.mxu0 }
 0xd52   :  { %v3832_v48 = vadd.f32 %v2087_v1, %v1949_v3  ;;  %v2088_v55 = vadd.f32 %v2086_v21, %v1929_v45 }
 0xd54   :  { %2668 = vtanh.f32 %v3832_v48  ;;  %v2456_v24 = vmul.f32 -1.442695, %v2088_v55  ;;  %v2457_v3 = vmul.f32 -1.442695, %v3832_v48 }
 0xd56   :  { %v1909_v46 = vpop.f32.mrf.mxu3  ;;  %v1889_v38 = vpop.f32.mrf.mxu2 }
 0xd5a   :  { %v2669_v29 = vpop.eup %2668 }
 0xd5b   :  { %2131 = vrot.lane.b32.xlu1 %v2669_v29, %s2862_s1 }
 0xd7a   :  { %v1992_v58 = vpop.f32.mrf.mxu3  ;;  %v1972_v47 = vpop.f32.mrf.mxu2 }
 0xd7b   :  { %v1993_v33 = vadd.f32 %v1992_v58, %v4060_v34  ;;  %v1973_v39 = vadd.f32 %v1972_v47, %v4024_v31 }
 0xd7d   :  { %v3837_v16 = vadd.f32 %v1993_v33, %v1909_v46  ;;  %v1995_v9 = vadd.f32 %v1973_v39, %v1889_v38 }
 0xd7f   :  { %2670 = vtanh.f32 %v3837_v16  ;;  %v2453_v27 = vmul.f32 -1.442695, %v1995_v9  ;;  %v2454_v46 = vmul.f32 -1.442695, %v3837_v16 }
 0xd80   :  { %2672 = vpow2.f32 %v2456_v24 }
 0xd85   :  { %v2671_v4 = vpop.eup %2670 }
 0xd86   :  { %2038 = vrot.lane.b32.xlu2 %v2671_v4, %s2862_s1  ;;  %v2673_v11 = vpop.eup %2672 }
 0xd87   :  { %v2096_v30 = vadd.f32 1.0, %v2673_v11 }
 0xd89   :  { %2674 = vrcp.f32 %v2096_v30  ;;  %v2109_v8 = vand.u32 2147483648, %v2096_v30  ;;  %vm2103_vm0 = vweird.f32 %v2096_v30  ;;  %v2107_v53 = vand.u32 2147483647, %v2096_v30 }
 0xd8a   :  { %2676 = vpow2.f32 %v2453_v27 }
 0xd8b   :  { %v2110_v13 = vor.u32 1.1754944e-38, %v2109_v8  ;;  %vm2108_vm2 = vcmp.eq.f32.partialorder %v2107_v53, 8.507059e+37 }
 0xd8f   :  { %v2675_v50 = vpop.eup %2674 }
 0xd90   :  { %v2099_v20 = vmul.f32 %v2675_v50, %v2096_v30  ;;  %v2677_v2 = vpop.eup %2676  ;;  %vm2104_vm15 = vweird.f32 %v2675_v50 }
 0xd91   :  { %v2003_v57 = vadd.f32 1.0, %v2677_v2  ;;  %vm2105_vm1 = vmor %vm2103_vm0, %vm2104_vm15 }
 0xd92   :  { %v2100_v37 = vsub.f32 1.0, %v2099_v20 }
 0xd93   :  { %2678 = vrcp.f32 %v2003_v57  ;;  %v2016_v63 = vand.u32 2147483648, %v2003_v57  ;;  %vm2010_vm4 = vweird.f32 %v2003_v57  ;;  %v2014_v60 = vand.u32 2147483647, %v2003_v57 }
 0xd94   :  { %v2101_v25 = vmul.f32 %v2675_v50, %v2100_v37 }
 0xd95   :  { %v2017_v35 = vor.u32 1.1754944e-38, %v2016_v63  ;;  %vm2015_vm6 = vcmp.eq.f32.partialorder %v2014_v60, 8.507059e+37 }
 0xd96   :  { %v2102_v59 = vadd.f32 %v2675_v50, %v2101_v25 }
 0xd98   :  { %v2106_v6 = vsel %vm2105_vm1, %v2675_v50, %v2102_v59 }
 0xd99   :  { %v2679_v56 = vpop.eup %2678  ;;  %v2111_v32 = vsel %vm2108_vm2, %v2110_v13, %v2106_v6 }
 0xd9a   :  { %v2006_v49 = vmul.f32 %v2679_v56, %v2003_v57  ;;  %vm2011_vm3 = vweird.f32 %v2679_v56  ;;  %v2129_v26 = vmul.f32 %v2111_v32, %v3789_v52 }
 0xd9b   :  { %vm2012_vm5 = vmor %vm2010_vm4, %vm2011_vm3 }
 0xd9c   :  { %v2007_v51 = vsub.f32 1.0, %v2006_v49 }
 0xd9e   :  { %v2008_v19 = vmul.f32 %v2679_v56, %v2007_v51 }
 0xda0   :  { %v2009_v23 = vadd.f32 %v2679_v56, %v2008_v19 }
 0xda2   :  { %v2013_v12 = vsel %vm2012_vm5, %v2679_v56, %v2009_v23 }
 0xda3   :  { %v2018_v5 = vsel %vm2015_vm6, %v2017_v35, %v2013_v12 }
 0xda4   :  { %v2036_v43 = vmul.f32 %v2018_v5, %v3794_v14 }
 0xdcd   :  { %v2132_v7 = vpop.permute.xlu1 %2131 }
 0xdce   :  { %v2134_v10 = vmul.f32 %v2132_v7, %v2111_v32 }
 0xdd0   :  { %2136 = vrot.lane.b32.xlu0 %v2134_v10, %s2862_s1 }
 0xde0   :  { %v2039_v62 = vpop.permute.xlu2 %2038 }
 0xde1   :  { %v2041_v18 = vmul.f32 %v2039_v62, %v2018_v5  ;;  %v2297_v62 = vld [vmem:[%s3920_s6 + $0x38] sm:$0xff] }
 0xde2   :  { %2313 = vmatpush.msrb.mxu0 %v2297_v62 }
 0xde3   :  { %2043 = vrot.lane.b32.xlu2 %v2041_v18, %s2862_s1  ;;  %v2296_v18 = vld [vmem:[%s3920_s6 + $0x30] sm:$0xff] }
 0xde4   :  { %2314 = vmatpush.msrb.mxu0 %v2296_v18 }
 0xe3d   :  { %v2044_v22 = vpop.permute.xlu2 %2043 }
 0xe3e   :  { %v3850_v44 = vadd.f32 %v2044_v22, %v2036_v43  ;;  %v2295_v43 = vld [vmem:[%s3920_s6 + $0x28] sm:$0xff]  ;;  %v2294_v22 = vld [vmem:[%s3920_s6 + $0x20] sm:$0xff] }
 0xe3f   :  { %2315 = vmatpush.msrb.mxu0 %v2295_v43 }
 0xe40   :  { %2680 = vtanh.f32 %v3850_v44 }
 0xe41   :  { %2316 = vmatpush.msrb.mxu0 %v2294_v22 }
 0xe42   :  { %v2137_v40 = vpop.permute.xlu0 %2136 }
 0xe43   :  { %v2139_v61 = vadd.f32 %v2137_v40, %v2129_v26  ;;  %v2293_v26 = vld [vmem:[%s3920_s6 + $0x18] sm:$0xff]  ;;  %v2292_v40 = vld [vmem:[%s3920_s6 + $0x10] sm:$0xff] }
 0xe44   :  { %2317 = vmatpush.msrb.mxu0 %v2293_v26 }
 0xe45   :  { %2682 = vtanh.f32 %v2139_v61  ;;  %v2291_v61 = vld [vmem:[%s3920_s6 + $0x8] sm:$0xff] }
 0xe46   :  { %v2681_v42 = vpop.eup %2680  ;;  %2684 = vpow2.f32 %v2457_v3  ;;  %2318 = vmatpush.msrb.mxu0 %v2292_v40 }
 0xe47   :  { %2049 = vrot.lane.b32.xlu1 %v2681_v42, %s2862_s1 }
 0xe48   :  { %2319 = vmatpush.msrb.mxu0 %v2291_v61 }
 0xe4b   :  { %v2683_v1 = vpop.eup %2682 }
 0xe4c   :  { %2142 = vrot.lane.b32.xlu2 %v2683_v1, %s2862_s1  ;;  %v2685_v14 = vpop.eup %2684 }
 0xe4d   :  { %v2097_v29 = vadd.f32 1.0, %v2685_v14 }
 0xe4f   :  { %2686 = vrcp.f32 %v2097_v29  ;;  %v2124_v28 = vand.u32 2147483648, %v2097_v29  ;;  %vm2118_vm9 = vweird.f32 %v2097_v29  ;;  %v2122_v15 = vand.u32 2147483647, %v2097_v29 }
 0xe50   :  { %2688 = vpow2.f32 %v2454_v46 }
 0xe51   :  { %v2125_v54 = vor.u32 1.1754944e-38, %v2124_v28  ;;  %vm2123_vm11 = vcmp.eq.f32.partialorder %v2122_v15, 8.507059e+37 }
 0xe55   :  { %v2687_v58 = vpop.eup %2686 }
 0xe56   :  { %v2114_v52 = vmul.f32 %v2687_v58, %v2097_v29  ;;  %v2689_v33 = vpop.eup %2688  ;;  %vm2119_vm7 = vweird.f32 %v2687_v58 }
 0xe57   :  { %v2004_v17 = vadd.f32 1.0, %v2689_v33  ;;  %vm2120_vm10 = vmor %vm2118_vm9, %vm2119_vm7  ;;  %v2329_v33 = vld [vmem:[%s3922_s8 + $0x18] sm:$0xff]  ;;  %vm2334_vm9 = vcmask 261120  }
 0xe58   :  { %v2115_v4 = vsub.f32 1.0, %v2114_v52  ;;  %v2290_v52 = vld [vmem:[%s3920_s6] sm:$0xff]  ;;  %2350 = vmatpush.msrb.mxu1 %v2329_v33 }
 0xe59   :  { %2690 = vrcp.f32 %v2004_v17  ;;  %v2031_v11 = vand.u32 2147483648, %v2004_v17  ;;  %vm2025_vm13 = vweird.f32 %v2004_v17  ;;  %v2029_v39 = vand.u32 2147483647, %v2004_v17  ;;  %2320 = vmatpush.msrb.mxu0 %v2290_v52 }
 0xe5a   :  { %v2116_v0 = vmul.f32 %v2687_v58, %v2115_v4 }
 0xe5b   :  { %v2032_v9 = vor.u32 1.1754944e-38, %v2031_v11  ;;  %vm2030_vm15 = vcmp.eq.f32.partialorder %v2029_v39, 8.507059e+37 }
 0xe5c   :  { %v2117_v36 = vadd.f32 %v2687_v58, %v2116_v0 }
 0xe5e   :  { %v2121_v41 = vsel %vm2120_vm10, %v2687_v58, %v2117_v36 }
 0xe5f   :  { %v2691_v48 = vpop.eup %2690  ;;  %v2126_v21 = vsel %vm2123_vm11, %v2125_v54, %v2121_v41 }
 0xe60   :  { %v2021_v45 = vmul.f32 %v2691_v48, %v2004_v17  ;;  %vm2026_vm12 = vweird.f32 %v2691_v48 }
 0xe61   :  { %vm2027_vm14 = vmor %vm2025_vm13, %vm2026_vm12 }
 0xe62   :  { %v2022_v24 = vsub.f32 1.0, %v2021_v45 }
 0xe64   :  { %v2023_v38 = vmul.f32 %v2691_v48, %v2022_v24  ;;  %v2326_v24 = vld [vmem:[%s3922_s8] sm:$0xff] }
 0xe66   :  { %v2024_v47 = vadd.f32 %v2691_v48, %v2023_v38  ;;  %v2510_v38 = vld [vmem:[%s3921_s7] ss:$0 sm:$0xff] }
 0xe68   :  { %v2028_v30 = vsel %vm2027_vm14, %v2691_v48, %v2024_v47 }
 0xe69   :  { %v2033_v27 = vsel %vm2030_vm15, %v2032_v9, %v2028_v30  ;;  %v2511_v30 = vld [vmem:[%s3923_s9] ss:$0 sm:$0xff] }
 0xea6   :  { %v2143_v16 = vpop.permute.xlu2 %2142 }
 0xea7   :  { %v2145_v55 = vmul.f32 %v2143_v16, %v2126_v21 }
 0xea9   :  { %2458 = vmatmul.msk.f32.vlgmr.msra.gmra.mxu0 %vm226_vm8, %v2145_v55  ;;  %2459 = vmatmul.msk.f32.vlgmr.msra.gmra.mxu1 %vm226_vm8, %v2145_v55  ;;  %v2327_v55 = vld [vmem:[%s3922_s8 + $0x8] sm:$0xff] }
 0xeb9   :  { %v2050_v50 = vpop.permute.xlu1 %2049 }
 0xeba   :  { %v2052_v20 = vmul.f32 %v2050_v50, %v2033_v27 }
 0xebc   :  { %2460 = vmatmul.msk.f32.vlgmr.msra.gmra.mxu2 %vm226_vm8, %v2052_v20  ;;  %2461 = vmatmul.msk.f32.vlgmr.msra.gmra.mxu3 %vm226_vm8, %v2052_v20 }
 0xf26   :  { %v2186_v57 = vpop.f32.mrf.mxu1  ;;  %v2166_v56 = vpop.f32.mrf.mxu0 }
 0xf3f   :  { %v2229_v2 = vpop.f32.mrf.mxu3  ;;  %v2209_v8 = vpop.f32.mrf.mxu2 }
 0xf40   :  { %v2230_v37 = vadd.f32 %v2229_v2, %v4060_v34  ;;  %v2210_v53 = vadd.f32 %v2209_v8, %v4024_v31 }
 0xf42   :  { %v2233_v25 = vadd.f32 %v2230_v37, %v2186_v57  ;;  %v2232_v6 = vadd.f32 %v2210_v53, %v2166_v56 }
 0xf44   :  { %2692 = vtanh.f32 %v2233_v25  ;;  %v2462_v13 = vmul.f32 -1.442695, %v2232_v6  ;;  %v2463_v29 = vmul.f32 -1.442695, %v2233_v25 }
 0xf46   :  { %2694 = vpow2.f32 %v2462_v13 }
 0xf4a   :  { %v2693_v59 = vpop.eup %2692 }
 0xf4b   :  { %2275 = vrot.lane.b32.xlu0 %v2693_v59, %s2862_s1 }
 0xf4c   :  { %v2695_v7 = vpop.eup %2694 }
 0xf4d   :  { %v2240_v32 = vadd.f32 1.0, %v2695_v7 }
 0xf4f   :  { %2696 = vrcp.f32 %v2240_v32  ;;  %v2253_v23 = vand.u32 2147483648, %v2240_v32  ;;  %vm2247_vm1 = vweird.f32 %v2240_v32  ;;  %v2251_v63 = vand.u32 2147483647, %v2240_v32 }
 0xf51   :  { %v2254_v12 = vor.u32 1.1754944e-38, %v2253_v23  ;;  %vm2252_vm3 = vcmp.eq.f32.partialorder %v2251_v63, 8.507059e+37 }
 0xf55   :  { %v2697_v49 = vpop.eup %2696 }
 0xf56   :  { %v2243_v10 = vmul.f32 %v2697_v49, %v2240_v32  ;;  %vm2248_vm0 = vweird.f32 %v2697_v49 }
 0xf57   :  { %vm2249_vm2 = vmor %vm2247_vm1, %vm2248_vm0 }
 0xf58   :  { %v2244_v51 = vsub.f32 1.0, %v2243_v10 }
 0xf5a   :  { %v2245_v34 = vmul.f32 %v2697_v49, %v2244_v51 }
 0xf5c   :  { %v2246_v19 = vadd.f32 %v2697_v49, %v2245_v34 }
 0xf5e   :  { %v2250_v60 = vsel %vm2249_vm2, %v2697_v49, %v2246_v19 }
 0xf5f   :  { %v2255_v35 = vsel %vm2252_vm3, %v2254_v12, %v2250_v60 }
 0xf60   :  { %v2273_v42 = vmul.f32 %v2255_v35, %v3850_v44  ;;  %v2328_v44 = vld [vmem:[%s3922_s8 + $0x10] sm:$0xff]  ;;  %s2367_s8 = sshll.u32 %s3924_s10, 4  ;;  %s2368_s8 = int_to_ptr.hbm [resolvable:$true] %s2367_s8 }
 0xf61   :  { %2351 = vmatpush.msrb.mxu1 %v2328_v44 }
 0xf63   :  { %2352 = vmatpush.msrb.mxu1 %v2327_v55 }
 0xf65   :  { %2353 = vmatpush.msrb.mxu1 %v2326_v24 }
 0xfbd   :  { %v2276_v31 = vpop.permute.xlu0 %2275 }
 0xfbe   :  { %v2278_v5 = vmul.f32 %v2276_v31, %v2255_v35 }
 0xfc0   :  { %2280 = vrot.lane.b32.xlu1 %v2278_v5, %s2862_s1 }
0x1032   :  { %v2281_v1 = vpop.permute.xlu1 %2280 }
0x1033   :  { %v2283_v3 = vadd.f32 %v2281_v1, %v2273_v42 }
0x1035   :  { %2698 = vtanh.f32 %v2283_v3 }
0x1036   :  { %2700 = vpow2.f32 %v2463_v29 }
0x103b   :  { %v2699_v14 = vpop.eup %2698 }
0x103c   :  { %2286 = vrot.lane.b32.xlu2 %v2699_v14, %s2862_s1  ;;  %v2701_v46 = vpop.eup %2700 }
0x103d   :  { %v2241_v58 = vadd.f32 1.0, %v2701_v46 }
0x103f   :  { %2702 = vrcp.f32 %v2241_v58  ;;  %v2268_v15 = vand.u32 2147483648, %v2241_v58  ;;  %vm2262_vm5 = vweird.f32 %v2241_v58  ;;  %v2266_v48 = vand.u32 2147483647, %v2241_v58 }
0x1041   :  { %v2269_v54 = vor.u32 1.1754944e-38, %v2268_v15  ;;  %vm2267_vm7 = vcmp.eq.f32.partialorder %v2266_v48, 8.507059e+37 }
0x1045   :  { %v2703_v4 = vpop.eup %2702 }
0x1046   :  { %v2258_v17 = vmul.f32 %v2703_v4, %v2241_v58  ;;  %vm2263_vm4 = vweird.f32 %v2703_v4 }
0x1047   :  { %vm2264_vm6 = vmor %vm2262_vm5, %vm2263_vm4 }
0x1048   :  { %v2259_v0 = vsub.f32 1.0, %v2258_v17 }
0x104a   :  { %v2260_v36 = vmul.f32 %v2703_v4, %v2259_v0 }
0x104c   :  { %v2261_v28 = vadd.f32 %v2703_v4, %v2260_v36 }
0x104e   :  { %v2265_v41 = vsel %vm2264_vm6, %v2703_v4, %v2261_v28 }
0x104f   :  { %v2270_v21 = vsel %vm2267_vm7, %v2269_v54, %v2265_v41 }
0x1096   :  { %v2287_v16 = vpop.permute.xlu2 %2286 }
0x1097   :  { %v2289_v45 = vmul.f32 %v2287_v16, %v2270_v21 }
0x1099   :  { %2464 = vmatmul.msk.f32.vlgmr.msrb.gmra.mxu0 %vm226_vm8, %v2289_v45  ;;  %vm2358_vm8 = vcmask 25600  }
0x1116   :  { %v2322_v47 = vpop.f32.mrf.mxu0 }
0x1117   :  { %v2323_v11 = vadd.f32 %v2510_v38, %v2322_v47 }
0x1119   :  { %v2325_v39 = vmax.f32 %v2323_v11, 0.0 }
0x111b   :  { %2465 = vmatmul.msk.f32.vlgmr.msrb.gmra.mxu1 %vm2334_vm9, %v2325_v39 }
0x1198   :  { %v2355_v9 = vpop.f32.mrf.mxu1 }
0x1199   :  { %v2356_v27 = vadd.f32 %v2511_v30, %v2355_v9 }
0x119b   :  { %2359 = vst.msk [vmem:[#allocation7] sm:$0x3] %vm2358_vm8, %v2356_v27 }
0x119c   :  { %2370 = dma.vmem_to_hbm [thread:$0]  %s2366_s30, 32, %s2368_s8, [#allocation4]  }
0x119d   :  { %2850 = dma.done.wait [#allocation4], 32  }
0x119e   :  { %2851 = vsyncadd [#allocation4], 4294967264 }
0x119f   :  { %2375 = vsyncpa [#allocation3], 1 }
0x11a0   :  { %2376 = vsyncpa [#allocation6], 1 }
0x11a1   :  { %2377 = vsyncpa [#allocation4], 1 }

</bundles_post_ra>
